<compile_context>
chip_gen: v6e
topology: v6e:2x2x1
jax: 0.10.0
libtpu: 0.0.40
codegen_flags: <defaults>
</compile_context>

<pallas_src>
import functools

import jax
import jax.numpy as jnp
from jax.experimental import pallas as pl
from jax.experimental.pallas import tpu as pltpu


# ---------------------------------------------------------------------------
# Static hardware-derived configuration (computed once at import).
# ---------------------------------------------------------------------------
def _vmem_capacity_bytes():
    try:
        return int(pltpu.get_tpu_info().vmem_capacity_bytes)
    except Exception:
        return 64 * 1024 * 1024  # conservative: v7x per-TensorCore VMEM


_VMEM_CAPACITY_BYTES = _vmem_capacity_bytes()
# Leave headroom for compiler scratch; 48 MiB on v7x (64 MiB phys), 64 MiB on
# v5e/v6e (128 MiB phys).  Worst-case kernel footprint at tm=2048 is ~35 MiB.
_VMEM_LIMIT_BYTES = min(64 * 1024 * 1024, (_VMEM_CAPACITY_BYTES * 3) // 4)
# Bigger tiles on 128-MiB-VMEM chips (v5e/v6e); cap at 1024 on v7x.
_DEFAULT_TILE_M = 2048 if _VMEM_CAPACITY_BYTES >= 100 * 1024 * 1024 else 1024


# ---------------------------------------------------------------------------
# Kernel
# ---------------------------------------------------------------------------
def _mlp_kernel(x_ref, w1_ref, b1_ref, w2_ref, b2_ref, w3_ref, b3_ref,
                w4_ref, b4_ref, o_ref):
    bf16 = jnp.bfloat16

    # In-kernel cast of the f32 X tile to bf16 (free on the VPU; avoids a
    # separate wrapper XLA pass over X).
    x = x_ref[...].astype(bf16)

    # Hidden layers: bf16 x bf16 on the MXU with f32 accumulation.
    h = jnp.dot(x, w1_ref[...], preferred_element_type=jnp.float32)
    h = jnp.maximum(h + b1_ref[...], 0.0)

    h = jnp.dot(h.astype(bf16), w2_ref[...], preferred_element_type=jnp.float32)
    h = jnp.maximum(h + b2_ref[...], 0.0)

    h = jnp.dot(h.astype(bf16), w3_ref[...], preferred_element_type=jnp.float32)
    h = jnp.maximum(h + b3_ref[...], 0.0)

    # Value head (hidden -> 1): VPU multiply + lane (XLU) reduction in full f32
    # instead of a degenerate K=1024, N=1 MXU pass.
    v = jnp.sum(h * w4_ref[...], axis=-1, keepdims=True) + b4_ref[...]
    o_ref[...] = v.astype(o_ref.dtype)


# ---------------------------------------------------------------------------
# Wrapper
# ---------------------------------------------------------------------------
def _choose_tile_m(m, tile_m):
    """Row-tile size: multiple of 8 (sublane) unless it covers all rows.

    Keeps the 'parallel' grid length even where possible so megacore (v7x,
    2 TensorCores) gets balanced work.
    """
    if m <= tile_m:
        if m >= 128:
            # Split a single big tile in two so both v7x cores get work.
            return ((pl.cdiv(m, 2) + 7) // 8) * 8
        return m
    steps = pl.cdiv(m, tile_m)
    if steps % 2:
        steps += 1  # even number of grid steps -> balanced across 2 TCs
    return ((pl.cdiv(m, steps) + 7) // 8) * 8


@functools.partial(jax.jit, static_argnames=("tile_m",))
def _forward(latent_state_batch, prepared_params, *, tile_m):
    w1, b1, w2, b2, w3, b3, w4_row, b4 = prepared_params
    batch, seq, latent = latent_state_batch.shape
    hidden = w1.shape[1]
    m = batch * seq

    tm = _choose_tile_m(m, tile_m)
    grid = (pl.cdiv(m, tm),)

    # Free metadata reshape (row-major contiguous): [batch, seq, L] -> [m, L].
    x = latent_state_batch.reshape(m, latent)

    # Grid-invariant operands (constant index_map): the pipeline fetches them
    # exactly once; no pl.Buffered(1) needed, which also removes the old
    # try/except double-compile fallback.
    def const_spec(shape):
        return pl.BlockSpec(shape, lambda i: (0, 0))

    flops = 2 * m * (latent * hidden + 2 * hidden * hidden + hidden)
    bytes_accessed = (
        m * latent * 4                                   # X (f32)
        + m * 4                                          # output (f32)
        + (latent * hidden + 2 * hidden * hidden) * 2    # bf16 weights
        + (4 * hidden + 1) * 4                           # biases + head row
    )

    out = pl.pallas_call(
        _mlp_kernel,
        out_shape=jax.ShapeDtypeStruct((m, 1), latent_state_batch.dtype),
        grid_spec=pltpu.PrefetchScalarGridSpec(
            num_scalar_prefetch=0,
            grid=grid,
            in_specs=[
                pl.BlockSpec((tm, latent), lambda i: (i, 0)),  # X row tile (f32)
                const_spec((latent, hidden)),                  # W1 (bf16)
                const_spec((1, hidden)),                       # b1 (f32)
                const_spec((hidden, hidden)),                  # W2 (bf16)
                const_spec((1, hidden)),                       # b2 (f32)
                const_spec((hidden, hidden)),                  # W3 (bf16)
                const_spec((1, hidden)),                       # b3 (f32)
                const_spec((1, hidden)),                       # W4 row slab (f32)
                const_spec((1, 1)),                            # b4 (f32)
            ],
            out_specs=pl.BlockSpec((tm, 1), lambda i: (i, 0)),
        ),
        compiler_params=pltpu.CompilerParams(
            dimension_semantics=("parallel",),
            vmem_limit_bytes=_VMEM_LIMIT_BYTES,
        ),
        cost_estimate=pl.CostEstimate(
            flops=flops, transcendentals=0, bytes_accessed=bytes_accessed),
    )(x, w1, b1, w2, b2, w3, b3, w4_row, b4)

    return out.reshape(batch, seq, 1)


def prepare_value_critic_params(params):
    """One-time conversion of PyTorch-style f32 params to kernel dtypes/layout.

    Call once (outside any per-step hot loop) and reuse the result; this is what
    removes the per-call f32->bf16 weight-conversion passes over W2/W3.
    """
    w1, b1, w2, b2, w3, b3, w4, b4 = params
    hidden = w1.shape[1]
    return (
        w1.astype(jnp.bfloat16),
        b1.reshape(1, hidden).astype(jnp.float32),
        w2.astype(jnp.bfloat16),
        b2.reshape(1, hidden).astype(jnp.float32),
        w3.astype(jnp.bfloat16),
        b3.reshape(1, hidden).astype(jnp.float32),
        w4.reshape(1, hidden).astype(jnp.float32),  # lane-dense head row (f32)
        b4.reshape(1, 1).astype(jnp.float32),
    )


def value_critic_forward(latent_state_batch, prepared_params, *, tile_m=None):
    """latent_state_batch: [batch, seq, latent] -> value estimate [batch, seq, 1].

    `prepared_params` must come from `prepare_value_critic_params` (bf16
    hidden-layer weights, 2-D f32 biases, lane-dense f32 value-head row).
    """
    if tile_m is None:
        tile_m = _DEFAULT_TILE_M
    return _forward(latent_state_batch, prepared_params, tile_m=tile_m)


# ---------------------------------------------------------------------------
# Init + references
# ---------------------------------------------------------------------------
def init_value_critic_params(key, latent_size=32, hidden_size=1024,
                             dtype=jnp.float32):
    """nn.Linear default init (U[-1/sqrt(fan_in), +1/sqrt(fan_in)]).

    Weights stored as [in_features, out_features] (y = x @ W + b)."""
    dims = [(latent_size, hidden_size),
            (hidden_size, hidden_size),
            (hidden_size, hidden_size),
            (hidden_size, 1)]
    params = []
    for fan_in, fan_out in dims:
        key, kw, kb = jax.random.split(key, 3)
        bound = 1.0 / float(fan_in) ** 0.5
        w = jax.random.uniform(kw, (fan_in, fan_out), dtype=dtype,
                               minval=-bound, maxval=bound)
        b = jax.random.uniform(kb, (fan_out,), dtype=dtype,
                               minval=-bound, maxval=bound)
        params.extend([w, b])
    return tuple(params)


def _reference_forward_f32(x, params):
    w1, b1, w2, b2, w3, b3, w4, b4 = params
    h = jnp.maximum(x @ w1 + b1, 0.0)
    h = jnp.maximum(h @ w2 + b2, 0.0)
    h = jnp.maximum(h @ w3 + b3, 0.0)
    return h @ w4 + b4


def _reference_forward_bf16(x, params):
    """Mirrors the kernel's precision: bf16 matmul inputs, f32 accumulation."""
    w1, b1, w2, b2, w3, b3, w4, b4 = params
    bf16 = jnp.bfloat16
    h = jnp.dot(x.astype(bf16), w1.astype(bf16),
                preferred_element_type=jnp.float32)
    h = jnp.maximum(h + b1, 0.0)
    h = jnp.dot(h.astype(bf16), w2.astype(bf16),
                preferred_element_type=jnp.float32)
    h = jnp.maximum(h + b2, 0.0)
    h = jnp.dot(h.astype(bf16), w3.astype(bf16),
                preferred_element_type=jnp.float32)
    h = jnp.maximum(h + b3, 0.0)
    return jnp.sum(h * w4[:, 0], axis=-1, keepdims=True) + b4


if __name__ == "__main__":
    key = jax.random.PRNGKey(0)
    k_param, k_x = jax.random.split(key)

    latent_size, hidden_size = 32, 1024
    batch, seq = 2, 8

    params = init_value_critic_params(k_param, latent_size, hidden_size)
    prepared = prepare_value_critic_params(params)   # one-time dtype conversion

    latent_state_batch = jax.random.normal(
        k_x, (batch, seq, latent_size), dtype=jnp.float32)

    value_estimate = value_critic_forward(latent_state_batch, prepared)
    value_estimate = jax.block_until_ready(value_estimate)

    assert value_estimate.shape == (batch, seq, 1), value_estimate.shape

    ref_bf16 = _reference_forward_bf16(latent_state_batch, params)
    assert jnp.allclose(value_estimate, ref_bf16, atol=1e-2, rtol=1e-2), (
        "mismatch vs bf16-precision reference")

    ref_f32 = _reference_forward_f32(latent_state_batch, params)
    assert jnp.allclose(value_estimate, ref_f32, atol=5e-2, rtol=5e-2), (
        "mismatch vs f32 reference")

    print("KERNEL_OK")
</pallas_src>

<mosaic_0001>
module attributes {stable_mosaic.version = 11 : i64} {
  func.func @_mlp_kernel(%arg0: i32, %arg1: memref<16x32xf32, #tpu.memory_space<vmem>>, %arg2: memref<32x1024xbf16, #tpu.memory_space<vmem>>, %arg3: memref<1x1024xf32, #tpu.memory_space<vmem>>, %arg4: memref<1024x1024xbf16, #tpu.memory_space<vmem>>, %arg5: memref<1x1024xf32, #tpu.memory_space<vmem>>, %arg6: memref<1024x1024xbf16, #tpu.memory_space<vmem>>, %arg7: memref<1x1024xf32, #tpu.memory_space<vmem>>, %arg8: memref<1x1024xf32, #tpu.memory_space<vmem>>, %arg9: memref<1x1xf32, #tpu.memory_space<vmem>>, %arg10: memref<16x1xf32, #tpu.memory_space<vmem>>) attributes {dimension_semantics = [#tpu.dimension_semantics<parallel>], iteration_bounds = array<i64: 1>, scalar_prefetch = 0 : i64, scratch_operands = 0 : i64, tpu.core_type = #tpu.core_type<tc>, window_params = [{transform_indices = @transform_0, window_bounds = array<i64: 16, 32>}, {pipeline_mode = #tpu.pipeline_mode<synchronous>, transform_indices = @transform_1, window_bounds = array<i64: 32, 1024>}, {pipeline_mode = #tpu.pipeline_mode<synchronous>, transform_indices = @transform_2, window_bounds = array<i64: 1, 1024>}, {pipeline_mode = #tpu.pipeline_mode<synchronous>, transform_indices = @transform_3, window_bounds = array<i64: 1024, 1024>}, {pipeline_mode = #tpu.pipeline_mode<synchronous>, transform_indices = @transform_4, window_bounds = array<i64: 1, 1024>}, {pipeline_mode = #tpu.pipeline_mode<synchronous>, transform_indices = @transform_5, window_bounds = array<i64: 1024, 1024>}, {pipeline_mode = #tpu.pipeline_mode<synchronous>, transform_indices = @transform_6, window_bounds = array<i64: 1, 1024>}, {pipeline_mode = #tpu.pipeline_mode<synchronous>, transform_indices = @transform_7, window_bounds = array<i64: 1, 1024>}, {pipeline_mode = #tpu.pipeline_mode<synchronous>, transform_indices = @transform_8, window_bounds = array<i64: 1, 1>}, {transform_indices = @transform_9, window_bounds = array<i64: 16, 1>}]} {
    %c0 = arith.constant 0 : index
    %c0_0 = arith.constant 0 : index
    %0 = vector.load %arg1[%c0, %c0_0] : memref<16x32xf32, #tpu.memory_space<vmem>>, vector<16x32xf32>
    %1 = arith.truncf %0 : vector<16x32xf32> to vector<16x32xbf16>
    %c0_1 = arith.constant 0 : index
    %c0_2 = arith.constant 0 : index
    %2 = vector.load %arg2[%c0_1, %c0_2] : memref<32x1024xbf16, #tpu.memory_space<vmem>>, vector<32x1024xbf16>
    %cst = arith.constant dense<0.000000e+00> : vector<16x1024xf32>
    %3 = tpu.matmul %1, %2, %cst {dimension_numbers = #tpu.dot_dimension_numbers<[1], [0], [0], [1], [0, 0, 1, 1], [], []>} : vector<16x32xbf16>, vector<32x1024xbf16>, vector<16x1024xf32> -> vector<16x1024xf32>
    %c0_3 = arith.constant 0 : index
    %c0_4 = arith.constant 0 : index
    %4 = vector.load %arg3[%c0_3, %c0_4] : memref<1x1024xf32, #tpu.memory_space<vmem>>, vector<1x1024xf32>
    %5 = vector.broadcast %4 : vector<1x1024xf32> to vector<16x1024xf32>
    %6 = arith.addf %3, %5 : vector<16x1024xf32>
    %cst_5 = arith.constant 0.000000e+00 : f32
    %7 = vector.broadcast %cst_5 : f32 to vector<16x1024xf32>
    %8 = arith.maximumf %6, %7 : vector<16x1024xf32>
    %9 = arith.truncf %8 : vector<16x1024xf32> to vector<16x1024xbf16>
    %c0_6 = arith.constant 0 : index
    %c0_7 = arith.constant 0 : index
    %10 = vector.load %arg4[%c0_6, %c0_7] : memref<1024x1024xbf16, #tpu.memory_space<vmem>>, vector<1024x1024xbf16>
    %cst_8 = arith.constant dense<0.000000e+00> : vector<16x1024xf32>
    %11 = tpu.matmul %9, %10, %cst_8 {dimension_numbers = #tpu.dot_dimension_numbers<[1], [0], [0], [1], [0, 0, 1, 1], [], []>} : vector<16x1024xbf16>, vector<1024x1024xbf16>, vector<16x1024xf32> -> vector<16x1024xf32>
    %c0_9 = arith.constant 0 : index
    %c0_10 = arith.constant 0 : index
    %12 = vector.load %arg5[%c0_9, %c0_10] : memref<1x1024xf32, #tpu.memory_space<vmem>>, vector<1x1024xf32>
    %13 = vector.broadcast %12 : vector<1x1024xf32> to vector<16x1024xf32>
    %14 = arith.addf %11, %13 : vector<16x1024xf32>
    %cst_11 = arith.constant 0.000000e+00 : f32
    %15 = vector.broadcast %cst_11 : f32 to vector<16x1024xf32>
    %16 = arith.maximumf %14, %15 : vector<16x1024xf32>
    %17 = arith.truncf %16 : vector<16x1024xf32> to vector<16x1024xbf16>
    %c0_12 = arith.constant 0 : index
    %c0_13 = arith.constant 0 : index
    %18 = vector.load %arg6[%c0_12, %c0_13] : memref<1024x1024xbf16, #tpu.memory_space<vmem>>, vector<1024x1024xbf16>
    %cst_14 = arith.constant dense<0.000000e+00> : vector<16x1024xf32>
    %19 = tpu.matmul %17, %18, %cst_14 {dimension_numbers = #tpu.dot_dimension_numbers<[1], [0], [0], [1], [0, 0, 1, 1], [], []>} : vector<16x1024xbf16>, vector<1024x1024xbf16>, vector<16x1024xf32> -> vector<16x1024xf32>
    %c0_15 = arith.constant 0 : index
    %c0_16 = arith.constant 0 : index
    %20 = vector.load %arg7[%c0_15, %c0_16] : memref<1x1024xf32, #tpu.memory_space<vmem>>, vector<1x1024xf32>
    %21 = vector.broadcast %20 : vector<1x1024xf32> to vector<16x1024xf32>
    %22 = arith.addf %19, %21 : vector<16x1024xf32>
    %cst_17 = arith.constant 0.000000e+00 : f32
    %23 = vector.broadcast %cst_17 : f32 to vector<16x1024xf32>
    %24 = arith.maximumf %22, %23 : vector<16x1024xf32>
    %c0_18 = arith.constant 0 : index
    %c0_19 = arith.constant 0 : index
    %25 = vector.load %arg8[%c0_18, %c0_19] : memref<1x1024xf32, #tpu.memory_space<vmem>>, vector<1x1024xf32>
    %26 = vector.broadcast %25 : vector<1x1024xf32> to vector<16x1024xf32>
    %27 = arith.mulf %24, %26 : vector<16x1024xf32>
    %cst_20 = arith.constant dense<0.000000e+00> : vector<16xf32>
    %28 = vector.multi_reduction <add>, %27, %cst_20 [1] : vector<16x1024xf32> to vector<16xf32>
    %29 = vector.shape_cast %28 : vector<16xf32> to vector<16x1xf32>
    %c0_21 = arith.constant 0 : index
    %c0_22 = arith.constant 0 : index
    %30 = vector.load %arg9[%c0_21, %c0_22] : memref<1x1xf32, #tpu.memory_space<vmem>>, vector<1x1xf32>
    %31 = vector.broadcast %30 : vector<1x1xf32> to vector<16x1xf32>
    %32 = arith.addf %29, %31 : vector<16x1xf32>
    %c0_23 = arith.constant 0 : index
    %c0_24 = arith.constant 0 : index
    %33 = vector.load %arg10[%c0_23, %c0_24] : memref<16x1xf32, #tpu.memory_space<vmem>>, vector<16x1xf32>
    tpu.vector_store %arg10[%c0_23, %c0_24], %32 {strides = array<i32>} : memref<16x1xf32, #tpu.memory_space<vmem>>, vector<16x1xf32>,
    return
  }
  func.func @transform_0(%arg0: i32) -> (i32, i32) {
    %c0_i32 = arith.constant 0 : i32
    %c0_i32_0 = arith.constant 0 : i32
    return %arg0, %c0_i32 : i32, i32
  }
  func.func @transform_1(%arg0: i32) -> (i32, i32) {
    %c0_i32 = arith.constant 0 : i32
    %c0_i32_0 = arith.constant 0 : i32
    %c0_i32_1 = arith.constant 0 : i32
    return %c0_i32, %c0_i32_0 : i32, i32
  }
  func.func @transform_2(%arg0: i32) -> (i32, i32) {
    %c0_i32 = arith.constant 0 : i32
    %c0_i32_0 = arith.constant 0 : i32
    %c0_i32_1 = arith.constant 0 : i32
    return %c0_i32, %c0_i32_0 : i32, i32
  }
  func.func @transform_3(%arg0: i32) -> (i32, i32) {
    %c0_i32 = arith.constant 0 : i32
    %c0_i32_0 = arith.constant 0 : i32
    %c0_i32_1 = arith.constant 0 : i32
    return %c0_i32, %c0_i32_0 : i32, i32
  }
  func.func @transform_4(%arg0: i32) -> (i32, i32) {
    %c0_i32 = arith.constant 0 : i32
    %c0_i32_0 = arith.constant 0 : i32
    %c0_i32_1 = arith.constant 0 : i32
    return %c0_i32, %c0_i32_0 : i32, i32
  }
  func.func @transform_5(%arg0: i32) -> (i32, i32) {
    %c0_i32 = arith.constant 0 : i32
    %c0_i32_0 = arith.constant 0 : i32
    %c0_i32_1 = arith.constant 0 : i32
    return %c0_i32, %c0_i32_0 : i32, i32
  }
  func.func @transform_6(%arg0: i32) -> (i32, i32) {
    %c0_i32 = arith.constant 0 : i32
    %c0_i32_0 = arith.constant 0 : i32
    %c0_i32_1 = arith.constant 0 : i32
    return %c0_i32, %c0_i32_0 : i32, i32
  }
  func.func @transform_7(%arg0: i32) -> (i32, i32) {
    %c0_i32 = arith.constant 0 : i32
    %c0_i32_0 = arith.constant 0 : i32
    %c0_i32_1 = arith.constant 0 : i32
    return %c0_i32, %c0_i32_0 : i32, i32
  }
  func.func @transform_8(%arg0: i32) -> (i32, i32) {
    %c0_i32 = arith.constant 0 : i32
    %c0_i32_0 = arith.constant 0 : i32
    %c0_i32_1 = arith.constant 0 : i32
    return %c0_i32, %c0_i32_0 : i32, i32
  }
  func.func @transform_9(%arg0: i32) -> (i32, i32) {
    %c0_i32 = arith.constant 0 : i32
    %c0_i32_0 = arith.constant 0 : i32
    return %arg0, %c0_i32 : i32, i32
  }
}

</mosaic_0001>

<bundles_post_ra>
// kernel: _forward.1
= control target key start
LH: loop header
LB: loop body
LE: loop exit
PB: predicated region body
PF: predicated region fallthrough
CT: control target
= control target key end

     0   :  { %s9923_s0 = inlined_call_operand.hbm [shape: f32[16,32], index: 0, kind: input, shape index: {}]   ;;  %s9924_s1 = inlined_call_operand.hbm [shape: bf16[32,1024], index: 1, kind: input, shape index: {}]   ;;  %s9925_s2 = inlined_call_operand.hbm [shape: f32[1,1024], index: 2, kind: input, shape index: {}]   ;;  %s9926_s3 = inlined_call_operand.hbm [shape: bf16[1024,1024], index: 3, kind: input, shape index: {}]   ;;  %s9927_s4 = inlined_call_operand.hbm [shape: f32[1,1024], index: 4, kind: input, shape index: {}]   ;;  %s9928_s5 = inlined_call_operand.hbm [shape: bf16[1024,1024], index: 5, kind: input, shape index: {}]   ;;  %s9929_s6 = inlined_call_operand.hbm [shape: f32[1,1024], index: 6, kind: input, shape index: {}]   ;;  %s9930_s7 = inlined_call_operand.hbm [shape: f32[1,1024], index: 7, kind: input, shape index: {}]   ;;  %s9931_s8 = inlined_call_operand.<no memory space> [shape: f32[1,1], index: 8, kind: input, shape index: {}]   ;;  %s9932_s9 = inlined_call_operand.vmem [shape: f32[16,1], index: 9, kind: output, shape index: {}]  }
   0x1   :  { %v14_v0 = vstv %s9931_s8 }
   0x2   :  { %15 = vst [vmem:[#allocation2] sm:$0x1] %v14_v0 }
   0x3   :  { %16 = vsyncpa [#allocation4], 0 }
   0x4   :  { %17 = vsyncpa [#allocation6], 0 }
   0x5   :  { %18 = vsyncpa [#allocation9], 0 }
   0x6   :  { %19 = vsyncpa [#allocation12], 0 }
   0x7   :  { %20 = vsyncpa [#allocation15], 0  ;;  %s9448_s11 = smov [#allocation5]  }
   0x8   :  { %s38_s12 = sshll.u32 %s9448_s11, 4  ;;  %s39_s12 = int_to_ptr.vmem [resolvable:$true] %s38_s12 }
   0x9   :  { %s9286_s13 = scalar_lea.vmem %s39_s12, 2048  ;;  %p9291_p1 = scmp.lt.s32.totalorder %s39_s12, %s39_s12 }
   0xa   :  { %p9287_p0 = scmp.ne.s32.totalorder %s39_s12, %s9286_s13  ;;  %p9292_p2 = scmp.lt.s32.totalorder %s9286_s13, %s9286_s13 }
   0xc   :  { %p9293_p3 = por %p9292_p2, %p9291_p1 }
   0xe   :  { %p9294_p4 = pnand %p9293_p3, %p9287_p0 }
  0x10   :  { %9297 = shalt.err (!%p9294_p4)
}
  0x11   :  { %s9449_s14 = smov 512   ;;  %s9450_s15 = smov 32  }
  0x12   :  { %44 = dma.hbm_to_vmem [thread:$0]  %s9924_s1, 2048, %s39_s12, [#allocation6], %s9449_s14, %s9449_s14, %s9450_s15  }
  0x13   :  { %s9451_s17 = smov [#allocation8]   ;;  %s9452_s19 = smov [#allocation11]  }
  0x14   :  { %s60_s18 = sshll.u32 %s9451_s17, 4  ;;  %s82_s20 = sshll.u32 %s9452_s19, 4  ;;  %s61_s18 = int_to_ptr.vmem [resolvable:$true] %s60_s18  ;;  %s83_s20 = int_to_ptr.vmem [resolvable:$true] %s82_s20 }
  0x15   :  { %s9306_s21 = scalar_lea.vmem %s61_s18, 65536  ;;  %p9311_p6 = scmp.lt.s32.totalorder %s61_s18, %s61_s18 }
  0x16   :  { %p9307_p5 = scmp.ne.s32.totalorder %s61_s18, %s9306_s21  ;;  %p9312_p7 = scmp.lt.s32.totalorder %s9306_s21, %s9306_s21 }
  0x18   :  { %p9313_p8 = por %p9312_p7, %p9311_p6 }
  0x1a   :  { %p9314_p9 = pnand %p9313_p8, %p9307_p5 }
  0x1c   :  { %9317 = shalt.err (!%p9314_p9)
}
  0x1d   :  { %66 = dma.hbm_to_vmem [thread:$0]  %s9926_s3, 65536, %s61_s18, [#allocation9], %s9449_s14, %s9449_s14, %s9450_s15  }
  0x1e   :  { %s9326_s24 = scalar_lea.vmem %s83_s20, 65536  ;;  %p9331_p11 = scmp.lt.s32.totalorder %s83_s20, %s83_s20 }
  0x1f   :  { %p9327_p10 = scmp.ne.s32.totalorder %s83_s20, %s9326_s24  ;;  %p9332_p12 = scmp.lt.s32.totalorder %s9326_s24, %s9326_s24 }
  0x21   :  { %p9333_p13 = por %p9332_p12, %p9331_p11 }
  0x23   :  { %p9334_p0 = pnand %p9333_p13, %p9327_p10 }
  0x25   :  { %9337 = shalt.err (!%p9334_p0)
}
  0x26   :  { %88 = dma.hbm_to_vmem [thread:$0]  %s9928_s5, 65536, %s83_s20, [#allocation12], %s9449_s14, %s9449_s14, %s9450_s15  }
  0x27   :  { %s9453_s26 = smov [#allocation3]  }
  0x28   :  { %s26_s27 = sshll.u32 %s9453_s26, 4  ;;  %s27_s27 = int_to_ptr.vmem [resolvable:$true] %s26_s27 }
  0x29   :  { %s9346_s28 = scalar_lea.vmem %s27_s27, 256  ;;  %p9351_p2 = scmp.lt.s32.totalorder %s27_s27, %s27_s27 }
  0x2a   :  { %p9347_p1 = scmp.ne.s32.totalorder %s27_s27, %s9346_s28  ;;  %p9352_p3 = scmp.lt.s32.totalorder %s9346_s28, %s9346_s28 }
  0x2c   :  { %p9353_p4 = por %p9352_p3, %p9351_p2 }
  0x2e   :  { %p9354_p5 = pnand %p9353_p4, %p9347_p1 }
  0x30   :  { %9357 = shalt.err (!%p9354_p5)
}
  0x31   :  { %s9454_s3 = smov 128   ;;  %s9455_s29 = smov 8  }
  0x32   :  { %32 = dma.hbm_to_vmem [thread:$0]  %s9923_s0, 256, %s27_s27, [#allocation4], %s9454_s3, %s9454_s3, %s9455_s29  }
  0x33   :  { %s9456_s11 = smov [#allocation7]   ;;  %s9457_s13 = smov [#allocation10]  }
  0x34   :  { %s51_s12 = sshll.u32 %s9456_s11, 4  ;;  %s73_s5 = sshll.u32 %s9457_s13, 4  ;;  %s52_s12 = int_to_ptr.vmem [resolvable:$true] %s51_s12  ;;  %s74_s5 = int_to_ptr.vmem [resolvable:$true] %s73_s5 }
  0x35   :  { %s9366_s14 = scalar_lea.vmem %s52_s12, 128  ;;  %p9371_p7 = scmp.lt.s32.totalorder %s52_s12, %s52_s12 }
  0x36   :  { %p9367_p6 = scmp.ne.s32.totalorder %s52_s12, %s9366_s14  ;;  %p9372_p8 = scmp.lt.s32.totalorder %s9366_s14, %s9366_s14 }
  0x38   :  { %p9373_p9 = por %p9372_p8, %p9371_p7 }
  0x3a   :  { %p9374_p10 = pnand %p9373_p9, %p9367_p6 }
  0x3c   :  { %9377 = shalt.err (!%p9374_p10)
}
  0x3d   :  { %54 = dma.hbm_to_vmem [thread:$0]  %s9925_s2, 128, %s52_s12, [#allocation6]  }
  0x3e   :  { %s9386_s8 = scalar_lea.vmem %s74_s5, 128  ;;  %p9391_p12 = scmp.lt.s32.totalorder %s74_s5, %s74_s5 }
  0x3f   :  { %p9387_p11 = scmp.ne.s32.totalorder %s74_s5, %s9386_s8  ;;  %p9392_p13 = scmp.lt.s32.totalorder %s9386_s8, %s9386_s8 }
  0x41   :  { %p9393_p0 = por %p9392_p13, %p9391_p12 }
  0x43   :  { %p9394_p1 = pnand %p9393_p0, %p9387_p11 }
  0x45   :  { %9397 = shalt.err (!%p9394_p1)
}
  0x46   :  { %76 = dma.hbm_to_vmem [thread:$0]  %s9927_s4, 128, %s74_s5, [#allocation9]  }
  0x47   :  { %s9458_s18 = smov [#allocation13]   ;;  %s9459_s20 = smov [#allocation14]  }
  0x48   :  { %s95_s19 = sshll.u32 %s9458_s18, 4  ;;  %s105_s21 = sshll.u32 %s9459_s20, 4  ;;  %s96_s19 = int_to_ptr.vmem [resolvable:$true] %s95_s19  ;;  %s106_s21 = int_to_ptr.vmem [resolvable:$true] %s105_s21 }
  0x49   :  { %s9406_s22 = scalar_lea.vmem %s96_s19, 128  ;;  %p9411_p3 = scmp.lt.s32.totalorder %s96_s19, %s96_s19 }
  0x4a   :  { %p9407_p2 = scmp.ne.s32.totalorder %s96_s19, %s9406_s22  ;;  %p9412_p4 = scmp.lt.s32.totalorder %s9406_s22, %s9406_s22 }
  0x4c   :  { %p9413_p5 = por %p9412_p4, %p9411_p3 }
  0x4e   :  { %p9414_p6 = pnand %p9413_p5, %p9407_p2 }
  0x50   :  { %9417 = shalt.err (!%p9414_p6)
}
  0x51   :  { %98 = dma.hbm_to_vmem [thread:$0]  %s9929_s6, 128, %s96_s19, [#allocation12]  }
  0x52   :  { %s9426_s24 = scalar_lea.vmem %s106_s21, 128  ;;  %p9431_p8 = scmp.lt.s32.totalorder %s106_s21, %s106_s21 }
  0x53   :  { %p9427_p7 = scmp.ne.s32.totalorder %s106_s21, %s9426_s24  ;;  %p9432_p9 = scmp.lt.s32.totalorder %s9426_s24, %s9426_s24 }
  0x55   :  { %p9433_p10 = por %p9432_p9, %p9431_p8 }
  0x57   :  { %p9434_p11 = pnand %p9433_p10, %p9427_p7 }
  0x59   :  { %9437 = shalt.err (!%p9434_p11)
}
  0x5a   :  { %108 = dma.hbm_to_vmem [thread:$0]  %s9930_s7, 128, %s106_s21, [#allocation15]  }
  0x5b   :  { %9438 = dma.done.wait [#allocation4], 256  }
  0x5c   :  { %9439 = vsyncadd [#allocation4], 4294967040 }
  0x5d   :  { %9440 = dma.done.wait [#allocation6], 2176  }
  0x5e   :  { %9441 = vsyncadd [#allocation6], 4294965120 }
  0x5f   :  { %9442 = dma.done.wait [#allocation9], 65664  }
  0x60   :  { %9443 = vsyncadd [#allocation9], 4294901632 }
  0x61   :  { %9444 = dma.done.wait [#allocation12], 65664  }
  0x62   :  { %9445 = vsyncadd [#allocation12], 4294901632 }
  0x63   :  { %9446 = dma.done.wait [#allocation15], 128  }
  0x64   :  { %9447 = vsyncadd [#allocation15], 4294967168  ;;  %v9460_v1 = vmov 0   ;;  %v147_v2 = vld [vmem:[#allocation5 + $0x40] sm:$0xff]  ;;  %v148_v4 = vld [vmem:[#allocation5 + $0x48] sm:$0xff]  ;;  %vm277_vm0 = vcmask 261120  }
  0x65   :  { %313 = vmatprep.mubr.bf16.mxu0 %v9460_v1  ;;  %356 = vmatprep.mubr.bf16.mxu1 %v9460_v1  ;;  %v151_v3 = vld [vmem:[#allocation5 + $0x60] sm:$0xff]  ;;  %v152_v6 = vld [vmem:[#allocation5 + $0x68] sm:$0xff]  ;;  %v136_v16 = vld [vmem:[#allocation3] sm:$0xff]  ;;  %vm8206_vm1 = vcmask 7168  }
  0x66   :  { %v8227_v5 = vcombine.high %v147_v2, %v151_v3  ;;  %v8226_v7 = vcombine.low %v147_v2, %v151_v3  ;;  %v139_v8 = vld [vmem:[#allocation5] sm:$0xff]  ;;  %v8229_v10 = vcombine.high %v148_v4, %v152_v6  ;;  %v8228_v11 = vcombine.low %v148_v4, %v152_v6  ;;  %v140_v13 = vld [vmem:[#allocation5 + $0x8] sm:$0xff]  ;;  %v149_v17 = vld [vmem:[#allocation5 + $0x50] sm:$0xff] }
  0x67   :  { %v143_v9 = vld [vmem:[#allocation5 + $0x20] sm:$0xff]  ;;  %v144_v14 = vld [vmem:[#allocation5 + $0x28] sm:$0xff]  ;;  %v153_v18 = vld [vmem:[#allocation5 + $0x70] sm:$0xff] }
  0x68   :  { %v8219_v12 = vcombine.high %v139_v8, %v143_v9  ;;  %293 = vmatprep.subr.bf16.mxu0 %v8227_v5  ;;  %v8221_v15 = vcombine.high %v140_v13, %v144_v14  ;;  %336 = vmatprep.subr.bf16.mxu1 %v8229_v10  ;;  %v8218_v19 = vcombine.low %v139_v8, %v143_v9  ;;  %v137_v20 = vld [vmem:[#allocation3 + $0x8] sm:$0xff]  ;;  %v141_v26 = vld [vmem:[#allocation5 + $0x10] sm:$0xff]  ;;  %v533_v35 = vld [vmem:[#allocation8 + $0x1c0] sm:$0xff] }
  0x69   :  { %294 = vmatpush1.bf16.msra.mxu0 %v8226_v7  ;;  %v150_v21 = vld [vmem:[#allocation5 + $0x58] sm:$0xff]  ;;  %337 = vmatpush1.bf16.msra.mxu1 %v8228_v11  ;;  %v8220_v23 = vcombine.low %v140_v13, %v144_v14  ;;  %v8231_v24 = vcombine.high %v149_v17, %v153_v18  ;;  %v145_v27 = vld [vmem:[#allocation5 + $0x30] sm:$0xff]  ;;  %v138_v28 = vpack.c.bf16 %v137_v20, %v136_v16  ;;  %v537_v36 = vld [vmem:[#allocation8 + $0x1e0] sm:$0xff] }
  0x6a   :  { %v154_v22 = vld [vmem:[#allocation5 + $0x78] sm:$0xff]  ;;  %295 = vmatprep.subr.bf16.mxu0 %v8219_v12  ;;  %338 = vmatprep.subr.bf16.mxu1 %v8221_v15  ;;  %v8230_v31 = vcombine.low %v149_v17, %v153_v18  ;;  %v8223_v33 = vcombine.high %v141_v26, %v145_v27  ;;  %v661_v37 = vld [vmem:[#allocation8 + $0x5c0] sm:$0xff]  ;;  %v8222_v39 = vcombine.low %v141_v26, %v145_v27 }
  0x6b   :  { %v8233_v25 = vcombine.high %v150_v21, %v154_v22  ;;  %v142_v29 = vld [vmem:[#allocation5 + $0x18] sm:$0xff]  ;;  %v8232_v32 = vcombine.low %v150_v21, %v154_v22  ;;  %v665_v38 = vld [vmem:[#allocation8 + $0x5e0] sm:$0xff]  ;;  %v8295_v41 = vcombine.high %v533_v35, %v537_v36  ;;  %v8294_v47 = vcombine.low %v533_v35, %v537_v36 }
  0x6c   :  { %v146_v30 = vld [vmem:[#allocation5 + $0x38] sm:$0xff]  ;;  %v8423_v42 = vcombine.high %v661_v37, %v665_v38  ;;  %v525_v43 = vld [vmem:[#allocation8 + $0x180] sm:$0xff]  ;;  %v8422_v48 = vcombine.low %v661_v37, %v665_v38 }
  0x6d   :  { %296 = vmatpush1.bf16.msra.mxu0 %v8218_v19  ;;  %339 = vmatpush1.bf16.msra.mxu1 %v8220_v23  ;;  %v8225_v34 = vcombine.high %v142_v29, %v146_v30  ;;  %v8224_v40 = vcombine.low %v142_v29, %v146_v30  ;;  %v529_v44 = vld [vmem:[#allocation8 + $0x1a0] sm:$0xff] }
  0x6e   :  { %379 = vmatprep.subr.bf16.mxu0 %v8231_v24  ;;  %422 = vmatprep.subr.bf16.mxu1 %v8233_v25  ;;  %v653_v45 = vld [vmem:[#allocation8 + $0x580] sm:$0xff]  ;;  %v8287_v49 = vcombine.high %v525_v43, %v529_v44  ;;  %v8286_v55 = vcombine.low %v525_v43, %v529_v44 }
  0x6f   :  { %v657_v46 = vld [vmem:[#allocation8 + $0x5a0] sm:$0xff] }
  0x70   :  { %8234 = vmatmul.mubr.msk.bf16.vlgmr.msra.gmra.mxu0 %vm277_vm0, %v138_v28  ;;  %8235 = vmatmul.mubr.msk.bf16.vlgmr.msra.gmra.mxu1 %vm277_vm0, %v138_v28  ;;  %v8415_v50 = vcombine.high %v653_v45, %v657_v46  ;;  %v517_v51 = vld [vmem:[#allocation8 + $0x140] sm:$0xff]  ;;  %v8414_v56 = vcombine.low %v653_v45, %v657_v46 }
  0x71   :  { %380 = vmatpush1.bf16.msra.mxu0 %v8230_v31  ;;  %423 = vmatpush1.bf16.msra.mxu1 %v8232_v32  ;;  %v521_v52 = vld [vmem:[#allocation8 + $0x160] sm:$0xff] }
  0x72   :  { %381 = vmatprep.subr.bf16.mxu0 %v8223_v33  ;;  %424 = vmatprep.subr.bf16.mxu1 %v8225_v34  ;;  %v645_v53 = vld [vmem:[#allocation8 + $0x540] sm:$0xff]  ;;  %v8279_v57 = vcombine.high %v517_v51, %v521_v52  ;;  %v8278_v63 = vcombine.low %v517_v51, %v521_v52 }
  0x73   :  { %399 = vmatprep.mubr.bf16.mxu0 %v9460_v1  ;;  %442 = vmatprep.mubr.bf16.mxu1 %v9460_v1  ;;  %v649_v54 = vld [vmem:[#allocation8 + $0x560] sm:$0xff] }
  0x74   :  { %v8407_v58 = vcombine.high %v645_v53, %v649_v54  ;;  %v509_v59 = vld [vmem:[#allocation8 + $0x100] sm:$0xff]  ;;  %v8406_v0 = vcombine.low %v645_v53, %v649_v54 }
  0x75   :  { %382 = vmatpush1.bf16.msra.mxu0 %v8222_v39  ;;  %425 = vmatpush1.bf16.msra.mxu1 %v8224_v40  ;;  %v513_v60 = vld [vmem:[#allocation8 + $0x120] sm:$0xff] }
  0x76   :  { %3591 = vmatprep.subr.bf16.mxu0 %v8295_v41  ;;  %3634 = vmatprep.subr.bf16.mxu1 %v8423_v42  ;;  %v637_v61 = vld [vmem:[#allocation8 + $0x500] sm:$0xff]  ;;  %v8271_v1 = vcombine.high %v509_v59, %v513_v60  ;;  %v8270_v7 = vcombine.low %v509_v59, %v513_v60 }
  0x77   :  { %v641_v62 = vld [vmem:[#allocation8 + $0x520] sm:$0xff] }
  0x78   :  { %8236 = vmatmul.mubr.msk.bf16.vlgmr.msra.gmra.mxu0 %vm277_vm0, %v138_v28  ;;  %8237 = vmatmul.mubr.msk.bf16.vlgmr.msra.gmra.mxu1 %vm277_vm0, %v138_v28  ;;  %v8399_v2 = vcombine.high %v637_v61, %v641_v62  ;;  %v501_v3 = vld [vmem:[#allocation8 + $0xc0] sm:$0xff]  ;;  %v8398_v8 = vcombine.low %v637_v61, %v641_v62 }
  0x79   :  { %3592 = vmatpush1.bf16.msra.mxu0 %v8294_v47  ;;  %3635 = vmatpush1.bf16.msra.mxu1 %v8422_v48  ;;  %v505_v4 = vld [vmem:[#allocation8 + $0xe0] sm:$0xff] }
  0x7a   :  { %3593 = vmatprep.subr.bf16.mxu0 %v8287_v49  ;;  %3636 = vmatprep.subr.bf16.mxu1 %v8415_v50  ;;  %v629_v5 = vld [vmem:[#allocation8 + $0x4c0] sm:$0xff]  ;;  %v8263_v9 = vcombine.high %v501_v3, %v505_v4  ;;  %v8262_v15 = vcombine.low %v501_v3, %v505_v4 }
  0x7b   :  { %v633_v6 = vld [vmem:[#allocation8 + $0x4e0] sm:$0xff] }
  0x7c   :  { %v8391_v10 = vcombine.high %v629_v5, %v633_v6  ;;  %v493_v11 = vld [vmem:[#allocation8 + $0x80] sm:$0xff]  ;;  %v8390_v16 = vcombine.low %v629_v5, %v633_v6 }
  0x7d   :  { %3594 = vmatpush1.bf16.msra.mxu0 %v8286_v55  ;;  %3637 = vmatpush1.bf16.msra.mxu1 %v8414_v56  ;;  %v497_v12 = vld [vmem:[#allocation8 + $0xa0] sm:$0xff] }
  0x7e   :  { %3595 = vmatprep.subr.bf16.mxu0 %v8279_v57  ;;  %3638 = vmatprep.subr.bf16.mxu1 %v8407_v58  ;;  %v621_v13 = vld [vmem:[#allocation8 + $0x480] sm:$0xff]  ;;  %v8255_v17 = vcombine.high %v493_v11, %v497_v12  ;;  %v8254_v23 = vcombine.low %v493_v11, %v497_v12 }
  0x7f   :  { %v625_v14 = vld [vmem:[#allocation8 + $0x4a0] sm:$0xff] }
  0x80   :  { %v8383_v18 = vcombine.high %v621_v13, %v625_v14  ;;  %v485_v19 = vld [vmem:[#allocation8 + $0x40] sm:$0xff]  ;;  %v8382_v24 = vcombine.low %v621_v13, %v625_v14 }
  0x81   :  { %3596 = vmatpush1.bf16.msra.mxu0 %v8278_v63  ;;  %3639 = vmatpush1.bf16.msra.mxu1 %v8406_v0  ;;  %v489_v20 = vld [vmem:[#allocation8 + $0x60] sm:$0xff] }
  0x82   :  { %3597 = vmatprep.subr.bf16.mxu0 %v8271_v1  ;;  %3640 = vmatprep.subr.bf16.mxu1 %v8399_v2  ;;  %v613_v21 = vld [vmem:[#allocation8 + $0x440] sm:$0xff]  ;;  %v8247_v25 = vcombine.high %v485_v19, %v489_v20  ;;  %v8246_v31 = vcombine.low %v485_v19, %v489_v20 }
  0x83   :  { %v617_v22 = vld [vmem:[#allocation8 + $0x460] sm:$0xff] }
  0x84   :  { %v8375_v26 = vcombine.high %v613_v21, %v617_v22  ;;  %v477_v27 = vld [vmem:[#allocation8] sm:$0xff]  ;;  %v8374_v32 = vcombine.low %v613_v21, %v617_v22 }
  0x85   :  { %3598 = vmatpush1.bf16.msra.mxu0 %v8270_v7  ;;  %3641 = vmatpush1.bf16.msra.mxu1 %v8398_v8  ;;  %v481_v28 = vld [vmem:[#allocation8 + $0x20] sm:$0xff] }
  0x86   :  { %3599 = vmatprep.subr.bf16.mxu0 %v8263_v9  ;;  %3642 = vmatprep.subr.bf16.mxu1 %v8391_v10  ;;  %v605_v29 = vld [vmem:[#allocation8 + $0x400] sm:$0xff]  ;;  %v8239_v33 = vcombine.high %v477_v27, %v481_v28  ;;  %v8238_v39 = vcombine.low %v477_v27, %v481_v28 }
  0x87   :  { %v609_v30 = vld [vmem:[#allocation8 + $0x420] sm:$0xff] }
  0x88   :  { %v8367_v34 = vcombine.high %v605_v29, %v609_v30  ;;  %v597_v35 = vld [vmem:[#allocation8 + $0x3c0] sm:$0xff]  ;;  %v8366_v40 = vcombine.low %v605_v29, %v609_v30 }
  0x89   :  { %3600 = vmatpush1.bf16.msra.mxu0 %v8262_v15  ;;  %3643 = vmatpush1.bf16.msra.mxu1 %v8390_v16  ;;  %v601_v36 = vld [vmem:[#allocation8 + $0x3e0] sm:$0xff] }
  0x8a   :  { %3601 = vmatprep.subr.bf16.mxu0 %v8255_v17  ;;  %3644 = vmatprep.subr.bf16.mxu1 %v8383_v18  ;;  %v725_v37 = vld [vmem:[#allocation8 + $0x7c0] sm:$0xff]  ;;  %v8359_v41 = vcombine.high %v597_v35, %v601_v36  ;;  %v8358_v47 = vcombine.low %v597_v35, %v601_v36 }
  0x8b   :  { %v729_v38 = vld [vmem:[#allocation8 + $0x7e0] sm:$0xff] }
  0x8c   :  { %v8487_v42 = vcombine.high %v725_v37, %v729_v38  ;;  %v589_v43 = vld [vmem:[#allocation8 + $0x380] sm:$0xff]  ;;  %v8486_v48 = vcombine.low %v725_v37, %v729_v38 }
  0x8d   :  { %3602 = vmatpush1.bf16.msra.mxu0 %v8254_v23  ;;  %3645 = vmatpush1.bf16.msra.mxu1 %v8382_v24  ;;  %v593_v44 = vld [vmem:[#allocation8 + $0x3a0] sm:$0xff] }
  0x8e   :  { %3603 = vmatprep.subr.bf16.mxu0 %v8247_v25  ;;  %3646 = vmatprep.subr.bf16.mxu1 %v8375_v26  ;;  %v717_v45 = vld [vmem:[#allocation8 + $0x780] sm:$0xff]  ;;  %v8351_v49 = vcombine.high %v589_v43, %v593_v44  ;;  %v8350_v55 = vcombine.low %v589_v43, %v593_v44 }
  0x8f   :  { %v721_v46 = vld [vmem:[#allocation8 + $0x7a0] sm:$0xff] }
  0x90   :  { %v8479_v50 = vcombine.high %v717_v45, %v721_v46  ;;  %v581_v51 = vld [vmem:[#allocation8 + $0x340] sm:$0xff]  ;;  %v8478_v56 = vcombine.low %v717_v45, %v721_v46  ;;  %v157_v45 = vlaneseq }
  0x91   :  { %3604 = vmatpush1.bf16.msra.mxu0 %v8246_v31  ;;  %3647 = vmatpush1.bf16.msra.mxu1 %v8374_v32  ;;  %v585_v52 = vld [vmem:[#allocation8 + $0x360] sm:$0xff] }
  0x92   :  { %3605 = vmatprep.subr.bf16.mxu0 %v8239_v33  ;;  %3648 = vmatprep.subr.bf16.mxu1 %v8367_v34  ;;  %v709_v53 = vld [vmem:[#allocation8 + $0x740] sm:$0xff]  ;;  %v8343_v57 = vcombine.high %v581_v51, %v585_v52  ;;  %v8342_v63 = vcombine.low %v581_v51, %v585_v52  ;;  %v9562_v46 = vshrl.u32 %v157_v45, 7 }
  0x93   :  { %v713_v54 = vld [vmem:[#allocation8 + $0x760] sm:$0xff] }
  0x94   :  { %v8471_v58 = vcombine.high %v709_v53, %v713_v54  ;;  %v573_v59 = vld [vmem:[#allocation8 + $0x300] sm:$0xff]  ;;  %v8470_v0 = vcombine.low %v709_v53, %v713_v54  ;;  %v9576_v51 = vsub.s32 2, %v9562_v46 }
  0x95   :  { %3606 = vmatpush1.bf16.msra.mxu0 %v8238_v39  ;;  %3649 = vmatpush1.bf16.msra.mxu1 %v8366_v40  ;;  %v577_v60 = vld [vmem:[#allocation8 + $0x320] sm:$0xff] }
  0x96   :  { %3607 = vmatprep.subr.bf16.mxu0 %v8359_v41  ;;  %3650 = vmatprep.subr.bf16.mxu1 %v8487_v42  ;;  %v701_v61 = vld [vmem:[#allocation8 + $0x700] sm:$0xff]  ;;  %v8335_v1 = vcombine.high %v573_v59, %v577_v60  ;;  %v8334_v7 = vcombine.low %v573_v59, %v577_v60  ;;  %v9587_v60 = vsub.s32 5, %v9562_v46 }
  0x97   :  { %v705_v62 = vld [vmem:[#allocation8 + $0x720] sm:$0xff] }
  0x98   :  { %v8463_v2 = vcombine.high %v701_v61, %v705_v62  ;;  %v565_v3 = vld [vmem:[#allocation8 + $0x2c0] sm:$0xff]  ;;  %v8462_v8 = vcombine.low %v701_v61, %v705_v62  ;;  %v9590_v62 = vsub.s32 7, %v9562_v46 }
  0x99   :  { %3608 = vmatpush2.bf16.msra.mxu0 %v8358_v47  ;;  %3651 = vmatpush2.bf16.msra.mxu1 %v8486_v48  ;;  %v569_v4 = vld [vmem:[#allocation8 + $0x2e0] sm:$0xff]  ;;  %v9565_v47 = vsub.s32 1, %v9562_v46  ;;  %v9568_v48 = vsub.s32 0, %v9562_v46 }
  0x9a   :  { %3609 = vmatprep.subr.bf16.mxu0 %v8351_v49  ;;  %3652 = vmatprep.subr.bf16.mxu1 %v8479_v50  ;;  %v693_v5 = vld [vmem:[#allocation8 + $0x6c0] sm:$0xff]  ;;  %v8327_v9 = vcombine.high %v565_v3, %v569_v4  ;;  %v8326_v11 = vcombine.low %v565_v3, %v569_v4  ;;  %v9571_v49 = vsub.s32 3, %v9562_v46  ;;  %v9573_v50 = vld [vmem:[#allocation7] sm:$0xff]  ;;  %9937 = vst [vmem:[#allocation21_spill] sm:$0xff] %v9590_v62 }
  0x9b   :  { %v697_v6 = vld [vmem:[#allocation8 + $0x6e0] sm:$0xff]  ;;  %v164_v54 = vrot.slane %v9573_v50, %v9565_v47 }
  0x9c   :  { %v8455_v10 = vcombine.high %v693_v5, %v697_v6  ;;  %v8454_v12 = vcombine.low %v693_v5, %v697_v6  ;;  %v557_v13 = vld [vmem:[#allocation8 + $0x280] sm:$0xff] }
  0x9d   :  { %3610 = vmatpush2.bf16.msra.mxu0 %v8350_v55  ;;  %3653 = vmatpush2.bf16.msra.mxu1 %v8478_v56  ;;  %v561_v14 = vld [vmem:[#allocation8 + $0x2a0] sm:$0xff]  ;;  %v160_v55 = vrot.slane %v9573_v50, %v9568_v48 }
  0x9e   :  { %3611 = vmatprep.subr.bf16.mxu0 %v8343_v57  ;;  %3654 = vmatprep.subr.bf16.mxu1 %v8471_v58  ;;  %v685_v15 = vld [vmem:[#allocation8 + $0x680] sm:$0xff]  ;;  %v8319_v16 = vcombine.high %v557_v13, %v561_v14  ;;  %v8318_v18 = vcombine.low %v557_v13, %v561_v14  ;;  %v172_v57 = vrot.slane %v9573_v50, %v9571_v49 }
  0x9f   :  { %v689_v17 = vld [vmem:[#allocation8 + $0x6a0] sm:$0xff]  ;;  %v168_v58 = vrot.slane %v9573_v50, %v9576_v51  ;;  %v188_v13 = vrot.slane %v9573_v50, %v9590_v62 }
  0xa0   :  { %v8446_v19 = vcombine.low %v685_v15, %v689_v17  ;;  %v8447_v20 = vcombine.high %v685_v15, %v689_v17  ;;  %v549_v21 = vld [vmem:[#allocation8 + $0x240] sm:$0xff] }
  0xa1   :  { %3612 = vmatpush2.bf16.msra.mxu0 %v8342_v63  ;;  %3655 = vmatpush2.bf16.msra.mxu1 %v8470_v0  ;;  %v553_v22 = vld [vmem:[#allocation8 + $0x260] sm:$0xff] }
  0xa2   :  { %3613 = vmatprep.subr.bf16.mxu0 %v8335_v1  ;;  %3656 = vmatprep.subr.bf16.mxu1 %v8463_v2  ;;  %v677_v23 = vld [vmem:[#allocation8 + $0x640] sm:$0xff]  ;;  %v8311_v24 = vcombine.high %v549_v21, %v553_v22  ;;  %v8310_v26 = vcombine.low %v549_v21, %v553_v22 }
  0xa3   :  { %v681_v25 = vld [vmem:[#allocation8 + $0x660] sm:$0xff] }
  0xa4   :  { %v8438_v27 = vcombine.low %v677_v23, %v681_v25  ;;  %v8439_v28 = vcombine.high %v677_v23, %v681_v25  ;;  %v541_v29 = vld [vmem:[#allocation8 + $0x200] sm:$0xff] }
  0xa5   :  { %3614 = vmatpush2.bf16.msra.mxu0 %v8334_v7  ;;  %3657 = vmatpush2.bf16.msra.mxu1 %v8462_v8  ;;  %v545_v30 = vld [vmem:[#allocation8 + $0x220] sm:$0xff] }
  0xa6   :  { %3615 = vmatprep.subr.bf16.mxu0 %v8327_v9  ;;  %3658 = vmatprep.subr.bf16.mxu1 %v8455_v10  ;;  %v669_v31 = vld [vmem:[#allocation8 + $0x600] sm:$0xff]  ;;  %v8303_v32 = vcombine.high %v541_v29, %v545_v30  ;;  %v8302_v34 = vcombine.low %v541_v29, %v545_v30  ;;  %v180_v9 = vrot.slane %v9573_v50, %v9587_v60 }
  0xa7   :  { %v673_v33 = vld [vmem:[#allocation8 + $0x620] sm:$0xff] }
  0xa8   :  { %v8430_v35 = vcombine.low %v669_v31, %v673_v33  ;;  %v8431_v36 = vcombine.high %v669_v31, %v673_v33  ;;  %v9546_v37 = vld [vmem:[#allocation8 + $0x9c0] sm:$0xff] }
  0xa9   :  { %3616 = vmatpush2.bf16.msra.mxu0 %v8326_v11  ;;  %3659 = vmatpush2.bf16.msra.mxu1 %v8454_v12  ;;  %v9548_v38 = vld [vmem:[#allocation8 + $0x9e0] sm:$0xff] }
  0xaa   :  { %3617 = vmatprep.subr.bf16.mxu0 %v8319_v16  ;;  %3660 = vmatprep.subr.bf16.mxu1 %v8447_v20  ;;  %v9550_v39 = vld [vmem:[#allocation8 + $0xdc0] sm:$0xff]  ;;  %v8551_v40 = vcombine.high %v9546_v37, %v9548_v38  ;;  %v8550_v42 = vcombine.low %v9546_v37, %v9548_v38 }
  0xab   :  { %v9554_v41 = vld [vmem:[#allocation8 + $0xde0] sm:$0xff] }
  0xac   :  { %v8678_v43 = vcombine.low %v9550_v39, %v9554_v41  ;;  %v8679_v44 = vcombine.high %v9550_v39, %v9554_v41  ;;  %v781_v17 = vld [vmem:[#allocation8 + $0x980] sm:$0xff] }
  0xad   :  { %3618 = vmatpush2.bf16.msra.mxu0 %v8318_v18  ;;  %3661 = vmatpush2.bf16.msra.mxu1 %v8446_v19  ;;  %v785_v18 = vld [vmem:[#allocation8 + $0x9a0] sm:$0xff] }
  0xae   :  { %3619 = vmatprep.subr.bf16.mxu0 %v8311_v24  ;;  %3662 = vmatprep.subr.bf16.mxu1 %v8439_v28  ;;  %v909_v23 = vld [vmem:[#allocation8 + $0xd80] sm:$0xff] }
  0xaf   :  { %v913_v24 = vld [vmem:[#allocation8 + $0xda0] sm:$0xff] }
  0xb0   :  { %v893_v37 = vld [vmem:[#allocation8 + $0xd00] sm:$0xff] }
  0xb1   :  { %3620 = vmatpush2.bf16.msra.mxu0 %v8310_v26  ;;  %3663 = vmatpush2.bf16.msra.mxu1 %v8438_v27  ;;  %v897_v38 = vld [vmem:[#allocation8 + $0xd20] sm:$0xff] }
  0xb2   :  { %3621 = vmatprep.subr.bf16.mxu0 %v8303_v32  ;;  %3664 = vmatprep.subr.bf16.mxu1 %v8431_v36  ;;  %v8543_v32 = vcombine.high %v781_v17, %v785_v18  ;;  %v8671_v36 = vcombine.high %v909_v23, %v913_v24 }
  0xb5   :  { %3622 = vmatpush2.bf16.msra.mxu0 %v8302_v34  ;;  %3665 = vmatpush2.bf16.msra.mxu1 %v8430_v35 }
  0xb6   :  { %3677 = vmatprep.subr.bf16.mxu0 %v8551_v40  ;;  %3720 = vmatprep.subr.bf16.mxu1 %v8679_v44  ;;  %v773_v40 = vld [vmem:[#allocation8 + $0x940] sm:$0xff] }
  0xb7   :  { %v777_v44 = vld [vmem:[#allocation8 + $0x960] sm:$0xff] }
 0x130   :  { %v315_v52 = vpop.f32.mrf.mxu0  ;;  %v358_v53 = vpop.f32.mrf.mxu1 }
 0x131   :  { %v316_v2 = vadd.f32 %v315_v52, %v160_v55  ;;  %v359_v6 = vadd.f32 %v358_v53, %v168_v58  ;;  %v901_v52 = vld [vmem:[#allocation8 + $0xd40] sm:$0xff] }
 0x132   :  { %v317_v56 = vpop.f32.mrf.mxu0  ;;  %v360_v59 = vpop.f32.mrf.mxu1  ;;  %v905_v53 = vld [vmem:[#allocation8 + $0xd60] sm:$0xff] }
 0x133   :  { %v318_v63 = vadd.f32 %v317_v56, %v164_v54  ;;  %v361_v3 = vadd.f32 %v360_v59, %v172_v57  ;;  %v453_v20 = vmax.f32 %v316_v2, 0.0  ;;  %v455_v26 = vmax.f32 %v359_v6, 0.0  ;;  %v765_v2 = vld [vmem:[#allocation8 + $0x900] sm:$0xff] }
 0x134   :  { %v319_v61 = vpop.f32.mrf.mxu0  ;;  %v362_v1 = vpop.f32.mrf.mxu1  ;;  %v8670_v59 = vcombine.low %v909_v23, %v913_v24  ;;  %v8662_v39 = vcombine.low %v901_v52, %v905_v53 }
 0x135   :  { %v320_v0 = vadd.f32 %v319_v61, %v160_v55  ;;  %v363_v4 = vadd.f32 %v362_v1, %v168_v58  ;;  %v454_v14 = vmax.f32 %v318_v63, 0.0  ;;  %v456_v21 = vmax.f32 %v361_v3, 0.0  ;;  %v769_v3 = vld [vmem:[#allocation8 + $0x920] sm:$0xff] }
 0x136   :  { %v321_v5 = vpop.f32.mrf.mxu0  ;;  %v364_v8 = vpop.f32.mrf.mxu1  ;;  %v8542_v55 = vcombine.low %v781_v17, %v785_v18  ;;  %v8535_v61 = vcombine.high %v773_v40, %v777_v44  ;;  %v8663_v1 = vcombine.high %v901_v52, %v905_v53  ;;  %v8527_v41 = vcombine.high %v765_v2, %v769_v3  ;;  %v749_v17 = vld [vmem:[#allocation8 + $0x880] sm:$0xff] }
 0x137   :  { %v322_v7 = vadd.f32 %v321_v5, %v164_v54  ;;  %v461_v10 = vmax.f32 %v320_v0, 0.0  ;;  %v365_v11 = vadd.f32 %v364_v8, %v172_v57  ;;  %v463_v15 = vmax.f32 %v363_v4, 0.0  ;;  %v757_v8 = vld [vmem:[#allocation8 + $0x8c0] sm:$0xff] }
 0x138   :  { %v9594_v12 = vpop.f32.mrf.mxu0  ;;  %v9598_v19 = vpop.f32.mrf.mxu1  ;;  %v8534_v5 = vcombine.low %v773_v40, %v777_v44  ;;  %v753_v18 = vld [vmem:[#allocation8 + $0x8a0] sm:$0xff] }
 0x139   :  { %v462_v16 = vmax.f32 %v322_v7, 0.0  ;;  %v464_v22 = vmax.f32 %v365_v11, 0.0  ;;  %v9602_v30 = vpack.c.bf16 %v461_v10, %v453_v20  ;;  %v9608_v35 = vpack.c.bf16 %v463_v15, %v455_v26  ;;  %v885_v10 = vld [vmem:[#allocation8 + $0xcc0] sm:$0xff] }
 0x13a   :  { %v403_v25 = vpop.f32.mrf.mxu0  ;;  %v446_v29 = vpop.f32.mrf.mxu1  ;;  %v8655_v7 = vcombine.high %v893_v37, %v897_v38  ;;  %v889_v11 = vld [vmem:[#allocation8 + $0xce0] sm:$0xff]  ;;  %v8511_v24 = vcombine.high %v749_v17, %v753_v18 }
 0x13b   :  { %v9600_v27 = vpack.c.bf16 %v462_v16, %v454_v14  ;;  %v404_v28 = vadd.f32 %v403_v25, %v180_v9  ;;  %v9604_v31 = vpack.c.bf16 %v464_v22, %v456_v21  ;;  %v447_v34 = vadd.f32 %v446_v29, %v188_v13  ;;  %v877_v20 = vld [vmem:[#allocation8 + $0xc80] sm:$0xff] }
 0x13c   :  { %v9606_v33 = vpop.f32.mrf.mxu0  ;;  %v9611_v45 = vpop.f32.mrf.mxu1  ;;  %v8654_v14 = vcombine.low %v893_v37, %v897_v38  ;;  %v8647_v16 = vcombine.high %v885_v10, %v889_v11  ;;  %v881_v21 = vld [vmem:[#allocation8 + $0xca0] sm:$0xff]  ;;  %v8646_v23 = vcombine.low %v885_v10, %v889_v11 }
 0x13d   :  { %3623 = vmatprep.mubr.bf16.mxu0 %v9600_v27  ;;  %3666 = vmatprep.mubr.bf16.mxu1 %v9604_v31  ;;  %v458_v56 = vmax.f32 %v404_v28, 0.0  ;;  %v460_v63 = vmax.f32 %v447_v34, 0.0  ;;  %v8639_v25 = vcombine.high %v877_v20, %v881_v21  ;;  %v741_v26 = vld [vmem:[#allocation8 + $0x840] sm:$0xff]  ;;  %v8510_v34 = vcombine.low %v749_v17, %v753_v18 }
 0x13e   :  { %3624 = vmatmul.mubr.bf16.vlgmr.msra.gmra.mxu0 %v9602_v30  ;;  %v407_v54 = vpop.f32.mrf.mxu0  ;;  %3667 = vmatmul.mubr.bf16.vlgmr.msra.gmra.mxu1 %v9608_v35  ;;  %v450_v58 = vpop.f32.mrf.mxu1  ;;  %v745_v28 = vld [vmem:[#allocation8 + $0x860] sm:$0xff] }
 0x13f   :  { %3678 = vmatpush1.bf16.msra.mxu0 %v8550_v42  ;;  %v408_v57 = vadd.f32 %v407_v54, %v180_v9  ;;  %3721 = vmatpush1.bf16.msra.mxu1 %v8678_v43  ;;  %v451_v0 = vadd.f32 %v450_v58, %v188_v13  ;;  %v761_v9 = vld [vmem:[#allocation8 + $0x8e0] sm:$0xff]  ;;  %v8526_v13 = vcombine.low %v765_v2, %v769_v3 }
 0x140   :  { %3679 = vmatprep.subr.bf16.mxu0 %v8543_v32  ;;  %3722 = vmatprep.subr.bf16.mxu1 %v8671_v36  ;;  %v8519_v15 = vcombine.high %v757_v8, %v761_v9  ;;  %v8518_v22 = vcombine.low %v757_v8, %v761_v9  ;;  %v869_v29 = vld [vmem:[#allocation8 + $0xc40] sm:$0xff]  ;;  %v8638_v36 = vcombine.low %v877_v20, %v881_v21 }
 0x141   :  { %v466_v4 = vmax.f32 %v408_v57, 0.0  ;;  %v468_v42 = vmax.f32 %v451_v0, 0.0  ;;  %v873_v32 = vld [vmem:[#allocation8 + $0xc60] sm:$0xff]  ;;  %v8503_v40 = vcombine.high %v741_v26, %v745_v28 }
 0x142   :  { %v8631_v44 = vcombine.high %v869_v29, %v873_v32  ;;  %v733_v52 = vld [vmem:[#allocation8 + $0x800] sm:$0xff]  ;;  %v8630_v57 = vcombine.low %v869_v29, %v873_v32 }
 0x143   :  { %3680 = vmatpush1.bf16.msra.mxu0 %v8542_v55  ;;  %v9622_v6 = vpack.c.bf16 %v466_v4, %v458_v56  ;;  %3723 = vmatpush1.bf16.msra.mxu1 %v8670_v59  ;;  %v9624_v43 = vpack.c.bf16 %v468_v42, %v460_v63  ;;  %v737_v53 = vld [vmem:[#allocation8 + $0x820] sm:$0xff]  ;;  %v8502_v56 = vcombine.low %v741_v26, %v745_v28 }
 0x144   :  { %3681 = vmatprep.subr.bf16.mxu0 %v8535_v61  ;;  %3724 = vmatprep.subr.bf16.mxu1 %v8663_v1  ;;  %v861_v54 = vld [vmem:[#allocation8 + $0xc00] sm:$0xff]  ;;  %v8495_v58 = vcombine.high %v733_v52, %v737_v53  ;;  %v8494_v2 = vcombine.low %v733_v52, %v737_v53 }
 0x145   :  { %3709 = vmatprep.mubr.bf16.mxu0 %v9622_v6  ;;  %3752 = vmatprep.mubr.bf16.mxu1 %v9624_v43  ;;  %v865_v55 = vld [vmem:[#allocation8 + $0xc20] sm:$0xff] }
 0x146   :  { %v8623_v59 = vcombine.high %v861_v54, %v865_v55  ;;  %v853_v61 = vld [vmem:[#allocation8 + $0xbc0] sm:$0xff]  ;;  %v8622_v3 = vcombine.low %v861_v54, %v865_v55 }
 0x147   :  { %3682 = vmatpush1.bf16.msra.mxu0 %v8534_v5  ;;  %3725 = vmatpush1.bf16.msra.mxu1 %v8662_v39  ;;  %v857_v63 = vld [vmem:[#allocation8 + $0xbe0] sm:$0xff] }
 0x148   :  { %3683 = vmatprep.subr.bf16.mxu0 %v8527_v41  ;;  %3726 = vmatprep.subr.bf16.mxu1 %v8655_v7  ;;  %v981_v0 = vld [vmem:[#allocation8 + $0xfc0] sm:$0xff]  ;;  %v8615_v4 = vcombine.high %v853_v61, %v857_v63  ;;  %v8614_v41 = vcombine.low %v853_v61, %v857_v63 }
 0x149   :  { %v985_v1 = vld [vmem:[#allocation8 + $0xfe0] sm:$0xff] }
 0x14a   :  { %v8743_v37 = vcombine.high %v981_v0, %v985_v1  ;;  %v845_v38 = vld [vmem:[#allocation8 + $0xb80] sm:$0xff]  ;;  %v8742_v7 = vcombine.low %v981_v0, %v985_v1  ;;  %v9632_v0 = vsub.s32 6, %v9562_v46 }
 0x14b   :  { %3684 = vmatpush1.bf16.msra.mxu0 %v8526_v13  ;;  %3727 = vmatpush1.bf16.msra.mxu1 %v8654_v14  ;;  %v849_v42 = vld [vmem:[#allocation8 + $0xba0] sm:$0xff] }
 0x14c   :  { %3685 = vmatprep.subr.bf16.mxu0 %v8519_v15  ;;  %3728 = vmatprep.subr.bf16.mxu1 %v8647_v16  ;;  %v973_v5 = vld [vmem:[#allocation8 + $0xf80] sm:$0xff]  ;;  %v8607_v8 = vcombine.high %v845_v38, %v849_v42  ;;  %v8606_v15 = vcombine.low %v845_v38, %v849_v42  ;;  %9938 = vst [vmem:[#allocation22_spill] sm:$0xff] %v9632_v0 }
 0x14d   :  { %v977_v39 = vld [vmem:[#allocation8 + $0xfa0] sm:$0xff] }
 0x14e   :  { %v8735_v9 = vcombine.high %v973_v5, %v977_v39  ;;  %v837_v10 = vld [vmem:[#allocation8 + $0xb40] sm:$0xff]  ;;  %v8734_v16 = vcombine.low %v973_v5, %v977_v39 }
 0x14f   :  { %3686 = vmatpush1.bf16.msra.mxu0 %v8518_v22  ;;  %3729 = vmatpush1.bf16.msra.mxu1 %v8646_v23  ;;  %v841_v11 = vld [vmem:[#allocation8 + $0xb60] sm:$0xff] }
 0x150   :  { %3687 = vmatprep.subr.bf16.mxu0 %v8511_v24  ;;  %3730 = vmatprep.subr.bf16.mxu1 %v8639_v25  ;;  %v965_v13 = vld [vmem:[#allocation8 + $0xf40] sm:$0xff]  ;;  %v8599_v17 = vcombine.high %v837_v10, %v841_v11  ;;  %v8598_v24 = vcombine.low %v837_v10, %v841_v11 }
 0x151   :  { %v969_v14 = vld [vmem:[#allocation8 + $0xf60] sm:$0xff] }
 0x152   :  { %v8727_v18 = vcombine.high %v965_v13, %v969_v14  ;;  %v829_v20 = vld [vmem:[#allocation8 + $0xb00] sm:$0xff]  ;;  %v8726_v25 = vcombine.low %v965_v13, %v969_v14 }
 0x153   :  { %3688 = vmatpush1.bf16.msra.mxu0 %v8510_v34  ;;  %3731 = vmatpush1.bf16.msra.mxu1 %v8638_v36  ;;  %v833_v21 = vld [vmem:[#allocation8 + $0xb20] sm:$0xff] }
 0x154   :  { %3689 = vmatprep.subr.bf16.mxu0 %v8503_v40  ;;  %3732 = vmatprep.subr.bf16.mxu1 %v8631_v44  ;;  %v957_v22 = vld [vmem:[#allocation8 + $0xf00] sm:$0xff]  ;;  %v8591_v26 = vcombine.high %v829_v20, %v833_v21  ;;  %v8590_v40 = vcombine.low %v829_v20, %v833_v21  ;;  %v534_v20 = vld [vmem:[#allocation8 + $0x1c8] sm:$0xff] }
 0x155   :  { %v961_v23 = vld [vmem:[#allocation8 + $0xf20] sm:$0xff]  ;;  %v538_v21 = vld [vmem:[#allocation8 + $0x1e8] sm:$0xff] }
 0x156   :  { %v8719_v28 = vcombine.high %v957_v22, %v961_v23  ;;  %v821_v29 = vld [vmem:[#allocation8 + $0xac0] sm:$0xff]  ;;  %v8718_v44 = vcombine.low %v957_v22, %v961_v23  ;;  %v662_v22 = vld [vmem:[#allocation8 + $0x5c8] sm:$0xff] }
 0x157   :  { %3690 = vmatpush1.bf16.msra.mxu0 %v8502_v56  ;;  %3733 = vmatpush1.bf16.msra.mxu1 %v8630_v57  ;;  %v825_v32 = vld [vmem:[#allocation8 + $0xae0] sm:$0xff]  ;;  %v666_v23 = vld [vmem:[#allocation8 + $0x5e8] sm:$0xff] }
 0x158   :  { %3691 = vmatprep.subr.bf16.mxu0 %v8495_v58  ;;  %3734 = vmatprep.subr.bf16.mxu1 %v8623_v59  ;;  %v949_v34 = vld [vmem:[#allocation8 + $0xec0] sm:$0xff]  ;;  %v8583_v52 = vcombine.high %v821_v29, %v825_v32  ;;  %v8582_v58 = vcombine.low %v821_v29, %v825_v32  ;;  %v9629_v59 = vsub.s32 4, %v9562_v46  ;;  %v526_v32 = vld [vmem:[#allocation8 + $0x188] sm:$0xff] }
 0x159   :  { %v953_v36 = vld [vmem:[#allocation8 + $0xee0] sm:$0xff] }
 0x15a   :  { %v8711_v53 = vcombine.high %v949_v34, %v953_v36  ;;  %v813_v54 = vld [vmem:[#allocation8 + $0xa80] sm:$0xff]  ;;  %v8710_v61 = vcombine.low %v949_v34, %v953_v36  ;;  %v176_v42 = vrot.slane %v9573_v50, %v9629_v59  ;;  %v8296_v34 = vcombine.low %v534_v20, %v538_v21  ;;  %v654_v36 = vld [vmem:[#allocation8 + $0x588] sm:$0xff] }
 0x15b   :  { %3692 = vmatpush1.bf16.msra.mxu0 %v8494_v2  ;;  %3735 = vmatpush1.bf16.msra.mxu1 %v8622_v3  ;;  %v817_v55 = vld [vmem:[#allocation8 + $0xaa0] sm:$0xff] }
 0x15c   :  { %3693 = vmatprep.subr.bf16.mxu0 %v8615_v4  ;;  %3736 = vmatprep.subr.bf16.mxu1 %v8743_v37  ;;  %v941_v56 = vld [vmem:[#allocation8 + $0xe80] sm:$0xff]  ;;  %v8575_v63 = vcombine.high %v813_v54, %v817_v55  ;;  %v8574_v38 = vcombine.low %v813_v54, %v817_v55  ;;  %v402_v14 = vadd.f32 %v9594_v12, %v176_v42  ;;  %v518_v55 = vld [vmem:[#allocation8 + $0x148] sm:$0xff] }
 0x15d   :  { %v945_v57 = vld [vmem:[#allocation8 + $0xea0] sm:$0xff] }
 0x15e   :  { %v8703_v1 = vcombine.high %v941_v56, %v945_v57  ;;  %v805_v2 = vld [vmem:[#allocation8 + $0xa40] sm:$0xff]  ;;  %v8702_v5 = vcombine.low %v941_v56, %v945_v57  ;;  %v522_v56 = vld [vmem:[#allocation8 + $0x168] sm:$0xff] }
 0x15f   :  { %3694 = vmatpush2.bf16.msra.mxu0 %v8614_v41  ;;  %3737 = vmatpush2.bf16.msra.mxu1 %v8742_v7  ;;  %v809_v3 = vld [vmem:[#allocation8 + $0xa60] sm:$0xff]  ;;  %v184_v41 = vrot.slane %v9573_v50, %v9632_v0 }
 0x160   :  { %3695 = vmatprep.subr.bf16.mxu0 %v8607_v8  ;;  %3738 = vmatprep.subr.bf16.mxu1 %v8735_v9  ;;  %v933_v4 = vld [vmem:[#allocation8 + $0xe40] sm:$0xff]  ;;  %v8567_v39 = vcombine.high %v805_v2, %v809_v3  ;;  %v8566_v11 = vcombine.low %v805_v2, %v809_v3  ;;  %v8281_v2 = vcombine.high %v518_v55, %v522_v56 }
 0x161   :  { %v937_v37 = vld [vmem:[#allocation8 + $0xe60] sm:$0xff]  ;;  %v449_v50 = vadd.f32 %v9611_v45, %v184_v41  ;;  %v530_v45 = vld [vmem:[#allocation8 + $0x1a8] sm:$0xff] }
 0x162   :  { %v8695_v46 = vcombine.high %v933_v4, %v937_v37  ;;  %v797_v7 = vld [vmem:[#allocation8 + $0xa00] sm:$0xff]  ;;  %v8694_v13 = vcombine.low %v933_v4, %v937_v37  ;;  %v8289_v54 = vcombine.high %v526_v32, %v530_v45  ;;  %v510_v4 = vld [vmem:[#allocation8 + $0x108] sm:$0xff] }
 0x163   :  { %3696 = vmatpush2.bf16.msra.mxu0 %v8606_v15  ;;  %3739 = vmatpush2.bf16.msra.mxu1 %v8734_v16  ;;  %v801_v8 = vld [vmem:[#allocation8 + $0xa20] sm:$0xff]  ;;  %v406_v15 = vadd.f32 %v9606_v33, %v176_v42  ;;  %v8297_v33 = vcombine.high %v534_v20, %v538_v21  ;;  %v467_v29 = vmax.f32 %v449_v50, 0.0  ;;  %v514_v37 = vld [vmem:[#allocation8 + $0x128] sm:$0xff] }
 0x164   :  { %3697 = vmatprep.subr.bf16.mxu0 %v8599_v17  ;;  %3740 = vmatprep.subr.bf16.mxu1 %v8727_v18  ;;  %v925_v9 = vld [vmem:[#allocation8 + $0xe00] sm:$0xff]  ;;  %v8559_v16 = vcombine.high %v797_v7, %v801_v8  ;;  %v445_v17 = vadd.f32 %v9598_v19, %v184_v41  ;;  %v8425_v19 = vcombine.high %v662_v22, %v666_v23  ;;  %v642_v42 = vld [vmem:[#allocation8 + $0x528] sm:$0xff] }
 0x165   :  { %v929_v10 = vld [vmem:[#allocation8 + $0xe20] sm:$0xff]  ;;  %v8273_v41 = vcombine.high %v510_v4, %v514_v37  ;;  %v622_v50 = vld [vmem:[#allocation8 + $0x488] sm:$0xff] }
 0x166   :  { %v8687_v18 = vcombine.high %v925_v9, %v929_v10  ;;  %v8686_v12 = vcombine.low %v925_v9, %v929_v10  ;;  %v630_v9 = vld [vmem:[#allocation8 + $0x4c8] sm:$0xff] }
 0x167   :  { %3698 = vmatpush2.bf16.msra.mxu0 %v8598_v24  ;;  %3741 = vmatpush2.bf16.msra.mxu1 %v8726_v25  ;;  %v8558_v24 = vcombine.low %v797_v7, %v801_v8  ;;  %v457_v25 = vmax.f32 %v402_v14, 0.0  ;;  %v502_v7 = vld [vmem:[#allocation8 + $0xc8] sm:$0xff] }
 0x168   :  { %3699 = vmatprep.subr.bf16.mxu0 %v8591_v26  ;;  %3742 = vmatprep.subr.bf16.mxu1 %v8719_v28  ;;  %v465_v26 = vmax.f32 %v406_v15, 0.0  ;;  %v459_v28 = vmax.f32 %v445_v17, 0.0  ;;  %v506_v8 = vld [vmem:[#allocation8 + $0xe8] sm:$0xff] }
 0x169   :  { %v634_v10 = vld [vmem:[#allocation8 + $0x4e8] sm:$0xff]  ;;  %v8265_v14 = vcombine.high %v502_v7, %v506_v8  ;;  %v8264_v20 = vcombine.low %v502_v7, %v506_v8 }
 0x16a   :  { %v8393_v15 = vcombine.high %v630_v9, %v634_v10  ;;  %v498_v17 = vld [vmem:[#allocation8 + $0xa8] sm:$0xff]  ;;  %v8392_v21 = vcombine.low %v630_v9, %v634_v10 }
 0x16b   :  { %3700 = vmatpush2.bf16.msra.mxu0 %v8590_v40  ;;  %3743 = vmatpush2.bf16.msra.mxu1 %v8718_v44  ;;  %v658_v40 = vld [vmem:[#allocation8 + $0x5a8] sm:$0xff]  ;;  %v9642_v44 = vpack.c.bf16 %v465_v26, %v457_v25 }
 0x16c   :  { %3701 = vmatprep.subr.bf16.mxu0 %v8583_v52  ;;  %3744 = vmatprep.subr.bf16.mxu1 %v8711_v53  ;;  %v8424_v52 = vcombine.low %v662_v22, %v666_v23  ;;  %v9644_v53 = vpack.c.bf16 %v467_v29, %v459_v28  ;;  %v8417_v57 = vcombine.high %v654_v36, %v658_v40  ;;  %v490_v25 = vld [vmem:[#allocation8 + $0x68] sm:$0xff] }
 0x16d   :  { %v614_v26 = vld [vmem:[#allocation8 + $0x448] sm:$0xff] }
 0x16e   :  { %v582_v7 = vld [vmem:[#allocation8 + $0x348] sm:$0xff] }
 0x16f   :  { %3702 = vmatpush2.bf16.msra.mxu0 %v8582_v58  ;;  %3745 = vmatpush2.bf16.msra.mxu1 %v8710_v61  ;;  %v646_v58 = vld [vmem:[#allocation8 + $0x548] sm:$0xff] }
 0x170   :  { %3703 = vmatprep.subr.bf16.mxu0 %v8575_v63  ;;  %3746 = vmatprep.subr.bf16.mxu1 %v8703_v1  ;;  %v650_v61 = vld [vmem:[#allocation8 + $0x568] sm:$0xff]  ;;  %v8288_v63 = vcombine.low %v526_v32, %v530_v45  ;;  %v8416_v1 = vcombine.low %v654_v36, %v658_v40 }
 0x171   :  { %v8409_v3 = vcombine.high %v646_v58, %v650_v61  ;;  %v478_v32 = vld [vmem:[#allocation8 + $0x8] sm:$0xff] }
 0x172   :  { %v482_v45 = vld [vmem:[#allocation8 + $0x28] sm:$0xff] }
 0x173   :  { %3704 = vmatpush2.bf16.msra.mxu0 %v8574_v38  ;;  %3747 = vmatpush2.bf16.msra.mxu1 %v8702_v5  ;;  %v638_v38 = vld [vmem:[#allocation8 + $0x508] sm:$0xff]  ;;  %v8280_v5 = vcombine.low %v518_v55, %v522_v56 }
 0x174   :  { %3705 = vmatprep.subr.bf16.mxu0 %v8567_v39  ;;  %3748 = vmatprep.subr.bf16.mxu1 %v8695_v46  ;;  %v8408_v39 = vcombine.low %v646_v58, %v650_v61  ;;  %v8401_v46 = vcombine.high %v638_v38, %v642_v42  ;;  %v610_v36 = vld [vmem:[#allocation8 + $0x428] sm:$0xff] }
 0x175   :  { %v598_v56 = vld [vmem:[#allocation8 + $0x3c8] sm:$0xff] }
 0x176   :  { %v726_v58 = vld [vmem:[#allocation8 + $0x7c8] sm:$0xff] }
 0x177   :  { %3706 = vmatpush2.bf16.msra.mxu0 %v8566_v11  ;;  %3749 = vmatpush2.bf16.msra.mxu1 %v8694_v13  ;;  %v8272_v11 = vcombine.low %v510_v4, %v514_v37  ;;  %v8400_v13 = vcombine.low %v638_v38, %v642_v42  ;;  %v730_v61 = vld [vmem:[#allocation8 + $0x7e8] sm:$0xff] }
 0x178   :  { %3707 = vmatprep.subr.bf16.mxu0 %v8559_v16  ;;  %3750 = vmatprep.subr.bf16.mxu1 %v8687_v18  ;;  %v494_v16 = vld [vmem:[#allocation8 + $0x88] sm:$0xff] }
 0x179   :  { %v626_v18 = vld [vmem:[#allocation8 + $0x4a8] sm:$0xff]  ;;  %v8257_v22 = vcombine.high %v494_v16, %v498_v17 }
 0x17a   :  { %v8385_v23 = vcombine.high %v622_v50, %v626_v18  ;;  %v8384_v28 = vcombine.low %v622_v50, %v626_v18  ;;  %v590_v4 = vld [vmem:[#allocation8 + $0x388] sm:$0xff] }
 0x17b   :  { %3708 = vmatpush2.bf16.msra.mxu0 %v8558_v24  ;;  %3751 = vmatpush2.bf16.msra.mxu1 %v8686_v12  ;;  %v486_v24 = vld [vmem:[#allocation8 + $0x48] sm:$0xff] }
 0x17c   :  { %3763 = vmatprep.subr.bf16.mxu0 %v8297_v33  ;;  %3806 = vmatprep.subr.bf16.mxu1 %v8425_v19  ;;  %v618_v12 = vld [vmem:[#allocation8 + $0x468] sm:$0xff]  ;;  %v8256_v33 = vcombine.low %v494_v16, %v498_v17  ;;  %v8249_v29 = vcombine.high %v486_v24, %v490_v25  ;;  %v8248_v40 = vcombine.low %v486_v24, %v490_v25 }
 0x17d   :  { %v8377_v19 = vcombine.high %v614_v26, %v618_v12  ;;  %v594_v37 = vld [vmem:[#allocation8 + $0x3a8] sm:$0xff] }
 0x17e   :  { %3710 = vmatmul.mubr.bf16.vlgmr.msra.gmra.mxu0 %v9642_v44  ;;  %3753 = vmatmul.mubr.bf16.vlgmr.msra.gmra.mxu1 %v9644_v53  ;;  %v718_v38 = vld [vmem:[#allocation8 + $0x788] sm:$0xff] }
 0x17f   :  { %3764 = vmatpush1.bf16.msra.mxu0 %v8296_v34  ;;  %3795 = vmatprep.mubr.bf16.mxu0 %v9600_v27  ;;  %v606_v34 = vld [vmem:[#allocation8 + $0x408] sm:$0xff] }
 0x180   :  { %3807 = vmatpush1.bf16.msra.mxu1 %v8424_v52  ;;  %3838 = vmatprep.mubr.bf16.mxu1 %v9604_v31  ;;  %v8376_v52 = vcombine.low %v614_v26, %v618_v12  ;;  %v8369_v55 = vcombine.high %v606_v34, %v610_v36  ;;  %v722_v42 = vld [vmem:[#allocation8 + $0x7a8] sm:$0xff] }
 0x181   :  { %3765 = vmatprep.subr.bf16.mxu0 %v8289_v54  ;;  %3808 = vmatprep.subr.bf16.mxu1 %v8417_v57  ;;  %v8241_v54 = vcombine.high %v478_v32, %v482_v45  ;;  %v602_v57 = vld [vmem:[#allocation8 + $0x3e8] sm:$0xff] }
 0x182   :  { %v586_v8 = vld [vmem:[#allocation8 + $0x368] sm:$0xff] }
 0x183   :  { %3766 = vmatpush1.bf16.msra.mxu0 %v8288_v63  ;;  %v8240_v63 = vcombine.low %v478_v32, %v482_v45  ;;  %v710_v9 = vld [vmem:[#allocation8 + $0x748] sm:$0xff] }
 0x184   :  { %3809 = vmatpush1.bf16.msra.mxu1 %v8416_v1  ;;  %3767 = vmatprep.subr.bf16.mxu0 %v8281_v2  ;;  %v8368_v1 = vcombine.low %v606_v34, %v610_v36  ;;  %v8361_v2 = vcombine.high %v598_v56, %v602_v57  ;;  %v714_v10 = vld [vmem:[#allocation8 + $0x768] sm:$0xff] }
 0x185   :  { %3810 = vmatprep.subr.bf16.mxu1 %v8409_v3  ;;  %v8489_v3 = vcombine.high %v726_v58, %v730_v61  ;;  %v574_v16 = vld [vmem:[#allocation8 + $0x308] sm:$0xff] }
 0x186   :  { %v578_v17 = vld [vmem:[#allocation8 + $0x328] sm:$0xff] }
 0x187   :  { %3768 = vmatpush1.bf16.msra.mxu0 %v8280_v5  ;;  %v8360_v5 = vcombine.low %v598_v56, %v602_v57  ;;  %v702_v50 = vld [vmem:[#allocation8 + $0x708] sm:$0xff] }
 0x188   :  { %3811 = vmatpush1.bf16.msra.mxu1 %v8408_v39  ;;  %3769 = vmatprep.subr.bf16.mxu0 %v8273_v41  ;;  %v8488_v39 = vcombine.low %v726_v58, %v730_v61  ;;  %v8353_v41 = vcombine.high %v590_v4, %v594_v37  ;;  %v706_v18 = vld [vmem:[#allocation8 + $0x728] sm:$0xff] }
 0x189   :  { %3812 = vmatprep.subr.bf16.mxu1 %v8401_v46  ;;  %v8481_v46 = vcombine.high %v718_v38, %v722_v42  ;;  %v566_v24 = vld [vmem:[#allocation8 + $0x2c8] sm:$0xff] }
 0x18a   :  { %v570_v25 = vld [vmem:[#allocation8 + $0x2e8] sm:$0xff] }
 0x18b   :  { %3770 = vmatpush1.bf16.msra.mxu0 %v8272_v11  ;;  %v8352_v11 = vcombine.low %v590_v4, %v594_v37  ;;  %v694_v26 = vld [vmem:[#allocation8 + $0x6c8] sm:$0xff] }
 0x18c   :  { %3813 = vmatpush1.bf16.msra.mxu1 %v8400_v13  ;;  %3771 = vmatprep.subr.bf16.mxu0 %v8265_v14  ;;  %v8480_v13 = vcombine.low %v718_v38, %v722_v42  ;;  %v8345_v14 = vcombine.high %v582_v7, %v586_v8  ;;  %v698_v12 = vld [vmem:[#allocation8 + $0x6e8] sm:$0xff] }
 0x18d   :  { %3814 = vmatprep.subr.bf16.mxu1 %v8393_v15  ;;  %v8473_v15 = vcombine.high %v710_v9, %v714_v10  ;;  %v558_v32 = vld [vmem:[#allocation8 + $0x288] sm:$0xff] }
 0x18e   :  { %v562_v45 = vld [vmem:[#allocation8 + $0x2a8] sm:$0xff] }
 0x18f   :  { %3772 = vmatpush1.bf16.msra.mxu0 %v8264_v20  ;;  %v8344_v20 = vcombine.low %v582_v7, %v586_v8  ;;  %v686_v34 = vld [vmem:[#allocation8 + $0x688] sm:$0xff] }
 0x190   :  { %3815 = vmatpush1.bf16.msra.mxu1 %v8392_v21  ;;  %3773 = vmatprep.subr.bf16.mxu0 %v8257_v22  ;;  %v8472_v21 = vcombine.low %v710_v9, %v714_v10  ;;  %v8337_v22 = vcombine.high %v574_v16, %v578_v17  ;;  %v690_v36 = vld [vmem:[#allocation8 + $0x6a8] sm:$0xff] }
 0x191   :  { %3816 = vmatprep.subr.bf16.mxu1 %v8385_v23  ;;  %v8465_v23 = vcombine.high %v702_v50, %v706_v18  ;;  %v550_v56 = vld [vmem:[#allocation8 + $0x248] sm:$0xff] }
 0x192   :  { %v554_v57 = vld [vmem:[#allocation8 + $0x268] sm:$0xff] }
 0x193   :  { %3774 = vmatpush1.bf16.msra.mxu0 %v8256_v33  ;;  %v8336_v33 = vcombine.low %v574_v16, %v578_v17  ;;  %v678_v58 = vld [vmem:[#allocation8 + $0x648] sm:$0xff] }
 0x194   :  { %3817 = vmatpush1.bf16.msra.mxu1 %v8384_v28  ;;  %3775 = vmatprep.subr.bf16.mxu0 %v8249_v29  ;;  %v8464_v28 = vcombine.low %v702_v50, %v706_v18  ;;  %v8329_v29 = vcombine.high %v566_v24, %v570_v25  ;;  %v682_v61 = vld [vmem:[#allocation8 + $0x668] sm:$0xff] }
 0x195   :  { %3818 = vmatprep.subr.bf16.mxu1 %v8377_v19  ;;  %v8457_v19 = vcombine.high %v694_v26, %v698_v12  ;;  %v542_v4 = vld [vmem:[#allocation8 + $0x208] sm:$0xff] }
 0x196   :  { %v546_v37 = vld [vmem:[#allocation8 + $0x228] sm:$0xff] }
 0x197   :  { %3776 = vmatpush1.bf16.msra.mxu0 %v8248_v40  ;;  %v8328_v40 = vcombine.low %v566_v24, %v570_v25  ;;  %v670_v38 = vld [vmem:[#allocation8 + $0x608] sm:$0xff] }
 0x198   :  { %3819 = vmatpush1.bf16.msra.mxu1 %v8376_v52  ;;  %3777 = vmatprep.subr.bf16.mxu0 %v8241_v54  ;;  %v8456_v52 = vcombine.low %v694_v26, %v698_v12  ;;  %v8321_v54 = vcombine.high %v558_v32, %v562_v45  ;;  %v674_v42 = vld [vmem:[#allocation8 + $0x628] sm:$0xff] }
 0x199   :  { %3820 = vmatprep.subr.bf16.mxu1 %v8369_v55  ;;  %v8449_v55 = vcombine.high %v686_v34, %v690_v36  ;;  %v790_v7 = vld [vmem:[#allocation8 + $0x9c8] sm:$0xff] }
 0x19a   :  { %v794_v8 = vld [vmem:[#allocation8 + $0x9e8] sm:$0xff] }
 0x19b   :  { %3778 = vmatpush1.bf16.msra.mxu0 %v8240_v63  ;;  %v8320_v63 = vcombine.low %v558_v32, %v562_v45  ;;  %v918_v9 = vld [vmem:[#allocation8 + $0xdc8] sm:$0xff]  ;;  %v8552_v50 = vcombine.low %v790_v7, %v794_v8 }
 0x19c   :  { %3821 = vmatpush1.bf16.msra.mxu1 %v8368_v1  ;;  %3779 = vmatprep.subr.bf16.mxu0 %v8361_v2  ;;  %v8448_v1 = vcombine.low %v686_v34, %v690_v36  ;;  %v8313_v2 = vcombine.high %v550_v56, %v554_v57  ;;  %v922_v10 = vld [vmem:[#allocation8 + $0xde8] sm:$0xff] }
 0x19d   :  { %3822 = vmatprep.subr.bf16.mxu1 %v8489_v3  ;;  %v8441_v3 = vcombine.high %v678_v58, %v682_v61  ;;  %v782_v16 = vld [vmem:[#allocation8 + $0x988] sm:$0xff] }
 0x19e   :  { %v786_v17 = vld [vmem:[#allocation8 + $0x9a8] sm:$0xff] }
 0x19f   :  { %3780 = vmatpush2.bf16.msra.mxu0 %v8360_v5  ;;  %v8312_v5 = vcombine.low %v550_v56, %v554_v57  ;;  %v910_v18 = vld [vmem:[#allocation8 + $0xd88] sm:$0xff] }
 0x1a0   :  { %3823 = vmatpush2.bf16.msra.mxu1 %v8488_v39  ;;  %3781 = vmatprep.subr.bf16.mxu0 %v8353_v41  ;;  %v8440_v39 = vcombine.low %v678_v58, %v682_v61  ;;  %v8305_v41 = vcombine.high %v542_v4, %v546_v37  ;;  %v778_v24 = vld [vmem:[#allocation8 + $0x968] sm:$0xff] }
 0x1a1   :  { %3824 = vmatprep.subr.bf16.mxu1 %v8481_v46  ;;  %v8433_v46 = vcombine.high %v670_v38, %v674_v42  ;;  %v902_v26 = vld [vmem:[#allocation8 + $0xd48] sm:$0xff] }
 0x1a2   :  { %v906_v12 = vld [vmem:[#allocation8 + $0xd68] sm:$0xff] }
 0x1a3   :  { %3782 = vmatpush2.bf16.msra.mxu0 %v8352_v11  ;;  %v8304_v11 = vcombine.low %v542_v4, %v546_v37  ;;  %v766_v32 = vld [vmem:[#allocation8 + $0x908] sm:$0xff] }
 0x1a4   :  { %3825 = vmatpush2.bf16.msra.mxu1 %v8480_v13  ;;  %3783 = vmatprep.subr.bf16.mxu0 %v8345_v14  ;;  %v8432_v13 = vcombine.low %v670_v38, %v674_v42  ;;  %v8553_v14 = vcombine.high %v790_v7, %v794_v8  ;;  %v770_v45 = vld [vmem:[#allocation8 + $0x928] sm:$0xff] }
 0x1a5   :  { %3826 = vmatprep.subr.bf16.mxu1 %v8473_v15  ;;  %v8681_v15 = vcombine.high %v918_v9, %v922_v10  ;;  %v894_v34 = vld [vmem:[#allocation8 + $0xd08] sm:$0xff] }
 0x1a6   :  { %v898_v36 = vld [vmem:[#allocation8 + $0xd28] sm:$0xff] }
 0x1a7   :  { %3784 = vmatpush2.bf16.msra.mxu0 %v8344_v20  ;;  %v914_v20 = vld [vmem:[#allocation8 + $0xda8] sm:$0xff] }
 0x1a8   :  { %3827 = vmatpush2.bf16.msra.mxu1 %v8472_v21  ;;  %3785 = vmatprep.subr.bf16.mxu0 %v8337_v22  ;;  %v8680_v21 = vcombine.low %v918_v9, %v922_v10  ;;  %v8545_v22 = vcombine.high %v782_v16, %v786_v17  ;;  %v8673_v25 = vcombine.high %v910_v18, %v914_v20  ;;  %v758_v56 = vld [vmem:[#allocation8 + $0x8c8] sm:$0xff] }
 0x1a9   :  { %3828 = vmatprep.subr.bf16.mxu1 %v8465_v23  ;;  %v774_v23 = vld [vmem:[#allocation8 + $0x948] sm:$0xff] }
 0x1aa   :  { %v762_v57 = vld [vmem:[#allocation8 + $0x8e8] sm:$0xff] }
 0x1ab   :  { %3786 = vmatpush2.bf16.msra.mxu0 %v8336_v33  ;;  %v8544_v33 = vcombine.low %v782_v16, %v786_v17  ;;  %v886_v58 = vld [vmem:[#allocation8 + $0xcc8] sm:$0xff] }
 0x1ac   :  { %3829 = vmatpush2.bf16.msra.mxu1 %v8464_v28  ;;  %3787 = vmatprep.subr.bf16.mxu0 %v8329_v29  ;;  %v8672_v28 = vcombine.low %v910_v18, %v914_v20  ;;  %v8537_v29 = vcombine.high %v774_v23, %v778_v24  ;;  %v890_v61 = vld [vmem:[#allocation8 + $0xce8] sm:$0xff] }
 0x1ad   :  { %3830 = vmatprep.subr.bf16.mxu1 %v8457_v19  ;;  %v8665_v19 = vcombine.high %v902_v26, %v906_v12  ;;  %v750_v4 = vld [vmem:[#allocation8 + $0x888] sm:$0xff] }
 0x1ae   :  { %v754_v37 = vld [vmem:[#allocation8 + $0x8a8] sm:$0xff] }
 0x1af   :  { %3788 = vmatpush2.bf16.msra.mxu0 %v8328_v40  ;;  %v8536_v40 = vcombine.low %v774_v23, %v778_v24  ;;  %v878_v38 = vld [vmem:[#allocation8 + $0xc88] sm:$0xff] }
 0x1b0   :  { %3831 = vmatpush2.bf16.msra.mxu1 %v8456_v52  ;;  %3789 = vmatprep.subr.bf16.mxu0 %v8321_v54  ;;  %v8664_v52 = vcombine.low %v902_v26, %v906_v12  ;;  %v8529_v54 = vcombine.high %v766_v32, %v770_v45  ;;  %v882_v42 = vld [vmem:[#allocation8 + $0xca8] sm:$0xff] }
 0x1b1   :  { %3832 = vmatprep.subr.bf16.mxu1 %v8449_v55  ;;  %v8657_v55 = vcombine.high %v894_v34, %v898_v36  ;;  %v742_v7 = vld [vmem:[#allocation8 + $0x848] sm:$0xff] }
 0x1b2   :  { %v746_v8 = vld [vmem:[#allocation8 + $0x868] sm:$0xff] }
 0x1b3   :  { %3790 = vmatpush2.bf16.msra.mxu0 %v8320_v63  ;;  %v8528_v63 = vcombine.low %v766_v32, %v770_v45  ;;  %v870_v9 = vld [vmem:[#allocation8 + $0xc48] sm:$0xff]  ;;  %v8504_v20 = vcombine.low %v742_v7, %v746_v8 }
 0x1b4   :  { %3833 = vmatpush2.bf16.msra.mxu1 %v8448_v1  ;;  %3791 = vmatprep.subr.bf16.mxu0 %v8313_v2  ;;  %v8656_v1 = vcombine.low %v894_v34, %v898_v36  ;;  %v8521_v2 = vcombine.high %v758_v56, %v762_v57  ;;  %v874_v10 = vld [vmem:[#allocation8 + $0xc68] sm:$0xff] }
 0x1b5   :  { %3834 = vmatprep.subr.bf16.mxu1 %v8441_v3  ;;  %v8649_v3 = vcombine.high %v886_v58, %v890_v61  ;;  %v734_v16 = vld [vmem:[#allocation8 + $0x808] sm:$0xff] }
 0x1b6   :  { %v738_v17 = vld [vmem:[#allocation8 + $0x828] sm:$0xff] }
 0x1b7   :  { %3792 = vmatpush2.bf16.msra.mxu0 %v8312_v5  ;;  %v8520_v5 = vcombine.low %v758_v56, %v762_v57  ;;  %v866_v18 = vld [vmem:[#allocation8 + $0xc28] sm:$0xff] }
 0x1b8   :  { %3835 = vmatpush2.bf16.msra.mxu1 %v8440_v39  ;;  %3793 = vmatprep.subr.bf16.mxu0 %v8305_v41  ;;  %v8648_v39 = vcombine.low %v886_v58, %v890_v61  ;;  %v8513_v41 = vcombine.high %v750_v4, %v754_v37  ;;  %v854_v24 = vld [vmem:[#allocation8 + $0xbc8] sm:$0xff] }
 0x1b9   :  { %3836 = vmatprep.subr.bf16.mxu1 %v8433_v46  ;;  %v8641_v46 = vcombine.high %v878_v38, %v882_v42  ;;  %v982_v26 = vld [vmem:[#allocation8 + $0xfc8] sm:$0xff] }
 0x1ba   :  { %v986_v12 = vld [vmem:[#allocation8 + $0xfe8] sm:$0xff] }
 0x1bb   :  { %3794 = vmatpush2.bf16.msra.mxu0 %v8304_v11  ;;  %v8512_v11 = vcombine.low %v750_v4, %v754_v37  ;;  %v846_v32 = vld [vmem:[#allocation8 + $0xb88] sm:$0xff] }
 0x1bc   :  { %3837 = vmatpush2.bf16.msra.mxu1 %v8432_v13  ;;  %3849 = vmatprep.subr.bf16.mxu0 %v8553_v14  ;;  %v8640_v13 = vcombine.low %v878_v38, %v882_v42  ;;  %v8505_v14 = vcombine.high %v742_v7, %v746_v8  ;;  %v850_v45 = vld [vmem:[#allocation8 + $0xba8] sm:$0xff] }
 0x1bd   :  { %3892 = vmatprep.subr.bf16.mxu1 %v8681_v15  ;;  %v8633_v15 = vcombine.high %v870_v9, %v874_v10  ;;  %v974_v34 = vld [vmem:[#allocation8 + $0xf88] sm:$0xff] }
 0x1be   :  { %3796 = vmatmul.mubr.bf16.vlgmr.msra.gmra.mxu0 %v9602_v30  ;;  %v978_v36 = vld [vmem:[#allocation8 + $0xfa8] sm:$0xff] }
 0x1bf   :  { %3839 = vmatmul.mubr.bf16.vlgmr.msra.gmra.mxu1 %v9608_v35  ;;  %3850 = vmatpush1.bf16.msra.mxu0 %v8552_v50  ;;  %v862_v50 = vld [vmem:[#allocation8 + $0xc08] sm:$0xff] }
 0x1c0   :  { %3881 = vmatprep.mubr.bf16.mxu0 %v9622_v6  ;;  %3893 = vmatpush1.bf16.msra.mxu1 %v8680_v21  ;;  %v8632_v21 = vcombine.low %v870_v9, %v874_v10  ;;  %v8625_v23 = vcombine.high %v862_v50, %v866_v18  ;;  %v838_v56 = vld [vmem:[#allocation8 + $0xb48] sm:$0xff] }
 0x1c1   :  { %3924 = vmatprep.mubr.bf16.mxu1 %v9624_v43  ;;  %3851 = vmatprep.subr.bf16.mxu0 %v8545_v22  ;;  %v8497_v22 = vcombine.high %v734_v16, %v738_v17  ;;  %v842_v57 = vld [vmem:[#allocation8 + $0xb68] sm:$0xff] }
 0x1c2   :  { %3894 = vmatprep.subr.bf16.mxu1 %v8673_v25  ;;  %v858_v25 = vld [vmem:[#allocation8 + $0xbe8] sm:$0xff] }
 0x1c3   :  { %3852 = vmatpush1.bf16.msra.mxu0 %v8544_v33  ;;  %v8496_v33 = vcombine.low %v734_v16, %v738_v17  ;;  %v966_v58 = vld [vmem:[#allocation8 + $0xf48] sm:$0xff] }
 0x1c4   :  { %3895 = vmatpush1.bf16.msra.mxu1 %v8672_v28  ;;  %3853 = vmatprep.subr.bf16.mxu0 %v8537_v29  ;;  %v8624_v28 = vcombine.low %v862_v50, %v866_v18  ;;  %v8617_v29 = vcombine.high %v854_v24, %v858_v25  ;;  %v970_v61 = vld [vmem:[#allocation8 + $0xf68] sm:$0xff] }
 0x1c5   :  { %3896 = vmatprep.subr.bf16.mxu1 %v8665_v19  ;;  %v8745_v19 = vcombine.high %v982_v26, %v986_v12  ;;  %v830_v4 = vld [vmem:[#allocation8 + $0xb08] sm:$0xff] }
 0x1c6   :  { %v834_v37 = vld [vmem:[#allocation8 + $0xb28] sm:$0xff] }
 0x1c7   :  { %3854 = vmatpush1.bf16.msra.mxu0 %v8536_v40  ;;  %v8616_v40 = vcombine.low %v854_v24, %v858_v25  ;;  %v958_v38 = vld [vmem:[#allocation8 + $0xf08] sm:$0xff] }
 0x1c8   :  { %3897 = vmatpush1.bf16.msra.mxu1 %v8664_v52  ;;  %3855 = vmatprep.subr.bf16.mxu0 %v8529_v54  ;;  %v8744_v52 = vcombine.low %v982_v26, %v986_v12  ;;  %v8609_v54 = vcombine.high %v846_v32, %v850_v45  ;;  %v962_v42 = vld [vmem:[#allocation8 + $0xf28] sm:$0xff] }
 0x1c9   :  { %3898 = vmatprep.subr.bf16.mxu1 %v8657_v55  ;;  %v8737_v55 = vcombine.high %v974_v34, %v978_v36  ;;  %v822_v7 = vld [vmem:[#allocation8 + $0xac8] sm:$0xff] }
 0x1ca   :  { %v826_v8 = vld [vmem:[#allocation8 + $0xae8] sm:$0xff] }
 0x1cb   :  { %3856 = vmatpush1.bf16.msra.mxu0 %v8528_v63  ;;  %v8608_v63 = vcombine.low %v846_v32, %v850_v45  ;;  %v950_v9 = vld [vmem:[#allocation8 + $0xec8] sm:$0xff] }
 0x1cc   :  { %3899 = vmatpush1.bf16.msra.mxu1 %v8656_v1  ;;  %3857 = vmatprep.subr.bf16.mxu0 %v8521_v2  ;;  %v8736_v1 = vcombine.low %v974_v34, %v978_v36  ;;  %v8601_v2 = vcombine.high %v838_v56, %v842_v57  ;;  %v954_v10 = vld [vmem:[#allocation8 + $0xee8] sm:$0xff] }
 0x1cd   :  { %3900 = vmatprep.subr.bf16.mxu1 %v8649_v3  ;;  %v8729_v3 = vcombine.high %v966_v58, %v970_v61  ;;  %v814_v16 = vld [vmem:[#allocation8 + $0xa88] sm:$0xff] }
 0x1ce   :  { %v818_v17 = vld [vmem:[#allocation8 + $0xaa8] sm:$0xff] }
 0x1cf   :  { %3858 = vmatpush1.bf16.msra.mxu0 %v8520_v5  ;;  %v8600_v5 = vcombine.low %v838_v56, %v842_v57  ;;  %v942_v50 = vld [vmem:[#allocation8 + $0xe88] sm:$0xff]  ;;  %v535_v56 = vld [vmem:[#allocation8 + $0x1d0] sm:$0xff] }
 0x1d0   :  { %3901 = vmatpush1.bf16.msra.mxu1 %v8648_v39  ;;  %3859 = vmatprep.subr.bf16.mxu0 %v8513_v41  ;;  %v8728_v39 = vcombine.low %v966_v58, %v970_v61  ;;  %v8593_v41 = vcombine.high %v830_v4, %v834_v37  ;;  %v946_v18 = vld [vmem:[#allocation8 + $0xea8] sm:$0xff]  ;;  %v539_v57 = vld [vmem:[#allocation8 + $0x1f0] sm:$0xff] }
 0x1d1   :  { %3902 = vmatprep.subr.bf16.mxu1 %v8641_v46  ;;  %v8721_v46 = vcombine.high %v958_v38, %v962_v42  ;;  %v806_v24 = vld [vmem:[#allocation8 + $0xa48] sm:$0xff]  ;;  %v663_v58 = vld [vmem:[#allocation8 + $0x5d0] sm:$0xff] }
 0x1d2   :  { %v810_v25 = vld [vmem:[#allocation8 + $0xa68] sm:$0xff]  ;;  %v667_v61 = vld [vmem:[#allocation8 + $0x5f0] sm:$0xff] }
 0x1d3   :  { %3860 = vmatpush1.bf16.msra.mxu0 %v8512_v11  ;;  %v8592_v11 = vcombine.low %v830_v4, %v834_v37  ;;  %v934_v26 = vld [vmem:[#allocation8 + $0xe48] sm:$0xff]  ;;  %v8427_v4 = vcombine.high %v663_v58, %v667_v61  ;;  %v527_v37 = vld [vmem:[#allocation8 + $0x190] sm:$0xff] }
 0x1d4   :  { %3903 = vmatpush1.bf16.msra.mxu1 %v8640_v13  ;;  %3861 = vmatprep.subr.bf16.mxu0 %v8505_v14  ;;  %v8720_v13 = vcombine.low %v958_v38, %v962_v42  ;;  %v8585_v14 = vcombine.high %v822_v7, %v826_v8  ;;  %v938_v12 = vld [vmem:[#allocation8 + $0xe68] sm:$0xff]  ;;  %v531_v38 = vld [vmem:[#allocation8 + $0x1b0] sm:$0xff]  ;;  %v8298_v42 = vcombine.low %v535_v56, %v539_v57 }
 0x1d5   :  { %3904 = vmatprep.subr.bf16.mxu1 %v8633_v15  ;;  %v8713_v15 = vcombine.high %v950_v9, %v954_v10  ;;  %v798_v32 = vld [vmem:[#allocation8 + $0xa08] sm:$0xff] }
 0x1d6   :  { %v802_v45 = vld [vmem:[#allocation8 + $0xa28] sm:$0xff] }
 0x1d7   :  { %3862 = vmatpush1.bf16.msra.mxu0 %v8504_v20  ;;  %v8584_v20 = vcombine.low %v822_v7, %v826_v8  ;;  %v926_v34 = vld [vmem:[#allocation8 + $0xe08] sm:$0xff]  ;;  %v8291_v7 = vcombine.high %v527_v37, %v531_v38  ;;  %v519_v8 = vld [vmem:[#allocation8 + $0x150] sm:$0xff] }
 0x1d8   :  { %3905 = vmatpush1.bf16.msra.mxu1 %v8632_v21  ;;  %3863 = vmatprep.subr.bf16.mxu0 %v8497_v22  ;;  %v8712_v21 = vcombine.low %v950_v9, %v954_v10  ;;  %v8577_v22 = vcombine.high %v814_v16, %v818_v17  ;;  %v930_v36 = vld [vmem:[#allocation8 + $0xe28] sm:$0xff]  ;;  %v523_v9 = vld [vmem:[#allocation8 + $0x170] sm:$0xff] }
 0x1d9   :  { %3906 = vmatprep.subr.bf16.mxu1 %v8625_v23  ;;  %v8705_v23 = vcombine.high %v942_v50, %v946_v18 }
 0x1db   :  { %3864 = vmatpush1.bf16.msra.mxu0 %v8496_v33  ;;  %v8576_v33 = vcombine.low %v814_v16, %v818_v17  ;;  %v8290_v17 = vcombine.low %v527_v37, %v531_v38 }
 0x1dc   :  { %3907 = vmatpush1.bf16.msra.mxu1 %v8624_v28  ;;  %3865 = vmatprep.subr.bf16.mxu0 %v8617_v29  ;;  %v8704_v28 = vcombine.low %v942_v50, %v946_v18  ;;  %v8569_v29 = vcombine.high %v806_v24, %v810_v25 }
 0x1dd   :  { %3908 = vmatprep.subr.bf16.mxu1 %v8745_v19  ;;  %v8697_v19 = vcombine.high %v934_v26, %v938_v12 }
 0x1df   :  { %3866 = vmatpush2.bf16.msra.mxu0 %v8616_v40  ;;  %v8568_v40 = vcombine.low %v806_v24, %v810_v25  ;;  %v511_v24 = vld [vmem:[#allocation8 + $0x110] sm:$0xff] }
 0x1e0   :  { %3909 = vmatpush2.bf16.msra.mxu1 %v8744_v52  ;;  %3867 = vmatprep.subr.bf16.mxu0 %v8609_v54  ;;  %v8696_v52 = vcombine.low %v934_v26, %v938_v12  ;;  %v8561_v54 = vcombine.high %v798_v32, %v802_v45  ;;  %v515_v25 = vld [vmem:[#allocation8 + $0x130] sm:$0xff] }
 0x1e1   :  { %3910 = vmatprep.subr.bf16.mxu1 %v8737_v55  ;;  %v8689_v55 = vcombine.high %v926_v34, %v930_v36  ;;  %v639_v12 = vld [vmem:[#allocation8 + $0x510] sm:$0xff] }
 0x1e3   :  { %3868 = vmatpush2.bf16.msra.mxu0 %v8608_v63  ;;  %v8560_v63 = vcombine.low %v798_v32, %v802_v45  ;;  %v8275_v45 = vcombine.high %v511_v24, %v515_v25 }
 0x1e4   :  { %3911 = vmatpush2.bf16.msra.mxu1 %v8736_v1  ;;  %3869 = vmatprep.subr.bf16.mxu0 %v8601_v2  ;;  %v8688_v1 = vcombine.low %v926_v34, %v930_v36  ;;  %v8299_v2 = vcombine.high %v535_v56, %v539_v57  ;;  %v8274_v56 = vcombine.low %v511_v24, %v515_v25  ;;  %v599_v24 = vld [vmem:[#allocation8 + $0x3d0] sm:$0xff] }
 0x1e5   :  { %3912 = vmatprep.subr.bf16.mxu1 %v8729_v3  ;;  %v9654_v3 = vld [vmem:[#allocation10] sm:$0xff]  ;;  %v603_v25 = vld [vmem:[#allocation8 + $0x3f0] sm:$0xff] }
 0x1e7   :  { %3870 = vmatpush2.bf16.msra.mxu0 %v8600_v5  ;;  %v994_v5 = vrot.slane %v9654_v3, %v9568_v48 }
 0x1e8   :  { %3913 = vmatpush2.bf16.msra.mxu1 %v8728_v39  ;;  %3871 = vmatprep.subr.bf16.mxu0 %v8593_v41  ;;  %v655_v39 = vld [vmem:[#allocation8 + $0x590] sm:$0xff] }
 0x1e9   :  { %3914 = vmatprep.subr.bf16.mxu1 %v8721_v46  ;;  %v659_v41 = vld [vmem:[#allocation8 + $0x5b0] sm:$0xff]  ;;  %v8426_v46 = vcombine.low %v663_v58, %v667_v61 }
 0x1ea   :  { %v8418_v18 = vcombine.low %v655_v39, %v659_v41 }
 0x1eb   :  { %3872 = vmatpush2.bf16.msra.mxu0 %v8592_v11  ;;  %v8419_v11 = vcombine.high %v655_v39, %v659_v41  ;;  %v487_v39 = vld [vmem:[#allocation8 + $0x50] sm:$0xff] }
 0x1ec   :  { %3915 = vmatpush2.bf16.msra.mxu1 %v8720_v13  ;;  %3873 = vmatprep.subr.bf16.mxu0 %v8585_v14  ;;  %v647_v13 = vld [vmem:[#allocation8 + $0x550] sm:$0xff] }
 0x1ed   :  { %3916 = vmatprep.subr.bf16.mxu1 %v8713_v15  ;;  %v651_v14 = vld [vmem:[#allocation8 + $0x570] sm:$0xff] }
 0x1ee   :  { %v8410_v32 = vcombine.low %v647_v13, %v651_v14  ;;  %v491_v41 = vld [vmem:[#allocation8 + $0x70] sm:$0xff] }
 0x1ef   :  { %3874 = vmatpush2.bf16.msra.mxu0 %v8584_v20  ;;  %v8283_v20 = vcombine.high %v519_v8, %v523_v9 }
 0x1f0   :  { %3917 = vmatpush2.bf16.msra.mxu1 %v8712_v21  ;;  %3875 = vmatprep.subr.bf16.mxu0 %v8577_v22 }
 0x1f1   :  { %3918 = vmatprep.subr.bf16.mxu1 %v8705_v23  ;;  %v8411_v23 = vcombine.high %v647_v13, %v651_v14  ;;  %v479_v13 = vld [vmem:[#allocation8 + $0x10] sm:$0xff] }
 0x1f2   :  { %v483_v14 = vld [vmem:[#allocation8 + $0x30] sm:$0xff] }
 0x1f3   :  { %3876 = vmatpush2.bf16.msra.mxu0 %v8576_v33  ;;  %v643_v33 = vld [vmem:[#allocation8 + $0x530] sm:$0xff] }
 0x1f4   :  { %3919 = vmatpush2.bf16.msra.mxu1 %v8704_v28  ;;  %3877 = vmatprep.subr.bf16.mxu0 %v8569_v29  ;;  %v8282_v29 = vcombine.low %v519_v8, %v523_v9  ;;  %v8403_v36 = vcombine.high %v639_v12, %v643_v33  ;;  %v8402_v57 = vcombine.low %v639_v12, %v643_v33  ;;  %v731_v12 = vld [vmem:[#allocation8 + $0x7f0] sm:$0xff] }
 0x1f5   :  { %3920 = vmatprep.subr.bf16.mxu1 %v8697_v19  ;;  %v8242_v33 = vcombine.low %v479_v13, %v483_v14 }
 0x1f7   :  { %3878 = vmatpush2.bf16.msra.mxu0 %v8568_v40  ;;  %v503_v40 = vld [vmem:[#allocation8 + $0xd0] sm:$0xff] }
 0x1f8   :  { %3921 = vmatpush2.bf16.msra.mxu1 %v8696_v52  ;;  %3879 = vmatprep.subr.bf16.mxu0 %v8561_v54  ;;  %v507_v52 = vld [vmem:[#allocation8 + $0xf0] sm:$0xff] }
 0x1f9   :  { %3922 = vmatprep.subr.bf16.mxu1 %v8689_v55  ;;  %v631_v54 = vld [vmem:[#allocation8 + $0x4d0] sm:$0xff]  ;;  %v8267_v58 = vcombine.high %v503_v40, %v507_v52  ;;  %v8266_v37 = vcombine.low %v503_v40, %v507_v52  ;;  %v8362_v52 = vcombine.low %v599_v24, %v603_v25 }
 0x1fa   :  { %v635_v55 = vld [vmem:[#allocation8 + $0x4f0] sm:$0xff] }
 0x1fb   :  { %3880 = vmatpush2.bf16.msra.mxu0 %v8560_v63  ;;  %v8395_v61 = vcombine.high %v631_v54, %v635_v55  ;;  %v495_v63 = vld [vmem:[#allocation8 + $0x90] sm:$0xff]  ;;  %v8394_v38 = vcombine.low %v631_v54, %v635_v55 }
 0x1fc   :  { %3923 = vmatpush2.bf16.msra.mxu1 %v8688_v1  ;;  %3935 = vmatprep.subr.bf16.mxu0 %v8299_v2  ;;  %v499_v1 = vld [vmem:[#allocation8 + $0xb0] sm:$0xff] }
 0x1fd   :  { %3978 = vmatprep.subr.bf16.mxu1 %v8427_v4  ;;  %v623_v2 = vld [vmem:[#allocation8 + $0x490] sm:$0xff]  ;;  %v8258_v8 = vcombine.low %v495_v63, %v499_v1 }
 0x1fe   :  { %3882 = vmatmul.mubr.bf16.vlgmr.msra.gmra.mxu0 %v9642_v44  ;;  %v3625_v10 = vpop.f32.mrf.mxu0  ;;  %v3668_v16 = vpop.f32.mrf.mxu1  ;;  %v627_v4 = vld [vmem:[#allocation8 + $0x4b0] sm:$0xff] }
 0x1ff   :  { %3925 = vmatmul.mubr.bf16.vlgmr.msra.gmra.mxu1 %v9644_v53  ;;  %v3626_v15 = vadd.f32 %v3625_v10, %v994_v5  ;;  %3936 = vmatpush1.bf16.msra.mxu0 %v8298_v42  ;;  %v8259_v42 = vcombine.high %v495_v63, %v499_v1  ;;  %v8386_v9 = vcombine.low %v623_v2, %v627_v4  ;;  %v723_v40 = vld [vmem:[#allocation8 + $0x7b0] sm:$0xff] }
 0x200   :  { %3967 = vmatprep.mubr.bf16.mxu0 %v9600_v27  ;;  %3979 = vmatpush1.bf16.msra.mxu1 %v8426_v46  ;;  %v9661_v50 = vpop.f32.mrf.mxu0  ;;  %v9666_v22 = vpop.f32.mrf.mxu1  ;;  %v615_v46 = vld [vmem:[#allocation8 + $0x450] sm:$0xff]  ;;  %v8251_v10 = vcombine.high %v487_v39, %v491_v41 }
 0x201   :  { %v9663_v21 = vadd.f32 %v3668_v16, %v3626_v15  ;;  %4010 = vmatprep.mubr.bf16.mxu1 %v9604_v31  ;;  %3937 = vmatprep.subr.bf16.mxu0 %v8291_v7  ;;  %v619_v7 = vld [vmem:[#allocation8 + $0x470] sm:$0xff] }
 0x202   :  { %3980 = vmatprep.subr.bf16.mxu1 %v8419_v11  ;;  %v3629_v26 = vpop.f32.mrf.mxu0  ;;  %v3672_v19 = vpop.f32.mrf.mxu1  ;;  %v8379_v11 = vcombine.high %v615_v46, %v619_v7  ;;  %v607_v15 = vld [vmem:[#allocation8 + $0x410] sm:$0xff] }
 0x203   :  { %v3630_v28 = vadd.f32 %v3629_v26, %v994_v5  ;;  %3938 = vmatpush1.bf16.msra.mxu0 %v8290_v17  ;;  %v8387_v5 = vcombine.high %v623_v2, %v627_v4  ;;  %v611_v16 = vld [vmem:[#allocation8 + $0x430] sm:$0xff]  ;;  %v8250_v17 = vcombine.low %v487_v39, %v491_v41 }
 0x204   :  { %3981 = vmatpush1.bf16.msra.mxu1 %v8418_v18  ;;  %3939 = vmatprep.subr.bf16.mxu0 %v8283_v20  ;;  %v8378_v18 = vcombine.low %v615_v46, %v619_v7  ;;  %v8243_v20 = vcombine.high %v479_v13, %v483_v14  ;;  %v727_v26 = vld [vmem:[#allocation8 + $0x7d0] sm:$0xff] }
 0x205   :  { %v9668_v34 = vadd.f32 %v3672_v19, %v3630_v28  ;;  %3982 = vmatprep.subr.bf16.mxu1 %v8411_v23  ;;  %v8371_v23 = vcombine.high %v607_v15, %v611_v16  ;;  %v8370_v28 = vcombine.low %v607_v15, %v611_v16  ;;  %v8491_v19 = vcombine.high %v727_v26, %v731_v12  ;;  %v715_v63 = vld [vmem:[#allocation8 + $0x770] sm:$0xff] }
 0x206   :  { %v8490_v54 = vcombine.low %v727_v26, %v731_v12  ;;  %v707_v39 = vld [vmem:[#allocation8 + $0x730] sm:$0xff] }
 0x207   :  { %3940 = vmatpush1.bf16.msra.mxu0 %v8282_v29  ;;  %v8363_v29 = vcombine.high %v599_v24, %v603_v25  ;;  %v699_v13 = vld [vmem:[#allocation8 + $0x6f0] sm:$0xff] }
 0x208   :  { %3983 = vmatpush1.bf16.msra.mxu1 %v8410_v32  ;;  %3941 = vmatprep.subr.bf16.mxu0 %v8275_v45  ;;  %v591_v32 = vld [vmem:[#allocation8 + $0x390] sm:$0xff] }
 0x209   :  { %3984 = vmatprep.subr.bf16.mxu1 %v8403_v36  ;;  %v595_v45 = vld [vmem:[#allocation8 + $0x3b0] sm:$0xff] }
 0x20a   :  { %v719_v36 = vld [vmem:[#allocation8 + $0x790] sm:$0xff]  ;;  %v8355_v55 = vcombine.high %v591_v32, %v595_v45  ;;  %v8354_v1 = vcombine.low %v591_v32, %v595_v45 }
 0x20b   :  { %3942 = vmatpush1.bf16.msra.mxu0 %v8274_v56  ;;  %v8483_v56 = vcombine.high %v719_v36, %v723_v40  ;;  %v8482_v2 = vcombine.low %v719_v36, %v723_v40  ;;  %v691_v24 = vld [vmem:[#allocation8 + $0x6b0] sm:$0xff] }
 0x20c   :  { %3985 = vmatpush1.bf16.msra.mxu1 %v8402_v57  ;;  %3943 = vmatprep.subr.bf16.mxu0 %v8267_v58  ;;  %v583_v57 = vld [vmem:[#allocation8 + $0x350] sm:$0xff] }
 0x20d   :  { %3986 = vmatprep.subr.bf16.mxu1 %v8395_v61  ;;  %v587_v58 = vld [vmem:[#allocation8 + $0x370] sm:$0xff] }
 0x20e   :  { %v711_v61 = vld [vmem:[#allocation8 + $0x750] sm:$0xff]  ;;  %v8347_v4 = vcombine.high %v583_v57, %v587_v58  ;;  %v8346_v41 = vcombine.low %v583_v57, %v587_v58 }
 0x20f   :  { %3944 = vmatpush1.bf16.msra.mxu0 %v8266_v37  ;;  %v8475_v37 = vcombine.high %v711_v61, %v715_v63  ;;  %v8474_v46 = vcombine.low %v711_v61, %v715_v63  ;;  %v683_v32 = vld [vmem:[#allocation8 + $0x670] sm:$0xff] }
 0x210   :  { %3987 = vmatpush1.bf16.msra.mxu1 %v8394_v38  ;;  %3945 = vmatprep.subr.bf16.mxu0 %v8259_v42  ;;  %v575_v38 = vld [vmem:[#allocation8 + $0x310] sm:$0xff] }
 0x211   :  { %3988 = vmatprep.subr.bf16.mxu1 %v8387_v5  ;;  %v579_v42 = vld [vmem:[#allocation8 + $0x330] sm:$0xff] }
 0x212   :  { %v703_v5 = vld [vmem:[#allocation8 + $0x710] sm:$0xff]  ;;  %v8339_v7 = vcombine.high %v575_v38, %v579_v42  ;;  %v8338_v14 = vcombine.low %v575_v38, %v579_v42 }
 0x213   :  { %3946 = vmatpush1.bf16.msra.mxu0 %v8258_v8  ;;  %v8467_v8 = vcombine.high %v703_v5, %v707_v39  ;;  %v8466_v15 = vcombine.low %v703_v5, %v707_v39  ;;  %v675_v57 = vld [vmem:[#allocation8 + $0x630] sm:$0xff] }
 0x214   :  { %3989 = vmatpush1.bf16.msra.mxu1 %v8386_v9  ;;  %3947 = vmatprep.subr.bf16.mxu0 %v8251_v10  ;;  %v567_v9 = vld [vmem:[#allocation8 + $0x2d0] sm:$0xff] }
 0x215   :  { %3990 = vmatprep.subr.bf16.mxu1 %v8379_v11  ;;  %v571_v10 = vld [vmem:[#allocation8 + $0x2f0] sm:$0xff] }
 0x216   :  { %v695_v11 = vld [vmem:[#allocation8 + $0x6d0] sm:$0xff]  ;;  %v8331_v16 = vcombine.high %v567_v9, %v571_v10  ;;  %v8330_v25 = vcombine.low %v567_v9, %v571_v10 }
 0x217   :  { %3948 = vmatpush1.bf16.msra.mxu0 %v8250_v17  ;;  %v8459_v17 = vcombine.high %v695_v11, %v699_v13  ;;  %v8458_v26 = vcombine.low %v695_v11, %v699_v13  ;;  %v923_v38 = vld [vmem:[#allocation8 + $0xdf0] sm:$0xff]  ;;  %v9670_v11 = vpop.f32.mrf.mxu0 }
 0x218   :  { %3991 = vmatpush1.bf16.msra.mxu1 %v8378_v18  ;;  %3949 = vmatprep.subr.bf16.mxu0 %v8243_v20  ;;  %v559_v18 = vld [vmem:[#allocation8 + $0x290] sm:$0xff] }
 0x219   :  { %3992 = vmatprep.subr.bf16.mxu1 %v8371_v23  ;;  %v563_v20 = vld [vmem:[#allocation8 + $0x2b0] sm:$0xff] }
 0x21a   :  { %v687_v23 = vld [vmem:[#allocation8 + $0x690] sm:$0xff]  ;;  %v8323_v12 = vcombine.high %v559_v18, %v563_v20  ;;  %v8322_v45 = vcombine.low %v559_v18, %v563_v20 }
 0x21b   :  { %3950 = vmatpush1.bf16.msra.mxu0 %v8242_v33  ;;  %v8451_v33 = vcombine.high %v687_v23, %v691_v24  ;;  %v8450_v36 = vcombine.low %v687_v23, %v691_v24  ;;  %v911_v9 = vld [vmem:[#allocation8 + $0xd90] sm:$0xff] }
 0x21c   :  { %3993 = vmatpush1.bf16.msra.mxu1 %v8370_v28  ;;  %3951 = vmatprep.subr.bf16.mxu0 %v8363_v29  ;;  %v551_v28 = vld [vmem:[#allocation8 + $0x250] sm:$0xff] }
 0x21d   :  { %3994 = vmatprep.subr.bf16.mxu1 %v8491_v19  ;;  %v555_v29 = vld [vmem:[#allocation8 + $0x270] sm:$0xff] }
 0x21e   :  { %v679_v19 = vld [vmem:[#allocation8 + $0x650] sm:$0xff]  ;;  %v8315_v40 = vcombine.high %v551_v28, %v555_v29  ;;  %v8314_v58 = vcombine.low %v551_v28, %v555_v29 }
 0x21f   :  { %3952 = vmatpush2.bf16.msra.mxu0 %v8362_v52  ;;  %v8443_v52 = vcombine.high %v679_v19, %v683_v32  ;;  %v8442_v61 = vcombine.low %v679_v19, %v683_v32  ;;  %v915_v10 = vld [vmem:[#allocation8 + $0xdb0] sm:$0xff] }
 0x220   :  { %3995 = vmatpush2.bf16.msra.mxu1 %v8490_v54  ;;  %3953 = vmatprep.subr.bf16.mxu0 %v8355_v55  ;;  %v543_v54 = vld [vmem:[#allocation8 + $0x210] sm:$0xff]  ;;  %v8675_v20 = vcombine.high %v911_v9, %v915_v10  ;;  %v8674_v28 = vcombine.low %v911_v9, %v915_v10 }
 0x221   :  { %3996 = vmatprep.subr.bf16.mxu1 %v8483_v56  ;;  %v547_v55 = vld [vmem:[#allocation8 + $0x230] sm:$0xff] }
 0x222   :  { %v671_v56 = vld [vmem:[#allocation8 + $0x610] sm:$0xff]  ;;  %v8307_v63 = vcombine.high %v543_v54, %v547_v55  ;;  %v8306_v42 = vcombine.low %v543_v54, %v547_v55 }
 0x223   :  { %3954 = vmatpush2.bf16.msra.mxu0 %v8354_v1  ;;  %v8435_v1 = vcombine.high %v671_v56, %v675_v57  ;;  %v8434_v5 = vcombine.low %v671_v56, %v675_v57  ;;  %v903_v23 = vld [vmem:[#allocation8 + $0xd50] sm:$0xff] }
 0x224   :  { %3997 = vmatpush2.bf16.msra.mxu1 %v8482_v2  ;;  %3955 = vmatprep.subr.bf16.mxu0 %v8347_v4  ;;  %v791_v2 = vld [vmem:[#allocation8 + $0x9d0] sm:$0xff] }
 0x225   :  { %3998 = vmatprep.subr.bf16.mxu1 %v8475_v37  ;;  %v795_v4 = vld [vmem:[#allocation8 + $0x9f0] sm:$0xff] }
 0x226   :  { %v919_v37 = vld [vmem:[#allocation8 + $0xdd0] sm:$0xff]  ;;  %v8555_v39 = vcombine.high %v791_v2, %v795_v4 }
 0x227   :  { %3956 = vmatpush2.bf16.msra.mxu0 %v8346_v41  ;;  %v8683_v41 = vcombine.high %v919_v37, %v923_v38  ;;  %v8682_v13 = vcombine.low %v919_v37, %v923_v38  ;;  %v907_v24 = vld [vmem:[#allocation8 + $0xd70] sm:$0xff] }
 0x228   :  { %3999 = vmatpush2.bf16.msra.mxu1 %v8474_v46  ;;  %3957 = vmatprep.subr.bf16.mxu0 %v8339_v7  ;;  %v783_v46 = vld [vmem:[#allocation8 + $0x990] sm:$0xff] }
 0x229   :  { %4000 = vmatprep.subr.bf16.mxu1 %v8467_v8  ;;  %v787_v7 = vld [vmem:[#allocation8 + $0x9b0] sm:$0xff]  ;;  %v8554_v8 = vcombine.low %v791_v2, %v795_v4 }
 0x22a   :  { %v899_v54 = vld [vmem:[#allocation8 + $0xd30] sm:$0xff] }
 0x22b   :  { %3958 = vmatpush2.bf16.msra.mxu0 %v8338_v14  ;;  %v9672_v14 = vpop.f32.mrf.mxu1  ;;  %v759_v2 = vld [vmem:[#allocation8 + $0x8d0] sm:$0xff] }
 0x22c   :  { %4001 = vmatpush2.bf16.msra.mxu1 %v8466_v15  ;;  %3959 = vmatprep.subr.bf16.mxu0 %v8331_v16  ;;  %v8547_v15 = vcombine.high %v783_v46, %v787_v7  ;;  %v775_v16 = vld [vmem:[#allocation8 + $0x950] sm:$0xff] }
 0x22d   :  { %4002 = vmatprep.subr.bf16.mxu1 %v8459_v17  ;;  %v779_v17 = vld [vmem:[#allocation8 + $0x970] sm:$0xff] }
 0x22e   :  { %v8539_v29 = vcombine.high %v775_v16, %v779_v17  ;;  %v8538_v56 = vcombine.low %v775_v16, %v779_v17  ;;  %v763_v4 = vld [vmem:[#allocation8 + $0x8f0] sm:$0xff] }
 0x22f   :  { %3960 = vmatpush2.bf16.msra.mxu0 %v8330_v25  ;;  %v887_v37 = vld [vmem:[#allocation8 + $0xcd0] sm:$0xff] }
 0x230   :  { %4003 = vmatpush2.bf16.msra.mxu1 %v8458_v26  ;;  %3961 = vmatprep.subr.bf16.mxu0 %v8323_v12  ;;  %v8546_v12 = vcombine.low %v783_v46, %v787_v7  ;;  %v891_v38 = vld [vmem:[#allocation8 + $0xcf0] sm:$0xff] }
 0x231   :  { %4004 = vmatprep.subr.bf16.mxu1 %v8451_v33  ;;  %v8651_v7 = vcombine.high %v887_v37, %v891_v38  ;;  %v755_v9 = vld [vmem:[#allocation8 + $0x8b0] sm:$0xff]  ;;  %v8650_v16 = vcombine.low %v887_v37, %v891_v38 }
 0x232   :  { %v879_v10 = vld [vmem:[#allocation8 + $0xc90] sm:$0xff] }
 0x233   :  { %3962 = vmatpush2.bf16.msra.mxu0 %v8322_v45  ;;  %v8667_v45 = vcombine.high %v903_v23, %v907_v24  ;;  %v847_v37 = vld [vmem:[#allocation8 + $0xb90] sm:$0xff] }
 0x234   :  { %4005 = vmatpush2.bf16.msra.mxu1 %v8450_v36  ;;  %3963 = vmatprep.subr.bf16.mxu0 %v8315_v40  ;;  %v771_v36 = vld [vmem:[#allocation8 + $0x930] sm:$0xff] }
 0x235   :  { %4006 = vmatprep.subr.bf16.mxu1 %v8443_v52  ;;  %v895_v52 = vld [vmem:[#allocation8 + $0xd10] sm:$0xff] }
 0x236   :  { %v851_v38 = vld [vmem:[#allocation8 + $0xbb0] sm:$0xff] }
 0x237   :  { %3964 = vmatpush2.bf16.msra.mxu0 %v8314_v58  ;;  %v8666_v58 = vcombine.low %v903_v23, %v907_v24  ;;  %v747_v23 = vld [vmem:[#allocation8 + $0x870] sm:$0xff] }
 0x238   :  { %4007 = vmatpush2.bf16.msra.mxu1 %v8442_v61  ;;  %3965 = vmatprep.subr.bf16.mxu0 %v8307_v63  ;;  %v871_v24 = vld [vmem:[#allocation8 + $0xc50] sm:$0xff] }
 0x239   :  { %4008 = vmatprep.subr.bf16.mxu1 %v8435_v1  ;;  %v8659_v1 = vcombine.high %v895_v52, %v899_v54 }
 0x23b   :  { %3966 = vmatpush2.bf16.msra.mxu0 %v8306_v42 }
 0x23c   :  { %4009 = vmatpush2.bf16.msra.mxu1 %v8434_v5  ;;  %4021 = vmatprep.subr.bf16.mxu0 %v8555_v39 }
 0x23d   :  { %4064 = vmatprep.subr.bf16.mxu1 %v8683_v41  ;;  %v8523_v41 = vcombine.high %v759_v2, %v763_v4 }
 0x23e   :  { %v3711_v18 = vpop.f32.mrf.mxu0  ;;  %3968 = vmatmul.mubr.bf16.vlgmr.msra.gmra.mxu0 %v9602_v30  ;;  %v3754_v26 = vpop.f32.mrf.mxu1 }
 0x23f   :  { %v3712_v25 = vadd.f32 %v3711_v18, %v9663_v21  ;;  %4011 = vmatmul.mubr.bf16.vlgmr.msra.gmra.mxu1 %v9608_v35  ;;  %4022 = vmatpush1.bf16.msra.mxu0 %v8554_v8  ;;  %v767_v21 = vld [vmem:[#allocation8 + $0x910] sm:$0xff] }
 0x240   :  { %4053 = vmatprep.mubr.bf16.mxu0 %v9622_v6  ;;  %4065 = vmatpush1.bf16.msra.mxu1 %v8682_v13  ;;  %v9678_v33 = vpop.f32.mrf.mxu0  ;;  %v9681_v32 = vpop.f32.mrf.mxu1  ;;  %v8531_v61 = vcombine.high %v767_v21, %v771_v36  ;;  %v8530_v39 = vcombine.low %v767_v21, %v771_v36  ;;  %v751_v8 = vld [vmem:[#allocation8 + $0x890] sm:$0xff] }
 0x241   :  { %v3755_v19 = vadd.f32 %v3754_v26, %v3712_v25  ;;  %4096 = vmatprep.mubr.bf16.mxu1 %v9624_v43  ;;  %4023 = vmatprep.subr.bf16.mxu0 %v8547_v15  ;;  %v883_v13 = vld [vmem:[#allocation8 + $0xcb0] sm:$0xff]  ;;  %v8522_v15 = vcombine.low %v759_v2, %v763_v4  ;;  %v8515_v17 = vcombine.high %v751_v8, %v755_v9 }
 0x242   :  { %v3715_v40 = vpop.f32.mrf.mxu0  ;;  %4066 = vmatprep.subr.bf16.mxu1 %v8675_v20  ;;  %v3758_v57 = vpop.f32.mrf.mxu1  ;;  %v8643_v18 = vcombine.high %v879_v10, %v883_v13  ;;  %v743_v20 = vld [vmem:[#allocation8 + $0x850] sm:$0xff]  ;;  %v8514_v26 = vcombine.low %v751_v8, %v755_v9 }
 0x243   :  { %v3716_v55 = vadd.f32 %v3715_v40, %v9668_v34  ;;  %4024 = vmatpush1.bf16.msra.mxu0 %v8546_v12  ;;  %v4279_v42 = vmax.f32 %v3755_v19, 0.0  ;;  %v8658_v34 = vcombine.low %v895_v52, %v899_v54  ;;  %v875_v25 = vld [vmem:[#allocation8 + $0xc70] sm:$0xff]  ;;  %v8642_v12 = vcombine.low %v879_v10, %v883_v13 }
 0x244   :  { %4067 = vmatpush1.bf16.msra.mxu1 %v8674_v28  ;;  %4025 = vmatprep.subr.bf16.mxu0 %v8539_v29  ;;  %v8507_v28 = vcombine.high %v743_v20, %v747_v23  ;;  %v8635_v29 = vcombine.high %v871_v24, %v875_v25  ;;  %v735_v19 = vld [vmem:[#allocation8 + $0x810] sm:$0xff]  ;;  %v8506_v40 = vcombine.low %v743_v20, %v747_v23 }
 0x245   :  { %v3759_v63 = vadd.f32 %v3758_v57, %v3716_v55  ;;  %4068 = vmatprep.subr.bf16.mxu1 %v8667_v45  ;;  %v739_v45 = vld [vmem:[#allocation8 + $0x830] sm:$0xff]  ;;  %v8634_v52 = vcombine.low %v871_v24, %v875_v25 }
 0x246   :  { %v863_v21 = vld [vmem:[#allocation8 + $0xc10] sm:$0xff]  ;;  %v8499_v54 = vcombine.high %v735_v19, %v739_v45 }
 0x247   :  { %v4287_v5 = vmax.f32 %v3759_v63, 0.0  ;;  %4026 = vmatpush1.bf16.msra.mxu0 %v8538_v56  ;;  %v867_v36 = vld [vmem:[#allocation8 + $0xc30] sm:$0xff]  ;;  %v8498_v63 = vcombine.low %v735_v19, %v739_v45 }
 0x248   :  { %4069 = vmatpush1.bf16.msra.mxu1 %v8666_v58  ;;  %4027 = vmatprep.subr.bf16.mxu0 %v8531_v61  ;;  %v8627_v55 = vcombine.high %v863_v21, %v867_v36  ;;  %v855_v56 = vld [vmem:[#allocation8 + $0xbd0] sm:$0xff] }
 0x249   :  { %v9684_v46 = vpack.c.bf16 %v4287_v5, %v4279_v42  ;;  %4070 = vmatprep.subr.bf16.mxu1 %v8659_v1  ;;  %v859_v57 = vld [vmem:[#allocation8 + $0xbf0] sm:$0xff]  ;;  %v8626_v1 = vcombine.low %v863_v21, %v867_v36 }
 0x24a   :  { %v983_v58 = vld [vmem:[#allocation8 + $0xfd0] sm:$0xff]  ;;  %v8619_v2 = vcombine.high %v855_v56, %v859_v57 }
 0x24b   :  { %4028 = vmatpush1.bf16.msra.mxu0 %v8530_v39  ;;  %v987_v61 = vld [vmem:[#allocation8 + $0xff0] sm:$0xff]  ;;  %v8618_v39 = vcombine.low %v855_v56, %v859_v57 }
 0x24c   :  { %4071 = vmatpush1.bf16.msra.mxu1 %v8658_v34  ;;  %4029 = vmatprep.subr.bf16.mxu0 %v8523_v41  ;;  %v8747_v4 = vcombine.high %v983_v58, %v987_v61  ;;  %v975_v42 = vld [vmem:[#allocation8 + $0xf90] sm:$0xff]  ;;  %v8746_v34 = vcombine.low %v983_v58, %v987_v61  ;;  %v8611_v41 = vcombine.high %v847_v37, %v851_v38 }
 0x24d   :  { %4072 = vmatprep.subr.bf16.mxu1 %v8651_v7  ;;  %v979_v5 = vld [vmem:[#allocation8 + $0xfb0] sm:$0xff] }
 0x24e   :  { %v8739_v7 = vcombine.high %v975_v42, %v979_v5  ;;  %v839_v8 = vld [vmem:[#allocation8 + $0xb50] sm:$0xff] }
 0x24f   :  { %4030 = vmatpush1.bf16.msra.mxu0 %v8522_v15  ;;  %v843_v9 = vld [vmem:[#allocation8 + $0xb70] sm:$0xff]  ;;  %v8610_v15 = vcombine.low %v847_v37, %v851_v38 }
 0x250   :  { %4073 = vmatpush1.bf16.msra.mxu1 %v8650_v16  ;;  %4031 = vmatprep.subr.bf16.mxu0 %v8515_v17  ;;  %v967_v10 = vld [vmem:[#allocation8 + $0xf50] sm:$0xff]  ;;  %v8738_v16 = vcombine.low %v975_v42, %v979_v5  ;;  %v8603_v17 = vcombine.high %v839_v8, %v843_v9 }
 0x251   :  { %4074 = vmatprep.subr.bf16.mxu1 %v8643_v18  ;;  %v971_v13 = vld [vmem:[#allocation8 + $0xf70] sm:$0xff] }
 0x252   :  { %v8731_v18 = vcombine.high %v967_v10, %v971_v13  ;;  %v831_v20 = vld [vmem:[#allocation8 + $0xb10] sm:$0xff] }
 0x253   :  { %4032 = vmatpush1.bf16.msra.mxu0 %v8514_v26  ;;  %v835_v23 = vld [vmem:[#allocation8 + $0xb30] sm:$0xff]  ;;  %v8602_v26 = vcombine.low %v839_v8, %v843_v9 }
 0x254   :  { %4075 = vmatpush1.bf16.msra.mxu1 %v8642_v12  ;;  %4033 = vmatprep.subr.bf16.mxu0 %v8507_v28  ;;  %v959_v24 = vld [vmem:[#allocation8 + $0xf10] sm:$0xff]  ;;  %v8730_v12 = vcombine.low %v967_v10, %v971_v13  ;;  %v8595_v28 = vcombine.high %v831_v20, %v835_v23 }
 0x255   :  { %4076 = vmatprep.subr.bf16.mxu1 %v8635_v29  ;;  %v963_v25 = vld [vmem:[#allocation8 + $0xf30] sm:$0xff] }
 0x256   :  { %v8723_v29 = vcombine.high %v959_v24, %v963_v25  ;;  %v823_v19 = vld [vmem:[#allocation8 + $0xad0] sm:$0xff] }
 0x257   :  { %4034 = vmatpush1.bf16.msra.mxu0 %v8506_v40  ;;  %v827_v45 = vld [vmem:[#allocation8 + $0xaf0] sm:$0xff]  ;;  %v8594_v40 = vcombine.low %v831_v20, %v835_v23  ;;  %v536_v20 = vld [vmem:[#allocation8 + $0x1d8] sm:$0xff] }
 0x258   :  { %4077 = vmatpush1.bf16.msra.mxu1 %v8634_v52  ;;  %4035 = vmatprep.subr.bf16.mxu0 %v8499_v54  ;;  %v951_v21 = vld [vmem:[#allocation8 + $0xed0] sm:$0xff]  ;;  %v8722_v52 = vcombine.low %v959_v24, %v963_v25  ;;  %v8587_v54 = vcombine.high %v823_v19, %v827_v45  ;;  %v540_v23 = vld [vmem:[#allocation8 + $0x1f8] sm:$0xff] }
 0x259   :  { %4078 = vmatprep.subr.bf16.mxu1 %v8627_v55  ;;  %v955_v36 = vld [vmem:[#allocation8 + $0xef0] sm:$0xff]  ;;  %v664_v24 = vld [vmem:[#allocation8 + $0x5d8] sm:$0xff] }
 0x25a   :  { %v8715_v55 = vcombine.high %v951_v21, %v955_v36  ;;  %v815_v56 = vld [vmem:[#allocation8 + $0xa90] sm:$0xff]  ;;  %v668_v25 = vld [vmem:[#allocation8 + $0x5f8] sm:$0xff] }
 0x25b   :  { %4036 = vmatpush1.bf16.msra.mxu0 %v8498_v63  ;;  %v819_v57 = vld [vmem:[#allocation8 + $0xab0] sm:$0xff]  ;;  %v8586_v63 = vcombine.low %v823_v19, %v827_v45  ;;  %v528_v19 = vld [vmem:[#allocation8 + $0x198] sm:$0xff] }
 0x25c   :  { %4079 = vmatpush1.bf16.msra.mxu1 %v8626_v1  ;;  %4037 = vmatprep.subr.bf16.mxu0 %v8619_v2  ;;  %v943_v58 = vld [vmem:[#allocation8 + $0xe90] sm:$0xff]  ;;  %v8714_v1 = vcombine.low %v951_v21, %v955_v36  ;;  %v8579_v2 = vcombine.high %v815_v56, %v819_v57  ;;  %v532_v45 = vld [vmem:[#allocation8 + $0x1b8] sm:$0xff]  ;;  %v1002_v21 = vrot.slane %v9654_v3, %v9576_v51 }
 0x25d   :  { %4080 = vmatprep.subr.bf16.mxu1 %v8747_v4  ;;  %v947_v61 = vld [vmem:[#allocation8 + $0xeb0] sm:$0xff]  ;;  %v8300_v36 = vcombine.low %v536_v20, %v540_v23  ;;  %v652_v3 = vld [vmem:[#allocation8 + $0x578] sm:$0xff] }
 0x25e   :  { %v8707_v4 = vcombine.high %v943_v58, %v947_v61  ;;  %v807_v37 = vld [vmem:[#allocation8 + $0xa50] sm:$0xff] }
 0x25f   :  { %4038 = vmatpush2.bf16.msra.mxu0 %v8618_v39  ;;  %v811_v38 = vld [vmem:[#allocation8 + $0xa70] sm:$0xff]  ;;  %v8578_v39 = vcombine.low %v815_v56, %v819_v57  ;;  %v9690_v56 = vpop.f32.mrf.mxu1  ;;  %v8293_v57 = vcombine.high %v528_v19, %v532_v45 }
 0x260   :  { %4081 = vmatpush2.bf16.msra.mxu1 %v8746_v34  ;;  %4039 = vmatprep.subr.bf16.mxu0 %v8611_v41  ;;  %v935_v42 = vld [vmem:[#allocation8 + $0xe50] sm:$0xff]  ;;  %v8706_v34 = vcombine.low %v943_v58, %v947_v61  ;;  %v8571_v41 = vcombine.high %v807_v37, %v811_v38  ;;  %v520_v58 = vld [vmem:[#allocation8 + $0x158] sm:$0xff] }
 0x261   :  { %4082 = vmatprep.subr.bf16.mxu1 %v8739_v7  ;;  %v939_v5 = vld [vmem:[#allocation8 + $0xe70] sm:$0xff]  ;;  %v524_v61 = vld [vmem:[#allocation8 + $0x178] sm:$0xff] }
 0x262   :  { %v8699_v7 = vcombine.high %v935_v42, %v939_v5  ;;  %v799_v8 = vld [vmem:[#allocation8 + $0xa10] sm:$0xff] }
 0x263   :  { %4040 = vmatpush2.bf16.msra.mxu0 %v8610_v15  ;;  %v803_v9 = vld [vmem:[#allocation8 + $0xa30] sm:$0xff]  ;;  %v8570_v15 = vcombine.low %v807_v37, %v811_v38  ;;  %v8292_v38 = vcombine.low %v528_v19, %v532_v45 }
 0x264   :  { %4083 = vmatpush2.bf16.msra.mxu1 %v8738_v16  ;;  %4041 = vmatprep.subr.bf16.mxu0 %v8603_v17  ;;  %v927_v10 = vld [vmem:[#allocation8 + $0xe10] sm:$0xff]  ;;  %v8698_v16 = vcombine.low %v935_v42, %v939_v5  ;;  %v8563_v17 = vcombine.high %v799_v8, %v803_v9 }
 0x265   :  { %4084 = vmatprep.subr.bf16.mxu1 %v8731_v18  ;;  %v931_v13 = vld [vmem:[#allocation8 + $0xe30] sm:$0xff] }
 0x266   :  { %v8691_v18 = vcombine.high %v927_v10, %v931_v13 }
 0x267   :  { %4042 = vmatpush2.bf16.msra.mxu0 %v8602_v26  ;;  %v8562_v26 = vcombine.low %v799_v8, %v803_v9  ;;  %v512_v8 = vld [vmem:[#allocation8 + $0x118] sm:$0xff] }
 0x268   :  { %4085 = vmatpush2.bf16.msra.mxu1 %v8730_v12  ;;  %4043 = vmatprep.subr.bf16.mxu0 %v8595_v28  ;;  %v8690_v12 = vcombine.low %v927_v10, %v931_v13  ;;  %v8301_v28 = vcombine.high %v536_v20, %v540_v23  ;;  %v516_v9 = vld [vmem:[#allocation8 + $0x138] sm:$0xff] }
 0x269   :  { %4086 = vmatprep.subr.bf16.mxu1 %v8723_v29  ;;  %v8429_v29 = vcombine.high %v664_v24, %v668_v25  ;;  %v640_v13 = vld [vmem:[#allocation8 + $0x518] sm:$0xff]  ;;  %v8277_v20 = vcombine.high %v512_v8, %v516_v9 }
 0x26b   :  { %4044 = vmatpush2.bf16.msra.mxu0 %v8594_v40  ;;  %v656_v40 = vld [vmem:[#allocation8 + $0x598] sm:$0xff] }
 0x26c   :  { %4087 = vmatpush2.bf16.msra.mxu1 %v8722_v52  ;;  %4045 = vmatprep.subr.bf16.mxu0 %v8587_v54  ;;  %v660_v52 = vld [vmem:[#allocation8 + $0x5b8] sm:$0xff]  ;;  %v9688_v54 = vpop.f32.mrf.mxu0 }
 0x26d   :  { %4088 = vmatprep.subr.bf16.mxu1 %v8715_v55  ;;  %v8428_v55 = vcombine.low %v664_v24, %v668_v25  ;;  %v8420_v5 = vcombine.low %v656_v40, %v660_v52  ;;  %v504_v24 = vld [vmem:[#allocation8 + $0xd8] sm:$0xff] }
 0x26e   :  { %v508_v25 = vld [vmem:[#allocation8 + $0xf8] sm:$0xff] }
 0x26f   :  { %4046 = vmatpush2.bf16.msra.mxu0 %v8586_v63  ;;  %v8269_v19 = vcombine.high %v504_v24, %v508_v25 }
 0x270   :  { %4089 = vmatpush2.bf16.msra.mxu1 %v8714_v1  ;;  %4047 = vmatprep.subr.bf16.mxu0 %v8579_v2  ;;  %v8421_v1 = vcombine.high %v656_v40, %v660_v52  ;;  %v648_v2 = vld [vmem:[#allocation8 + $0x558] sm:$0xff] }
 0x271   :  { %4090 = vmatprep.subr.bf16.mxu1 %v8707_v4  ;;  %v624_v40 = vld [vmem:[#allocation8 + $0x498] sm:$0xff] }
 0x272   :  { %v628_v52 = vld [vmem:[#allocation8 + $0x4b8] sm:$0xff] }
 0x273   :  { %4048 = vmatpush2.bf16.msra.mxu0 %v8578_v39  ;;  %v8285_v39 = vcombine.high %v520_v58, %v524_v61 }
 0x274   :  { %4091 = vmatpush2.bf16.msra.mxu1 %v8706_v34  ;;  %4049 = vmatprep.subr.bf16.mxu0 %v8571_v41 }
 0x275   :  { %4092 = vmatprep.subr.bf16.mxu1 %v8699_v7  ;;  %v8413_v7 = vcombine.high %v648_v2, %v652_v3 }
 0x277   :  { %4050 = vmatpush2.bf16.msra.mxu0 %v8570_v15  ;;  %v644_v15 = vld [vmem:[#allocation8 + $0x538] sm:$0xff] }
 0x278   :  { %4093 = vmatpush2.bf16.msra.mxu1 %v8698_v16  ;;  %4051 = vmatprep.subr.bf16.mxu0 %v8563_v17  ;;  %v8284_v16 = vcombine.low %v520_v58, %v524_v61  ;;  %v8389_v61 = vcombine.high %v624_v40, %v628_v52 }
 0x279   :  { %4094 = vmatprep.subr.bf16.mxu1 %v8691_v18  ;;  %v8412_v18 = vcombine.low %v648_v2, %v652_v3  ;;  %v616_v2 = vld [vmem:[#allocation8 + $0x458] sm:$0xff] }
 0x27a   :  { %v620_v3 = vld [vmem:[#allocation8 + $0x478] sm:$0xff] }
 0x27b   :  { %4052 = vmatpush2.bf16.msra.mxu0 %v8562_v26  ;;  %v632_v26 = vld [vmem:[#allocation8 + $0x4d8] sm:$0xff] }
 0x27c   :  { %4095 = vmatpush2.bf16.msra.mxu1 %v8690_v12  ;;  %4107 = vmatprep.subr.bf16.mxu0 %v8301_v28  ;;  %v636_v12 = vld [vmem:[#allocation8 + $0x4f8] sm:$0xff]  ;;  %v8276_v28 = vcombine.low %v512_v8, %v516_v9 }
 0x27d   :  { %4150 = vmatprep.subr.bf16.mxu1 %v8429_v29  ;;  %v8404_v29 = vcombine.low %v640_v13, %v644_v15  ;;  %v8397_v45 = vcombine.high %v632_v26, %v636_v12  ;;  %v608_v8 = vld [vmem:[#allocation8 + $0x418] sm:$0xff] }
 0x27e   :  { %v3797_v63 = vpop.f32.mrf.mxu0  ;;  %4054 = vmatmul.mubr.bf16.vlgmr.msra.gmra.mxu0 %v9642_v44  ;;  %v612_v9 = vld [vmem:[#allocation8 + $0x438] sm:$0xff] }
 0x27f   :  { %v3798_v4 = vadd.f32 %v3797_v63, %v1002_v21  ;;  %v3840_v37 = vpop.f32.mrf.mxu1  ;;  %4097 = vmatmul.mubr.bf16.vlgmr.msra.gmra.mxu1 %v9644_v53  ;;  %4108 = vmatpush1.bf16.msra.mxu0 %v8300_v36  ;;  %v500_v36 = vld [vmem:[#allocation8 + $0xb8] sm:$0xff] }
 0x280   :  { %4139 = vmatprep.mubr.bf16.mxu0 %v9600_v27  ;;  %4151 = vmatpush1.bf16.msra.mxu1 %v8428_v55  ;;  %v9695_v42 = vpop.f32.mrf.mxu0  ;;  %v8268_v55 = vcombine.low %v504_v24, %v508_v25  ;;  %v488_v63 = vld [vmem:[#allocation8 + $0x58] sm:$0xff]  ;;  %v8372_v24 = vcombine.low %v608_v8, %v612_v9 }
 0x281   :  { %v9697_v34 = vadd.f32 %v3840_v37, %v3798_v4  ;;  %4182 = vmatprep.mubr.bf16.mxu1 %v9604_v31  ;;  %v9700_v41 = vpop.f32.mrf.mxu1  ;;  %4109 = vmatprep.subr.bf16.mxu0 %v8293_v57  ;;  %v8405_v31 = vcombine.high %v640_v13, %v644_v15  ;;  %v8396_v57 = vcombine.low %v632_v26, %v636_v12  ;;  %v592_v12 = vld [vmem:[#allocation8 + $0x398] sm:$0xff] }
 0x282   :  { %v3801_v10 = vpop.f32.mrf.mxu0  ;;  %4152 = vmatprep.subr.bf16.mxu1 %v8421_v1  ;;  %v492_v1 = vld [vmem:[#allocation8 + $0x78] sm:$0xff]  ;;  %v8388_v37 = vcombine.low %v624_v40, %v628_v52  ;;  %v8380_v13 = vcombine.low %v616_v2, %v620_v3 }
 0x283   :  { %v3802_v27 = vadd.f32 %v3801_v10, %v1002_v21  ;;  %4110 = vmatpush1.bf16.msra.mxu0 %v8292_v38  ;;  %v3844_v17 = vpop.f32.mrf.mxu1  ;;  %v496_v21 = vld [vmem:[#allocation8 + $0x98] sm:$0xff]  ;;  %v8253_v38 = vcombine.high %v488_v63, %v492_v1  ;;  %v8252_v10 = vcombine.low %v488_v63, %v492_v1 }
 0x284   :  { %4153 = vmatpush1.bf16.msra.mxu1 %v8420_v5  ;;  %4111 = vmatprep.subr.bf16.mxu0 %v8285_v39  ;;  %v8261_v58 = vcombine.high %v496_v21, %v500_v36  ;;  %v8260_v4 = vcombine.low %v496_v21, %v500_v36  ;;  %v8381_v5 = vcombine.high %v616_v2, %v620_v3  ;;  %v480_v39 = vld [vmem:[#allocation8 + $0x18] sm:$0xff] }
 0x285   :  { %v9702_v23 = vadd.f32 %v3844_v17, %v3802_v27  ;;  %4154 = vmatprep.subr.bf16.mxu1 %v8413_v7  ;;  %v484_v7 = vld [vmem:[#allocation8 + $0x38] sm:$0xff]  ;;  %v8373_v27 = vcombine.high %v608_v8, %v612_v9 }
 0x286   :  { %v8245_v15 = vcombine.high %v480_v39, %v484_v7  ;;  %v604_v17 = vld [vmem:[#allocation8 + $0x3f8] sm:$0xff] }
 0x287   :  { %4112 = vmatpush1.bf16.msra.mxu0 %v8284_v16  ;;  %v600_v16 = vld [vmem:[#allocation8 + $0x3d8] sm:$0xff] }
 0x288   :  { %4155 = vmatpush1.bf16.msra.mxu1 %v8412_v18  ;;  %4113 = vmatprep.subr.bf16.mxu0 %v8277_v20  ;;  %v728_v18 = vld [vmem:[#allocation8 + $0x7d8] sm:$0xff]  ;;  %v8365_v25 = vcombine.high %v600_v16, %v604_v17 }
 0x289   :  { %4156 = vmatprep.subr.bf16.mxu1 %v8405_v31  ;;  %v732_v20 = vld [vmem:[#allocation8 + $0x7f8] sm:$0xff]  ;;  %v8244_v31 = vcombine.low %v480_v39, %v484_v7 }
 0x28a   :  { %v8493_v26 = vcombine.high %v728_v18, %v732_v20  ;;  %v8492_v21 = vcombine.low %v728_v18, %v732_v20  ;;  %v584_v52 = vld [vmem:[#allocation8 + $0x358] sm:$0xff] }
 0x28b   :  { %4114 = vmatpush1.bf16.msra.mxu0 %v8276_v28  ;;  %v596_v28 = vld [vmem:[#allocation8 + $0x3b8] sm:$0xff] }
 0x28c   :  { %4157 = vmatpush1.bf16.msra.mxu1 %v8404_v29  ;;  %4115 = vmatprep.subr.bf16.mxu0 %v8269_v19  ;;  %v720_v29 = vld [vmem:[#allocation8 + $0x798] sm:$0xff]  ;;  %v8357_v36 = vcombine.high %v592_v12, %v596_v28 }
 0x28d   :  { %4158 = vmatprep.subr.bf16.mxu1 %v8397_v45  ;;  %v724_v19 = vld [vmem:[#allocation8 + $0x7b8] sm:$0xff]  ;;  %v8364_v45 = vcombine.low %v600_v16, %v604_v17 }
 0x28e   :  { %v8485_v40 = vcombine.high %v720_v29, %v724_v19  ;;  %v8484_v63 = vcombine.low %v720_v29, %v724_v19  ;;  %v576_v3 = vld [vmem:[#allocation8 + $0x318] sm:$0xff] }
 0x28f   :  { %4116 = vmatpush1.bf16.msra.mxu0 %v8268_v55  ;;  %v588_v55 = vld [vmem:[#allocation8 + $0x378] sm:$0xff] }
 0x290   :  { %4159 = vmatpush1.bf16.msra.mxu1 %v8396_v57  ;;  %4117 = vmatprep.subr.bf16.mxu0 %v8261_v58  ;;  %v712_v57 = vld [vmem:[#allocation8 + $0x758] sm:$0xff]  ;;  %v8349_v1 = vcombine.high %v584_v52, %v588_v55 }
 0x291   :  { %4160 = vmatprep.subr.bf16.mxu1 %v8389_v61  ;;  %v716_v58 = vld [vmem:[#allocation8 + $0x778] sm:$0xff]  ;;  %v8356_v61 = vcombine.low %v592_v12, %v596_v28 }
 0x292   :  { %v8477_v2 = vcombine.high %v712_v57, %v716_v58  ;;  %v8476_v39 = vcombine.low %v712_v57, %v716_v58  ;;  %v568_v9 = vld [vmem:[#allocation8 + $0x2d8] sm:$0xff] }
 0x293   :  { %4118 = vmatpush1.bf16.msra.mxu0 %v8260_v4  ;;  %v580_v4 = vld [vmem:[#allocation8 + $0x338] sm:$0xff] }
 0x294   :  { %4161 = vmatpush1.bf16.msra.mxu1 %v8388_v37  ;;  %4119 = vmatprep.subr.bf16.mxu0 %v8253_v38  ;;  %v704_v37 = vld [vmem:[#allocation8 + $0x718] sm:$0xff]  ;;  %v8341_v7 = vcombine.high %v576_v3, %v580_v4 }
 0x295   :  { %4162 = vmatprep.subr.bf16.mxu1 %v8381_v5  ;;  %v708_v38 = vld [vmem:[#allocation8 + $0x738] sm:$0xff]  ;;  %v8348_v5 = vcombine.low %v584_v52, %v588_v55 }
 0x296   :  { %v8469_v8 = vcombine.high %v704_v37, %v708_v38  ;;  %v8468_v16 = vcombine.low %v704_v37, %v708_v38  ;;  %v560_v20 = vld [vmem:[#allocation8 + $0x298] sm:$0xff] }
 0x297   :  { %4120 = vmatpush1.bf16.msra.mxu0 %v8252_v10  ;;  %v572_v10 = vld [vmem:[#allocation8 + $0x2f8] sm:$0xff] }
 0x298   :  { %4163 = vmatpush1.bf16.msra.mxu1 %v8380_v13  ;;  %4121 = vmatprep.subr.bf16.mxu0 %v8245_v15  ;;  %v696_v13 = vld [vmem:[#allocation8 + $0x6d8] sm:$0xff]  ;;  %v8333_v17 = vcombine.high %v568_v9, %v572_v10 }
 0x299   :  { %4164 = vmatprep.subr.bf16.mxu1 %v8373_v27  ;;  %v700_v15 = vld [vmem:[#allocation8 + $0x6f8] sm:$0xff]  ;;  %v8340_v27 = vcombine.low %v576_v3, %v580_v4 }
 0x29a   :  { %v8461_v18 = vcombine.high %v696_v13, %v700_v15  ;;  %v8460_v12 = vcombine.low %v696_v13, %v700_v15  ;;  %v552_v19 = vld [vmem:[#allocation8 + $0x258] sm:$0xff] }
 0x29b   :  { %4122 = vmatpush1.bf16.msra.mxu0 %v8244_v31  ;;  %v564_v31 = vld [vmem:[#allocation8 + $0x2b8] sm:$0xff] }
 0x29c   :  { %4165 = vmatpush1.bf16.msra.mxu1 %v8372_v24  ;;  %4123 = vmatprep.subr.bf16.mxu0 %v8365_v25  ;;  %v688_v24 = vld [vmem:[#allocation8 + $0x698] sm:$0xff]  ;;  %v8325_v28 = vcombine.high %v560_v20, %v564_v31 }
 0x29d   :  { %4166 = vmatprep.subr.bf16.mxu1 %v8493_v26  ;;  %v692_v25 = vld [vmem:[#allocation8 + $0x6b8] sm:$0xff]  ;;  %v8332_v26 = vcombine.low %v568_v9, %v572_v10 }
 0x29e   :  { %v8453_v29 = vcombine.high %v688_v24, %v692_v25  ;;  %v8452_v52 = vcombine.low %v688_v24, %v692_v25  ;;  %v544_v58 = vld [vmem:[#allocation8 + $0x218] sm:$0xff]  ;;  %v9706_v24 = vpop.f32.mrf.mxu1 }
 0x29f   :  { %4124 = vmatpush2.bf16.msra.mxu0 %v8364_v45  ;;  %v556_v45 = vld [vmem:[#allocation8 + $0x278] sm:$0xff] }
 0x2a0   :  { %4167 = vmatpush2.bf16.msra.mxu1 %v8492_v21  ;;  %4125 = vmatprep.subr.bf16.mxu0 %v8357_v36  ;;  %v680_v21 = vld [vmem:[#allocation8 + $0x658] sm:$0xff]  ;;  %v8317_v55 = vcombine.high %v552_v19, %v556_v45 }
 0x2a1   :  { %4168 = vmatprep.subr.bf16.mxu1 %v8485_v40  ;;  %v684_v36 = vld [vmem:[#allocation8 + $0x678] sm:$0xff]  ;;  %v8324_v40 = vcombine.low %v560_v20, %v564_v31  ;;  %v9704_v20 = vpop.f32.mrf.mxu0 }
 0x2a2   :  { %v8445_v57 = vcombine.high %v680_v21, %v684_v36  ;;  %v8444_v3 = vcombine.low %v680_v21, %v684_v36  ;;  %v792_v38 = vld [vmem:[#allocation8 + $0x9d8] sm:$0xff] }
 0x2a3   :  { %4126 = vmatpush2.bf16.msra.mxu0 %v8356_v61  ;;  %v548_v61 = vld [vmem:[#allocation8 + $0x238] sm:$0xff] }
 0x2a4   :  { %4169 = vmatpush2.bf16.msra.mxu1 %v8484_v63  ;;  %4127 = vmatprep.subr.bf16.mxu0 %v8349_v1  ;;  %v672_v63 = vld [vmem:[#allocation8 + $0x618] sm:$0xff]  ;;  %v8309_v4 = vcombine.high %v544_v58, %v548_v61 }
 0x2a5   :  { %4170 = vmatprep.subr.bf16.mxu1 %v8477_v2  ;;  %v676_v1 = vld [vmem:[#allocation8 + $0x638] sm:$0xff]  ;;  %v8316_v2 = vcombine.low %v552_v19, %v556_v45 }
 0x2a6   :  { %v8437_v37 = vcombine.high %v672_v63, %v676_v1  ;;  %v8436_v9 = vcombine.low %v672_v63, %v676_v1  ;;  %v784_v15 = vld [vmem:[#allocation8 + $0x998] sm:$0xff] }
 0x2a7   :  { %4128 = vmatpush2.bf16.msra.mxu0 %v8348_v5  ;;  %v796_v5 = vld [vmem:[#allocation8 + $0x9f8] sm:$0xff] }
 0x2a8   :  { %4171 = vmatpush2.bf16.msra.mxu1 %v8476_v39  ;;  %4129 = vmatprep.subr.bf16.mxu0 %v8341_v7  ;;  %v920_v39 = vld [vmem:[#allocation8 + $0xdd8] sm:$0xff]  ;;  %v8557_v10 = vcombine.high %v792_v38, %v796_v5 }
 0x2a9   :  { %4172 = vmatprep.subr.bf16.mxu1 %v8469_v8  ;;  %v924_v7 = vld [vmem:[#allocation8 + $0xdf8] sm:$0xff]  ;;  %v8308_v8 = vcombine.low %v544_v58, %v548_v61 }
 0x2aa   :  { %v8685_v13 = vcombine.high %v920_v39, %v924_v7  ;;  %v8684_v31 = vcombine.low %v920_v39, %v924_v7  ;;  %v904_v19 = vld [vmem:[#allocation8 + $0xd58] sm:$0xff] }
 0x2ab   :  { %4130 = vmatpush2.bf16.msra.mxu0 %v8340_v27  ;;  %v788_v27 = vld [vmem:[#allocation8 + $0x9b8] sm:$0xff] }
 0x2ac   :  { %4173 = vmatpush2.bf16.msra.mxu1 %v8468_v16  ;;  %4131 = vmatprep.subr.bf16.mxu0 %v8333_v17  ;;  %v8556_v16 = vcombine.low %v792_v38, %v796_v5  ;;  %v912_v17 = vld [vmem:[#allocation8 + $0xd98] sm:$0xff]  ;;  %v8549_v25 = vcombine.high %v784_v15, %v788_v27 }
 0x2ad   :  { %4174 = vmatprep.subr.bf16.mxu1 %v8461_v18  ;;  %v916_v18 = vld [vmem:[#allocation8 + $0xdb8] sm:$0xff] }
 0x2ae   :  { %v908_v45 = vld [vmem:[#allocation8 + $0xd78] sm:$0xff] }
 0x2af   :  { %4132 = vmatpush2.bf16.msra.mxu0 %v8332_v26  ;;  %v776_v26 = vld [vmem:[#allocation8 + $0x958] sm:$0xff]  ;;  %v8669_v61 = vcombine.high %v904_v19, %v908_v45 }
 0x2b0   :  { %4175 = vmatpush2.bf16.msra.mxu1 %v8460_v12  ;;  %4133 = vmatprep.subr.bf16.mxu0 %v8325_v28  ;;  %v780_v12 = vld [vmem:[#allocation8 + $0x978] sm:$0xff] }
 0x2b1   :  { %4176 = vmatprep.subr.bf16.mxu1 %v8453_v29  ;;  %v8677_v29 = vcombine.high %v912_v17, %v916_v18  ;;  %v772_v63 = vld [vmem:[#allocation8 + $0x938] sm:$0xff] }
 0x2b2   :  { %v760_v39 = vld [vmem:[#allocation8 + $0x8d8] sm:$0xff] }
 0x2b3   :  { %4134 = vmatpush2.bf16.msra.mxu0 %v8324_v40  ;;  %v8548_v40 = vcombine.low %v784_v15, %v788_v27  ;;  %v764_v7 = vld [vmem:[#allocation8 + $0x8f8] sm:$0xff] }
 0x2b4   :  { %4177 = vmatpush2.bf16.msra.mxu1 %v8452_v52  ;;  %4135 = vmatprep.subr.bf16.mxu0 %v8317_v55  ;;  %v8676_v55 = vcombine.low %v912_v17, %v916_v18  ;;  %v8525_v27 = vcombine.high %v760_v39, %v764_v7  ;;  %v752_v18 = vld [vmem:[#allocation8 + $0x898] sm:$0xff] }
 0x2b5   :  { %4178 = vmatprep.subr.bf16.mxu1 %v8445_v57  ;;  %v8541_v57 = vcombine.high %v776_v26, %v780_v12 }
 0x2b7   :  { %4136 = vmatpush2.bf16.msra.mxu0 %v8316_v2  ;;  %v900_v2 = vld [vmem:[#allocation8 + $0xd38] sm:$0xff] }
 0x2b8   :  { %4179 = vmatpush2.bf16.msra.mxu1 %v8444_v3  ;;  %4137 = vmatprep.subr.bf16.mxu0 %v8309_v4  ;;  %v8540_v3 = vcombine.low %v776_v26, %v780_v12  ;;  %v884_v26 = vld [vmem:[#allocation8 + $0xcb8] sm:$0xff]  ;;  %v8524_v12 = vcombine.low %v760_v39, %v764_v7 }
 0x2b9   :  { %4180 = vmatprep.subr.bf16.mxu1 %v8437_v37  ;;  %v8668_v37 = vcombine.low %v904_v19, %v908_v45  ;;  %v744_v45 = vld [vmem:[#allocation8 + $0x858] sm:$0xff] }
 0x2bb   :  { %4138 = vmatpush2.bf16.msra.mxu0 %v8308_v8  ;;  %v888_v8 = vld [vmem:[#allocation8 + $0xcd8] sm:$0xff] }
 0x2bc   :  { %4181 = vmatpush2.bf16.msra.mxu1 %v8436_v9  ;;  %4193 = vmatprep.subr.bf16.mxu0 %v8557_v10  ;;  %v892_v9 = vld [vmem:[#allocation8 + $0xcf8] sm:$0xff] }
 0x2bd   :  { %4236 = vmatprep.subr.bf16.mxu1 %v8685_v13  ;;  %v8653_v17 = vcombine.high %v888_v8, %v892_v9 }
 0x2be   :  { %v3883_v28 = vpop.f32.mrf.mxu0  ;;  %4140 = vmatmul.mubr.bf16.vlgmr.msra.gmra.mxu0 %v9602_v30 }
 0x2bf   :  { %v3884_v21 = vadd.f32 %v3883_v28, %v9697_v34  ;;  %v3926_v36 = vpop.f32.mrf.mxu1  ;;  %4183 = vmatmul.mubr.bf16.vlgmr.msra.gmra.mxu1 %v9608_v35  ;;  %4194 = vmatpush1.bf16.msra.mxu0 %v8556_v16  ;;  %v768_v34 = vld [vmem:[#allocation8 + $0x918] sm:$0xff]  ;;  %v8652_v28 = vcombine.low %v888_v8, %v892_v9 }
 0x2c0   :  { %4225 = vmatprep.mubr.bf16.mxu0 %v9622_v6  ;;  %4237 = vmatpush1.bf16.msra.mxu1 %v8684_v31  ;;  %v9712_v52 = vpop.f32.mrf.mxu0  ;;  %v896_v35 = vld [vmem:[#allocation8 + $0xd18] sm:$0xff]  ;;  %v8533_v38 = vcombine.high %v768_v34, %v772_v63  ;;  %v8532_v15 = vcombine.low %v768_v34, %v772_v63 }
 0x2c1   :  { %v3927_v58 = vadd.f32 %v3926_v36, %v3884_v21  ;;  %4268 = vmatprep.mubr.bf16.mxu1 %v9624_v43  ;;  %v9715_v30 = vpop.f32.mrf.mxu1  ;;  %4195 = vmatprep.subr.bf16.mxu0 %v8549_v25  ;;  %v8661_v5 = vcombine.high %v896_v35, %v900_v2  ;;  %v756_v31 = vld [vmem:[#allocation8 + $0x8b8] sm:$0xff] }
 0x2c2   :  { %v3887_v1 = vpop.f32.mrf.mxu0  ;;  %4238 = vmatprep.subr.bf16.mxu1 %v8677_v29  ;;  %v880_v25 = vld [vmem:[#allocation8 + $0xc98] sm:$0xff]  ;;  %v8517_v29 = vcombine.high %v752_v18, %v756_v31 }
 0x2c3   :  { %v3888_v6 = vadd.f32 %v3887_v1, %v9702_v23  ;;  %4196 = vmatpush1.bf16.msra.mxu0 %v8548_v40  ;;  %v3930_v4 = vpop.f32.mrf.mxu1  ;;  %v4281_v10 = vmax.f32 %v3927_v58, 0.0  ;;  %v8660_v23 = vcombine.low %v896_v35, %v900_v2  ;;  %v8645_v19 = vcombine.high %v880_v25, %v884_v26  ;;  %v748_v21 = vld [vmem:[#allocation8 + $0x878] sm:$0xff] }
 0x2c4   :  { %4239 = vmatpush1.bf16.msra.mxu1 %v8676_v55  ;;  %4197 = vmatprep.subr.bf16.mxu0 %v8541_v57  ;;  %v872_v36 = vld [vmem:[#allocation8 + $0xc58] sm:$0xff]  ;;  %v8516_v55 = vcombine.low %v752_v18, %v756_v31  ;;  %v8644_v57 = vcombine.low %v880_v25, %v884_v26  ;;  %v8509_v58 = vcombine.high %v744_v45, %v748_v21 }
 0x2c5   :  { %v3931_v43 = vadd.f32 %v3930_v4, %v3888_v6  ;;  %4240 = vmatprep.subr.bf16.mxu1 %v8669_v61  ;;  %v876_v40 = vld [vmem:[#allocation8 + $0xc78] sm:$0xff]  ;;  %v8508_v2 = vcombine.low %v744_v45, %v748_v21 }
 0x2c6   :  { %v8637_v61 = vcombine.high %v872_v36, %v876_v40  ;;  %v736_v34 = vld [vmem:[#allocation8 + $0x818] sm:$0xff]  ;;  %v8636_v6 = vcombine.low %v872_v36, %v876_v40 }
 0x2c7   :  { %v4289_v13 = vmax.f32 %v3931_v43, 0.0  ;;  %4198 = vmatpush1.bf16.msra.mxu0 %v8540_v3  ;;  %v740_v63 = vld [vmem:[#allocation8 + $0x838] sm:$0xff] }
 0x2c8   :  { %4241 = vmatpush1.bf16.msra.mxu1 %v8668_v37  ;;  %4199 = vmatprep.subr.bf16.mxu0 %v8533_v38  ;;  %v864_v1 = vld [vmem:[#allocation8 + $0xc18] sm:$0xff]  ;;  %v8501_v3 = vcombine.high %v736_v34, %v740_v63  ;;  %v8500_v39 = vcombine.low %v736_v34, %v740_v63 }
 0x2c9   :  { %v9718_v16 = vpack.c.bf16 %v4289_v13, %v4281_v10  ;;  %4242 = vmatprep.subr.bf16.mxu1 %v8661_v5  ;;  %v868_v35 = vld [vmem:[#allocation8 + $0xc38] sm:$0xff] }
 0x2ca   :  { %v8629_v4 = vcombine.high %v864_v1, %v868_v35  ;;  %v856_v37 = vld [vmem:[#allocation8 + $0xbd8] sm:$0xff]  ;;  %v8628_v7 = vcombine.low %v864_v1, %v868_v35 }
 0x2cb   :  { %4200 = vmatpush1.bf16.msra.mxu0 %v8532_v15  ;;  %v860_v38 = vld [vmem:[#allocation8 + $0xbf8] sm:$0xff] }
 0x2cc   :  { %4243 = vmatpush1.bf16.msra.mxu1 %v8660_v23  ;;  %4201 = vmatprep.subr.bf16.mxu0 %v8525_v27  ;;  %v984_v43 = vld [vmem:[#allocation8 + $0xfd8] sm:$0xff]  ;;  %v8621_v8 = vcombine.high %v856_v37, %v860_v38  ;;  %v8620_v27 = vcombine.low %v856_v37, %v860_v38 }
 0x2cd   :  { %4244 = vmatprep.subr.bf16.mxu1 %v8653_v17  ;;  %v988_v5 = vld [vmem:[#allocation8 + $0xff8] sm:$0xff] }
 0x2ce   :  { %v8749_v9 = vcombine.high %v984_v43, %v988_v5  ;;  %v848_v10 = vld [vmem:[#allocation8 + $0xb98] sm:$0xff]  ;;  %v8748_v17 = vcombine.low %v984_v43, %v988_v5 }
 0x2cf   :  { %4202 = vmatpush1.bf16.msra.mxu0 %v8524_v12  ;;  %v852_v13 = vld [vmem:[#allocation8 + $0xbb8] sm:$0xff] }
 0x2d0   :  { %4245 = vmatpush1.bf16.msra.mxu1 %v8652_v28  ;;  %4203 = vmatprep.subr.bf16.mxu0 %v8517_v29  ;;  %v976_v15 = vld [vmem:[#allocation8 + $0xf98] sm:$0xff]  ;;  %v8613_v18 = vcombine.high %v848_v10, %v852_v13  ;;  %v8612_v29 = vcombine.low %v848_v10, %v852_v13 }
 0x2d1   :  { %4246 = vmatprep.subr.bf16.mxu1 %v8645_v19  ;;  %v980_v23 = vld [vmem:[#allocation8 + $0xfb8] sm:$0xff] }
 0x2d2   :  { %v8741_v31 = vcombine.high %v976_v15, %v980_v23  ;;  %v840_v25 = vld [vmem:[#allocation8 + $0xb58] sm:$0xff]  ;;  %v8740_v19 = vcombine.low %v976_v15, %v980_v23 }
 0x2d3   :  { %4204 = vmatpush1.bf16.msra.mxu0 %v8516_v55  ;;  %v844_v26 = vld [vmem:[#allocation8 + $0xb78] sm:$0xff] }
 0x2d4   :  { %4247 = vmatpush1.bf16.msra.mxu1 %v8644_v57  ;;  %4205 = vmatprep.subr.bf16.mxu0 %v8509_v58  ;;  %v968_v12 = vld [vmem:[#allocation8 + $0xf58] sm:$0xff]  ;;  %v8605_v45 = vcombine.high %v840_v25, %v844_v26  ;;  %v8604_v58 = vcombine.low %v840_v25, %v844_v26 }
 0x2d5   :  { %4248 = vmatprep.subr.bf16.mxu1 %v8637_v61  ;;  %v972_v28 = vld [vmem:[#allocation8 + $0xf78] sm:$0xff] }
 0x2d6   :  { %v8733_v21 = vcombine.high %v968_v12, %v972_v28  ;;  %v832_v36 = vld [vmem:[#allocation8 + $0xb18] sm:$0xff]  ;;  %v8732_v61 = vcombine.low %v968_v12, %v972_v28 }
 0x2d7   :  { %4206 = vmatpush1.bf16.msra.mxu0 %v8508_v2  ;;  %v836_v40 = vld [vmem:[#allocation8 + $0xb38] sm:$0xff] }
 0x2d8   :  { %4249 = vmatpush1.bf16.msra.mxu1 %v8636_v6  ;;  %4207 = vmatprep.subr.bf16.mxu0 %v8501_v3  ;;  %v960_v55 = vld [vmem:[#allocation8 + $0xf18] sm:$0xff]  ;;  %v8597_v34 = vcombine.high %v832_v36, %v836_v40  ;;  %v8596_v3 = vcombine.low %v832_v36, %v836_v40 }
 0x2d9   :  { %4250 = vmatprep.subr.bf16.mxu1 %v8629_v4  ;;  %v964_v57 = vld [vmem:[#allocation8 + $0xf38] sm:$0xff] }
 0x2da   :  { %v8725_v63 = vcombine.high %v960_v55, %v964_v57  ;;  %v824_v1 = vld [vmem:[#allocation8 + $0xad8] sm:$0xff]  ;;  %v8724_v4 = vcombine.low %v960_v55, %v964_v57 }
 0x2db   :  { %4208 = vmatpush1.bf16.msra.mxu0 %v8500_v39  ;;  %v828_v35 = vld [vmem:[#allocation8 + $0xaf8] sm:$0xff]  ;;  %v9720_v39 = vld [vmem:[#allocation10] sm:$0xff] }
 0x2dc   :  { %4251 = vmatpush1.bf16.msra.mxu1 %v8628_v7  ;;  %4209 = vmatprep.subr.bf16.mxu0 %v8621_v8  ;;  %v952_v2 = vld [vmem:[#allocation8 + $0xed8] sm:$0xff]  ;;  %v8589_v37 = vcombine.high %v824_v1, %v828_v35  ;;  %v998_v7 = vrot.slane %v9720_v39, %v9565_v47  ;;  %v1006_v10 = vrot.slane %v9720_v39, %v9571_v49 }
 0x2dd   :  { %4252 = vmatprep.subr.bf16.mxu1 %v8749_v9  ;;  %v956_v6 = vld [vmem:[#allocation8 + $0xef8] sm:$0xff]  ;;  %v8588_v13 = vcombine.low %v824_v1, %v828_v35 }
 0x2de   :  { %v8717_v38 = vcombine.high %v952_v2, %v956_v6  ;;  %v816_v43 = vld [vmem:[#allocation8 + $0xa98] sm:$0xff]  ;;  %v3632_v15 = vadd.f32 %v9670_v11, %v998_v7  ;;  %v8716_v23 = vcombine.low %v952_v2, %v956_v6  ;;  %v3628_v26 = vadd.f32 %v9661_v50, %v998_v7 }
 0x2df   :  { %4210 = vmatpush2.bf16.msra.mxu0 %v8620_v27  ;;  %v820_v5 = vld [vmem:[#allocation8 + $0xab8] sm:$0xff] }
 0x2e0   :  { %4253 = vmatpush2.bf16.msra.mxu1 %v8748_v17  ;;  %4211 = vmatprep.subr.bf16.mxu0 %v8613_v18  ;;  %v944_v8 = vld [vmem:[#allocation8 + $0xe98] sm:$0xff]  ;;  %v8581_v27 = vcombine.high %v816_v43, %v820_v5  ;;  %v3804_v17 = vadd.f32 %v9704_v20, %v1006_v10  ;;  %v3675_v11 = vadd.f32 %v9672_v14, %v3632_v15 }
 0x2e1   :  { %4254 = vmatprep.subr.bf16.mxu1 %v8741_v31  ;;  %v948_v9 = vld [vmem:[#allocation8 + $0xeb8] sm:$0xff]  ;;  %v3671_v50 = vadd.f32 %v9666_v22, %v3628_v26  ;;  %v4359_v22 = vld [vmem:[#allocation11 + $0x1c0] sm:$0xff] }
 0x2e2   :  { %v8709_v18 = vcombine.high %v944_v8, %v948_v9  ;;  %v808_v31 = vld [vmem:[#allocation8 + $0xa58] sm:$0xff]  ;;  %v3847_v20 = vadd.f32 %v9706_v24, %v3804_v17  ;;  %v4347_v26 = vld [vmem:[#allocation11 + $0x160] sm:$0xff] }
 0x2e3   :  { %4212 = vmatpush2.bf16.msra.mxu0 %v8612_v29  ;;  %v812_v25 = vld [vmem:[#allocation8 + $0xa78] sm:$0xff]  ;;  %v3800_v29 = vadd.f32 %v9695_v42, %v1006_v10  ;;  %v3714_v1 = vadd.f32 %v9678_v33, %v3671_v50  ;;  %v4351_v10 = vld [vmem:[#allocation11 + $0x180] sm:$0xff] }
 0x2e4   :  { %4255 = vmatpush2.bf16.msra.mxu1 %v8740_v19  ;;  %4213 = vmatprep.subr.bf16.mxu0 %v8605_v45  ;;  %v936_v12 = vld [vmem:[#allocation8 + $0xe58] sm:$0xff]  ;;  %v8580_v19 = vcombine.low %v816_v43, %v820_v5  ;;  %v3889_v45 = vpop.f32.mrf.mxu0  ;;  %v8573_v36 = vcombine.high %v808_v31, %v812_v25 }
 0x2e5   :  { %4256 = vmatprep.subr.bf16.mxu1 %v8733_v21  ;;  %v940_v28 = vld [vmem:[#allocation8 + $0xe78] sm:$0xff]  ;;  %v8708_v21 = vcombine.low %v944_v8, %v948_v9  ;;  %v3890_v14 = vadd.f32 %v3889_v45, %v3847_v20  ;;  %v3757_v33 = vadd.f32 %v9681_v32, %v3714_v1  ;;  %v4335_v20 = vld [vmem:[#allocation11 + $0x100] sm:$0xff] }
 0x2e6   :  { %v8701_v40 = vcombine.high %v936_v12, %v940_v28  ;;  %v800_v55 = vld [vmem:[#allocation8 + $0xa18] sm:$0xff]  ;;  %v8700_v24 = vcombine.low %v936_v12, %v940_v28  ;;  %v4471_v28 = vld [vmem:[#allocation11 + $0x540] sm:$0xff] }
 0x2e7   :  { %4214 = vmatpush2.bf16.msra.mxu0 %v8604_v58  ;;  %v804_v57 = vld [vmem:[#allocation8 + $0xa38] sm:$0xff]  ;;  %v3718_v58 = vadd.f32 %v9688_v54, %v3675_v11  ;;  %v4280_v17 = vmax.f32 %v3757_v33, 0.0  ;;  %v4439_v33 = vld [vmem:[#allocation11 + $0x440] sm:$0xff] }
 0x2e8   :  { %4257 = vmatpush2.bf16.msra.mxu1 %v8732_v61  ;;  %4215 = vmatprep.subr.bf16.mxu0 %v8597_v34  ;;  %v928_v42 = vld [vmem:[#allocation8 + $0xe18] sm:$0xff]  ;;  %v3843_v34 = vadd.f32 %v9700_v41, %v3800_v29  ;;  %v8565_v35 = vcombine.high %v800_v55, %v804_v57  ;;  %v4491_v41 = vld [vmem:[#allocation11 + $0x5e0] sm:$0xff]  ;;  %v8564_v43 = vcombine.low %v800_v55, %v804_v57 }
 0x2e9   :  { %4258 = vmatprep.subr.bf16.mxu1 %v8725_v63  ;;  %v932_v61 = vld [vmem:[#allocation8 + $0xe38] sm:$0xff]  ;;  %v8572_v63 = vcombine.low %v808_v31, %v812_v25  ;;  %v3761_v54 = vadd.f32 %v9690_v56, %v3718_v58  ;;  %v4343_v25 = vld [vmem:[#allocation11 + $0x140] sm:$0xff] }
 0x2ea   :  { %v3886_v2 = vadd.f32 %v9712_v52, %v3843_v34  ;;  %v8693_v6 = vcombine.high %v928_v42, %v932_v61  ;;  %v8692_v5 = vcombine.low %v928_v42, %v932_v61  ;;  %v4475_v29 = vld [vmem:[#allocation11 + $0x560] sm:$0xff]  ;;  %v8790_v57 = vcombine.low %v4343_v25, %v4347_v26 }
 0x2eb   :  { %4216 = vmatpush2.bf16.msra.mxu0 %v8596_v3  ;;  %v4363_v3 = vld [vmem:[#allocation11 + $0x1e0] sm:$0xff]  ;;  %v4288_v9 = vmax.f32 %v3761_v54, 0.0 }
 0x2ec   :  { %4259 = vmatpush2.bf16.msra.mxu1 %v8724_v4  ;;  %4217 = vmatprep.subr.bf16.mxu0 %v8589_v37  ;;  %v3932_v4 = vpop.f32.mrf.mxu1  ;;  %v4487_v37 = vld [vmem:[#allocation11 + $0x5c0] sm:$0xff]  ;;  %v8807_v7 = vcombine.high %v4359_v22, %v4363_v3  ;;  %v3929_v52 = vadd.f32 %v9715_v30, %v3886_v2  ;;  %v8806_v15 = vcombine.low %v4359_v22, %v4363_v3 }
 0x2ed   :  { %4260 = vmatprep.subr.bf16.mxu1 %v8717_v38  ;;  %v3933_v38 = vadd.f32 %v3932_v4, %v3890_v14  ;;  %v8935_v8 = vcombine.high %v4487_v37, %v4491_v41  ;;  %v8934_v32 = vcombine.low %v4487_v37, %v4491_v41  ;;  %v9740_v30 = vpack.c.bf16 %v4288_v9, %v4280_v17  ;;  %v4467_v55 = vld [vmem:[#allocation11 + $0x520] sm:$0xff] }
 0x2ee   :  { %v4327_v42 = vld [vmem:[#allocation11 + $0xc0] sm:$0xff] }
 0x2ef   :  { %4218 = vmatpush2.bf16.msra.mxu0 %v8588_v13  ;;  %v4355_v13 = vld [vmem:[#allocation11 + $0x1a0] sm:$0xff]  ;;  %v4290_v56 = vmax.f32 %v3933_v38, 0.0 }
 0x2f0   :  { %4261 = vmatpush2.bf16.msra.mxu1 %v8716_v23  ;;  %4219 = vmatprep.subr.bf16.mxu0 %v8581_v27  ;;  %v4479_v23 = vld [vmem:[#allocation11 + $0x580] sm:$0xff]  ;;  %v8799_v31 = vcombine.high %v4351_v10, %v4355_v13  ;;  %v8798_v11 = vcombine.low %v4351_v10, %v4355_v13 }
 0x2f1   :  { %4262 = vmatprep.subr.bf16.mxu1 %v8709_v18  ;;  %v4483_v27 = vld [vmem:[#allocation11 + $0x5a0] sm:$0xff]  ;;  %v4282_v18 = vmax.f32 %v3929_v52, 0.0 }
 0x2f2   :  { %v8927_v12 = vcombine.high %v4479_v23, %v4483_v27  ;;  %v8926_v45 = vcombine.low %v4479_v23, %v4483_v27  ;;  %v4331_v61 = vld [vmem:[#allocation11 + $0xe0] sm:$0xff] }
 0x2f3   :  { %4220 = vmatpush2.bf16.msra.mxu0 %v8580_v19  ;;  %v9743_v19 = vpack.c.bf16 %v4290_v56, %v4282_v18  ;;  %v4455_v34 = vld [vmem:[#allocation11 + $0x4c0] sm:$0xff]  ;;  %v8774_v54 = vcombine.low %v4327_v42, %v4331_v61 }
 0x2f4   :  { %4263 = vmatpush2.bf16.msra.mxu1 %v8708_v21  ;;  %4221 = vmatprep.subr.bf16.mxu0 %v8573_v36  ;;  %v8791_v21 = vcombine.high %v4343_v25, %v4347_v26  ;;  %v8919_v36 = vcombine.high %v4471_v28, %v4475_v29  ;;  %v4459_v14 = vld [vmem:[#allocation11 + $0x4e0] sm:$0xff] }
 0x2f5   :  { %4264 = vmatprep.subr.bf16.mxu1 %v8701_v40  ;;  %v4463_v40 = vld [vmem:[#allocation11 + $0x500] sm:$0xff]  ;;  %v8902_v4 = vcombine.low %v4455_v34, %v4459_v14 }
 0x2f6   :  { %v8911_v58 = vcombine.high %v4463_v40, %v4467_v55  ;;  %v8910_v1 = vcombine.low %v4463_v40, %v4467_v55  ;;  %v4319_v2 = vld [vmem:[#allocation11 + $0x80] sm:$0xff] }
 0x2f7   :  { %4222 = vmatpush2.bf16.msra.mxu0 %v8572_v63  ;;  %v4447_v22 = vld [vmem:[#allocation11 + $0x480] sm:$0xff] }
 0x2f8   :  { %4265 = vmatpush2.bf16.msra.mxu1 %v8700_v24  ;;  %4223 = vmatprep.subr.bf16.mxu0 %v8565_v35  ;;  %v8775_v24 = vcombine.high %v4327_v42, %v4331_v61  ;;  %v8903_v35 = vcombine.high %v4455_v34, %v4459_v14  ;;  %v4451_v3 = vld [vmem:[#allocation11 + $0x4a0] sm:$0xff] }
 0x2f9   :  { %4266 = vmatprep.subr.bf16.mxu1 %v8693_v6  ;;  %v4323_v6 = vld [vmem:[#allocation11 + $0xa0] sm:$0xff]  ;;  %v8895_v41 = vcombine.high %v4447_v22, %v4451_v3  ;;  %v8894_v52 = vcombine.low %v4447_v22, %v4451_v3 }
 0x2fa   :  { %v8767_v37 = vcombine.high %v4319_v2, %v4323_v6  ;;  %v4311_v38 = vld [vmem:[#allocation11 + $0x40] sm:$0xff] }
 0x2fb   :  { %4224 = vmatpush2.bf16.msra.mxu0 %v8564_v43  ;;  %v4315_v43 = vld [vmem:[#allocation11 + $0x60] sm:$0xff] }
 0x2fc   :  { %4267 = vmatpush2.bf16.msra.mxu1 %v8692_v5  ;;  %7417 = vmatprep.subr.bf16.mxu0 %v8807_v7  ;;  %v4443_v5 = vld [vmem:[#allocation11 + $0x460] sm:$0xff]  ;;  %v8766_v7 = vcombine.low %v4319_v2, %v4323_v6  ;;  %v8758_v23 = vcombine.low %v4311_v38, %v4315_v43 }
 0x2fd   :  { %7460 = vmatprep.subr.bf16.mxu1 %v8935_v8  ;;  %v8759_v8 = vcombine.high %v4311_v38, %v4315_v43  ;;  %v8887_v9 = vcombine.high %v4439_v33, %v4443_v5  ;;  %v4303_v10 = vld [vmem:[#allocation11] sm:$0xff]  ;;  %v8886_v27 = vcombine.low %v4439_v33, %v4443_v5 }
 0x2fe   :  { %4226 = vmatmul.mubr.bf16.vlgmr.msra.gmra.mxu0 %v9642_v44  ;;  %v4339_v44 = vld [vmem:[#allocation11 + $0x120] sm:$0xff] }
 0x2ff   :  { %4269 = vmatmul.mubr.bf16.vlgmr.msra.gmra.mxu1 %v9644_v53  ;;  %7418 = vmatpush1.bf16.msra.mxu0 %v8806_v15  ;;  %v8918_v53 = vcombine.low %v4471_v28, %v4475_v29  ;;  %v8783_v50 = vcombine.high %v4335_v20, %v4339_v44  ;;  %v8782_v63 = vcombine.low %v4335_v20, %v4339_v44  ;;  %v4307_v13 = vld [vmem:[#allocation11 + $0x20] sm:$0xff] }
 0x300   :  { %7449 = vmatprep.mubr.bf16.mxu0 %v9740_v30  ;;  %7461 = vmatpush1.bf16.msra.mxu1 %v8934_v32  ;;  %v4431_v56 = vld [vmem:[#allocation11 + $0x400] sm:$0xff]  ;;  %v8751_v17 = vcombine.high %v4303_v10, %v4307_v13 }
 0x301   :  { %7492 = vmatprep.mubr.bf16.mxu1 %v9743_v19  ;;  %7419 = vmatprep.subr.bf16.mxu0 %v8799_v31  ;;  %v4435_v15 = vld [vmem:[#allocation11 + $0x420] sm:$0xff] }
 0x302   :  { %7462 = vmatprep.subr.bf16.mxu1 %v8927_v12  ;;  %v8879_v32 = vcombine.high %v4431_v56, %v4435_v15  ;;  %v4423_v18 = vld [vmem:[#allocation11 + $0x3c0] sm:$0xff]  ;;  %v8750_v12 = vcombine.low %v4303_v10, %v4307_v13  ;;  %v8878_v28 = vcombine.low %v4431_v56, %v4435_v15 }
 0x303   :  { %7420 = vmatpush1.bf16.msra.mxu0 %v8798_v11  ;;  %v4427_v31 = vld [vmem:[#allocation11 + $0x3e0] sm:$0xff] }
 0x304   :  { %7463 = vmatpush1.bf16.msra.mxu1 %v8926_v45  ;;  %7421 = vmatprep.subr.bf16.mxu0 %v8791_v21  ;;  %v4551_v25 = vld [vmem:[#allocation11 + $0x7c0] sm:$0xff]  ;;  %v8871_v29 = vcombine.high %v4423_v18, %v4427_v31  ;;  %v8870_v44 = vcombine.low %v4423_v18, %v4427_v31 }
 0x305   :  { %7464 = vmatprep.subr.bf16.mxu1 %v8919_v36  ;;  %v4555_v26 = vld [vmem:[#allocation11 + $0x7e0] sm:$0xff] }
 0x306   :  { %v8999_v11 = vcombine.high %v4551_v25, %v4555_v26  ;;  %v4415_v45 = vld [vmem:[#allocation11 + $0x380] sm:$0xff]  ;;  %v8998_v40 = vcombine.low %v4551_v25, %v4555_v26  ;;  %v9748_v25 = vpop.f32.mrf.mxu0 }
 0x307   :  { %7422 = vmatpush1.bf16.msra.mxu0 %v8790_v57  ;;  %v4419_v21 = vld [vmem:[#allocation11 + $0x3a0] sm:$0xff] }
 0x308   :  { %7465 = vmatpush1.bf16.msra.mxu1 %v8918_v53  ;;  %7423 = vmatprep.subr.bf16.mxu0 %v8783_v50  ;;  %v4543_v36 = vld [vmem:[#allocation11 + $0x780] sm:$0xff]  ;;  %v8863_v55 = vcombine.high %v4415_v45, %v4419_v21  ;;  %v8862_v61 = vcombine.low %v4415_v45, %v4419_v21 }
 0x309   :  { %7466 = vmatprep.subr.bf16.mxu1 %v8911_v58  ;;  %v4547_v20 = vld [vmem:[#allocation11 + $0x7a0] sm:$0xff] }
 0x30a   :  { %v8991_v57 = vcombine.high %v4543_v36, %v4547_v20  ;;  %v4407_v53 = vld [vmem:[#allocation11 + $0x340] sm:$0xff]  ;;  %v8990_v34 = vcombine.low %v4543_v36, %v4547_v20 }
 0x30b   :  { %7424 = vmatpush1.bf16.msra.mxu0 %v8782_v63  ;;  %v4411_v50 = vld [vmem:[#allocation11 + $0x360] sm:$0xff] }
 0x30c   :  { %7467 = vmatpush1.bf16.msra.mxu1 %v8910_v1  ;;  %7425 = vmatprep.subr.bf16.mxu0 %v8775_v24  ;;  %v4535_v58 = vld [vmem:[#allocation11 + $0x740] sm:$0xff]  ;;  %v8855_v14 = vcombine.high %v4407_v53, %v4411_v50  ;;  %v8854_v6 = vcombine.low %v4407_v53, %v4411_v50 }
 0x30d   :  { %7468 = vmatprep.subr.bf16.mxu1 %v8903_v35  ;;  %v4539_v42 = vld [vmem:[#allocation11 + $0x760] sm:$0xff] }
 0x30e   :  { %v8983_v63 = vcombine.high %v4535_v58, %v4539_v42  ;;  %v4399_v1 = vld [vmem:[#allocation11 + $0x300] sm:$0xff]  ;;  %v8982_v22 = vcombine.low %v4535_v58, %v4539_v42 }
 0x30f   :  { %7426 = vmatpush1.bf16.msra.mxu0 %v8774_v54  ;;  %v4403_v24 = vld [vmem:[#allocation11 + $0x320] sm:$0xff] }
 0x310   :  { %7469 = vmatpush1.bf16.msra.mxu1 %v8902_v4  ;;  %7427 = vmatprep.subr.bf16.mxu0 %v8767_v37  ;;  %v4527_v35 = vld [vmem:[#allocation11 + $0x700] sm:$0xff]  ;;  %v8847_v3 = vcombine.high %v4399_v1, %v4403_v24  ;;  %v8846_v43 = vcombine.low %v4399_v1, %v4403_v24 }
 0x311   :  { %7470 = vmatprep.subr.bf16.mxu1 %v8895_v41  ;;  %v4531_v2 = vld [vmem:[#allocation11 + $0x720] sm:$0xff] }
 0x312   :  { %v8975_v54 = vcombine.high %v4527_v35, %v4531_v2  ;;  %v4391_v4 = vld [vmem:[#allocation11 + $0x2c0] sm:$0xff]  ;;  %v8974_v33 = vcombine.low %v4527_v35, %v4531_v2 }
 0x313   :  { %7428 = vmatpush1.bf16.msra.mxu0 %v8766_v7  ;;  %v4395_v37 = vld [vmem:[#allocation11 + $0x2e0] sm:$0xff] }
 0x314   :  { %7471 = vmatpush1.bf16.msra.mxu1 %v8894_v52  ;;  %7429 = vmatprep.subr.bf16.mxu0 %v8759_v8  ;;  %v4519_v41 = vld [vmem:[#allocation11 + $0x6c0] sm:$0xff]  ;;  %v8839_v5 = vcombine.high %v4391_v4, %v4395_v37  ;;  %v8838_v13 = vcombine.low %v4391_v4, %v4395_v37 }
 0x315   :  { %7472 = vmatprep.subr.bf16.mxu1 %v8887_v9  ;;  %v4523_v38 = vld [vmem:[#allocation11 + $0x6e0] sm:$0xff] }
 0x316   :  { %v8967_v7 = vcombine.high %v4519_v41, %v4523_v38  ;;  %v4383_v52 = vld [vmem:[#allocation11 + $0x280] sm:$0xff]  ;;  %v8966_v56 = vcombine.low %v4519_v41, %v4523_v38 }
 0x317   :  { %7430 = vmatpush1.bf16.msra.mxu0 %v8758_v23  ;;  %v4387_v8 = vld [vmem:[#allocation11 + $0x2a0] sm:$0xff] }
 0x318   :  { %7473 = vmatpush1.bf16.msra.mxu1 %v8886_v27  ;;  %7431 = vmatprep.subr.bf16.mxu0 %v8751_v17  ;;  %v4511_v9 = vld [vmem:[#allocation11 + $0x680] sm:$0xff]  ;;  %v8831_v15 = vcombine.high %v4383_v52, %v4387_v8  ;;  %v8830_v31 = vcombine.low %v4383_v52, %v4387_v8 }
 0x319   :  { %7474 = vmatprep.subr.bf16.mxu1 %v8879_v32  ;;  %v4515_v10 = vld [vmem:[#allocation11 + $0x6a0] sm:$0xff] }
 0x31a   :  { %v8959_v23 = vcombine.high %v4511_v9, %v4515_v10  ;;  %v4375_v27 = vld [vmem:[#allocation11 + $0x240] sm:$0xff]  ;;  %v8958_v26 = vcombine.low %v4511_v9, %v4515_v10 }
 0x31b   :  { %7432 = vmatpush1.bf16.msra.mxu0 %v8750_v12  ;;  %v4379_v17 = vld [vmem:[#allocation11 + $0x260] sm:$0xff] }
 0x31c   :  { %7475 = vmatpush1.bf16.msra.mxu1 %v8878_v28  ;;  %7433 = vmatprep.subr.bf16.mxu0 %v8871_v29  ;;  %v4503_v32 = vld [vmem:[#allocation11 + $0x640] sm:$0xff]  ;;  %v8823_v12 = vcombine.high %v4375_v27, %v4379_v17  ;;  %v9750_v28 = vpop.f32.mrf.mxu1  ;;  %v8822_v20 = vcombine.low %v4375_v27, %v4379_v17 }
 0x31d   :  { %7476 = vmatprep.subr.bf16.mxu1 %v8999_v11  ;;  %v4507_v18 = vld [vmem:[#allocation11 + $0x660] sm:$0xff] }
 0x31e   :  { %v8951_v29 = vcombine.high %v4503_v32, %v4507_v18  ;;  %v4367_v11 = vld [vmem:[#allocation11 + $0x200] sm:$0xff] }
 0x31f   :  { %7434 = vmatpush2.bf16.msra.mxu0 %v8870_v44  ;;  %v4371_v45 = vld [vmem:[#allocation11 + $0x220] sm:$0xff]  ;;  %v3971_v44 = vpop.f32.mrf.mxu0 }
 0x320   :  { %7477 = vmatpush2.bf16.msra.mxu1 %v8998_v40  ;;  %7435 = vmatprep.subr.bf16.mxu0 %v8863_v55  ;;  %v4495_v21 = vld [vmem:[#allocation11 + $0x600] sm:$0xff]  ;;  %v8950_v40 = vcombine.low %v4503_v32, %v4507_v18  ;;  %v8815_v55 = vcombine.high %v4367_v11, %v4371_v45 }
 0x321   :  { %7478 = vmatprep.subr.bf16.mxu1 %v8991_v57  ;;  %v4499_v36 = vld [vmem:[#allocation11 + $0x620] sm:$0xff]  ;;  %v4014_v57 = vpop.f32.mrf.mxu1 }
 0x322   :  { %v8943_v53 = vcombine.high %v4495_v21, %v4499_v36  ;;  %v4615_v50 = vld [vmem:[#allocation11 + $0x9c0] sm:$0xff]  ;;  %v8942_v1 = vcombine.low %v4495_v21, %v4499_v36 }
 0x323   :  { %7436 = vmatpush2.bf16.msra.mxu0 %v8862_v61  ;;  %v4619_v58 = vld [vmem:[#allocation11 + $0x9e0] sm:$0xff]  ;;  %v9756_v35 = vpop.f32.mrf.mxu1 }
 0x324   :  { %7479 = vmatpush2.bf16.msra.mxu1 %v8990_v34  ;;  %7437 = vmatprep.subr.bf16.mxu0 %v8855_v14  ;;  %v4743_v42 = vld [vmem:[#allocation11 + $0xdc0] sm:$0xff]  ;;  %v1014_v34 = vrot.slane %v9720_v39, %v9587_v60  ;;  %v8814_v14 = vcombine.low %v4367_v11, %v4371_v45  ;;  %v9063_v24 = vcombine.high %v4615_v50, %v4619_v58 }
 0x325   :  { %7480 = vmatprep.subr.bf16.mxu1 %v8983_v63  ;;  %v4747_v61 = vld [vmem:[#allocation11 + $0xde0] sm:$0xff]  ;;  %v9754_v63 = vpop.f32.mrf.mxu0  ;;  %v9062_v37 = vcombine.low %v4615_v50, %v4619_v58 }
 0x326   :  { %v4607_v2 = vld [vmem:[#allocation11 + $0x980] sm:$0xff]  ;;  %v3972_v4 = vadd.f32 %v3971_v44, %v1014_v34 }
 0x327   :  { %7438 = vmatpush2.bf16.msra.mxu0 %v8854_v6  ;;  %v4611_v6 = vld [vmem:[#allocation11 + $0x9a0] sm:$0xff]  ;;  %v3975_v41 = vpop.f32.mrf.mxu0 }
 0x328   :  { %7481 = vmatpush2.bf16.msra.mxu1 %v8982_v22  ;;  %7439 = vmatprep.subr.bf16.mxu0 %v8847_v3  ;;  %v9191_v22 = vcombine.high %v4743_v42, %v4747_v61  ;;  %v4735_v3 = vld [vmem:[#allocation11 + $0xd80] sm:$0xff]  ;;  %v9055_v38 = vcombine.high %v4607_v2, %v4611_v6 }
 0x329   :  { %7482 = vmatprep.subr.bf16.mxu1 %v8975_v54  ;;  %v4739_v54 = vld [vmem:[#allocation11 + $0xda0] sm:$0xff] }
 0x32a   :  { %v9183_v52 = vcombine.high %v4735_v3, %v4739_v54  ;;  %v4727_v9 = vld [vmem:[#allocation11 + $0xd40] sm:$0xff]  ;;  %v9182_v32 = vcombine.low %v4735_v3, %v4739_v54 }
 0x32b   :  { %7440 = vmatpush2.bf16.msra.mxu0 %v8846_v43  ;;  %v9190_v43 = vcombine.low %v4743_v42, %v4747_v61  ;;  %v4731_v10 = vld [vmem:[#allocation11 + $0xd60] sm:$0xff] }
 0x32c   :  { %7483 = vmatpush2.bf16.msra.mxu1 %v8974_v33  ;;  %7441 = vmatprep.subr.bf16.mxu0 %v8839_v5  ;;  %v4018_v33 = vpop.f32.mrf.mxu1  ;;  %v4599_v5 = vld [vmem:[#allocation11 + $0x940] sm:$0xff] }
 0x32d   :  { %7484 = vmatprep.subr.bf16.mxu1 %v8967_v7  ;;  %v4603_v7 = vld [vmem:[#allocation11 + $0x960] sm:$0xff] }
 0x32e   :  { %v9047_v17 = vcombine.high %v4599_v5, %v4603_v7  ;;  %v4719_v45 = vld [vmem:[#allocation11 + $0xd00] sm:$0xff]  ;;  %v9046_v44 = vcombine.low %v4599_v5, %v4603_v7 }
 0x32f   :  { %7442 = vmatpush2.bf16.msra.mxu0 %v8838_v13  ;;  %v4015_v13 = vadd.f32 %v4014_v57, %v3972_v4  ;;  %v4723_v21 = vld [vmem:[#allocation11 + $0xd20] sm:$0xff]  ;;  %v9174_v57 = vcombine.low %v4727_v9, %v4731_v10 }
 0x330   :  { %7485 = vmatpush2.bf16.msra.mxu1 %v8966_v56  ;;  %7443 = vmatprep.subr.bf16.mxu0 %v8831_v15  ;;  %v3976_v56 = vadd.f32 %v3975_v41, %v1014_v34  ;;  %v4583_v58 = vld [vmem:[#allocation11 + $0x8c0] sm:$0xff]  ;;  %v9167_v61 = vcombine.high %v4719_v45, %v4723_v21 }
 0x331   :  { %7486 = vmatprep.subr.bf16.mxu1 %v8959_v23  ;;  %v9054_v23 = vcombine.low %v4607_v2, %v4611_v6  ;;  %v4587_v42 = vld [vmem:[#allocation11 + $0x8e0] sm:$0xff] }
 0x332   :  { %v4019_v36 = vadd.f32 %v4018_v33, %v3976_v56  ;;  %v9031_v6 = vcombine.high %v4583_v58, %v4587_v42  ;;  %v4575_v4 = vld [vmem:[#allocation11 + $0x880] sm:$0xff]  ;;  %v9030_v5 = vcombine.low %v4583_v58, %v4587_v42 }
 0x333   :  { %7444 = vmatpush2.bf16.msra.mxu0 %v8830_v31  ;;  %v4571_v56 = vld [vmem:[#allocation11 + $0x860] sm:$0xff] }
 0x334   :  { %7487 = vmatpush2.bf16.msra.mxu1 %v8958_v26  ;;  %7445 = vmatprep.subr.bf16.mxu0 %v8823_v12  ;;  %v4591_v26 = vld [vmem:[#allocation11 + $0x900] sm:$0xff] }
 0x335   :  { %7488 = vmatprep.subr.bf16.mxu1 %v8951_v29  ;;  %v4595_v12 = vld [vmem:[#allocation11 + $0x920] sm:$0xff]  ;;  %v9175_v29 = vcombine.high %v4727_v9, %v4731_v10  ;;  %v9770_v9 = vld [vmem:[#allocation11 + $0x5c8] sm:$0xff] }
 0x336   :  { %v9038_v2 = vcombine.low %v4591_v26, %v4595_v12  ;;  %v9772_v10 = vld [vmem:[#allocation11 + $0x5e8] sm:$0xff]  ;;  %v4807_v58 = vld [vmem:[#allocation11 + $0xfc0] sm:$0xff] }
 0x337   :  { %7446 = vmatpush2.bf16.msra.mxu0 %v8822_v20  ;;  %v4811_v42 = vld [vmem:[#allocation11 + $0xfe0] sm:$0xff] }
 0x338   :  { %7489 = vmatpush2.bf16.msra.mxu1 %v8950_v40  ;;  %7447 = vmatprep.subr.bf16.mxu0 %v8815_v55  ;;  %v9039_v55 = vcombine.high %v4591_v26, %v4595_v12  ;;  %v4559_v12 = vld [vmem:[#allocation11 + $0x800] sm:$0xff] }
 0x339   :  { %7490 = vmatprep.subr.bf16.mxu1 %v8943_v53 }
 0x33b   :  { %7448 = vmatpush2.bf16.msra.mxu0 %v8814_v14  ;;  %v4711_v14 = vld [vmem:[#allocation11 + $0xcc0] sm:$0xff] }
 0x33c   :  { %7491 = vmatpush2.bf16.msra.mxu1 %v8942_v1  ;;  %7503 = vmatprep.subr.bf16.mxu0 %v9063_v24  ;;  %v4715_v1 = vld [vmem:[#allocation11 + $0xce0] sm:$0xff] }
 0x33d   :  { %7546 = vmatprep.subr.bf16.mxu1 %v9191_v22  ;;  %v9166_v22 = vcombine.low %v4719_v45, %v4723_v21  ;;  %v9159_v41 = vcombine.high %v4711_v14, %v4715_v1  ;;  %v4687_v21 = vld [vmem:[#allocation11 + $0xc00] sm:$0xff] }
 0x33e   :  { %v9758_v8 = vpop.f32.mrf.mxu0  ;;  %7450 = vmatmul.mubr.bf16.vlgmr.msra.gmra.mxu0 %v9684_v46 }
 0x33f   :  { %v9761_v15 = vpop.f32.mrf.mxu1  ;;  %7493 = vmatmul.mubr.bf16.vlgmr.msra.gmra.mxu1 %v9718_v16  ;;  %7504 = vmatpush1.bf16.msra.mxu0 %v9062_v37  ;;  %v4579_v37 = vld [vmem:[#allocation11 + $0x8a0] sm:$0xff] }
 0x340   :  { %v4057_v27 = vpop.f32.mrf.mxu0  ;;  %7505 = vmatprep.subr.bf16.mxu0 %v9055_v38  ;;  %7547 = vmatpush1.bf16.msra.mxu1 %v9190_v43  ;;  %v4703_v38 = vld [vmem:[#allocation11 + $0xc80] sm:$0xff]  ;;  %v9023_v7 = vcombine.high %v4575_v4, %v4579_v37 }
 0x341   :  { %v4058_v18 = vadd.f32 %v4057_v27, %v4015_v13  ;;  %v4100_v31 = vpop.f32.mrf.mxu1  ;;  %7548 = vmatprep.subr.bf16.mxu1 %v9183_v52  ;;  %v4707_v43 = vld [vmem:[#allocation11 + $0xca0] sm:$0xff]  ;;  %v9158_v52 = vcombine.low %v4711_v14, %v4715_v1  ;;  %v8936_v27 = vcombine.low %v9770_v9, %v9772_v10 }
 0x342   :  { %v9764_v11 = vpop.f32.mrf.mxu0  ;;  %v4567_v13 = vld [vmem:[#allocation11 + $0x840] sm:$0xff]  ;;  %v9150_v26 = vcombine.low %v4703_v38, %v4707_v43 }
 0x343   :  { %v9766_v20 = vpop.f32.mrf.mxu1  ;;  %7506 = vmatpush1.bf16.msra.mxu0 %v9054_v23  ;;  %v4101_v53 = vadd.f32 %v4100_v31, %v4058_v18  ;;  %v9151_v23 = vcombine.high %v4703_v38, %v4707_v43  ;;  %v9022_v18 = vcombine.low %v4575_v4, %v4579_v37  ;;  %v9015_v31 = vcombine.high %v4567_v13, %v4571_v56  ;;  %v4671_v1 = vld [vmem:[#allocation11 + $0xb80] sm:$0xff] }
 0x344   :  { %v4061_v40 = vpop.f32.mrf.mxu0  ;;  %7507 = vmatprep.subr.bf16.mxu0 %v9047_v17  ;;  %7549 = vmatpush1.bf16.msra.mxu1 %v9182_v32  ;;  %v4695_v17 = vld [vmem:[#allocation11 + $0xc40] sm:$0xff]  ;;  %v9254_v4 = vcombine.low %v4807_v58, %v4811_v42 }
 0x345   :  { %v4062_v50 = vadd.f32 %v4061_v40, %v4019_v36  ;;  %7550 = vmatprep.subr.bf16.mxu1 %v9175_v29  ;;  %v4104_v34 = vpop.f32.mrf.mxu1  ;;  %v4284_v3 = vmax.f32 %v4101_v53, 0.0  ;;  %v4699_v32 = vld [vmem:[#allocation11 + $0xc60] sm:$0xff] }
 0x346   :  { %v4563_v29 = vld [vmem:[#allocation11 + $0x820] sm:$0xff]  ;;  %v9143_v45 = vcombine.high %v4695_v17, %v4699_v32 }
 0x347   :  { %v4105_v24 = vadd.f32 %v4104_v34, %v4062_v50  ;;  %7508 = vmatpush1.bf16.msra.mxu0 %v9046_v44  ;;  %v4691_v36 = vld [vmem:[#allocation11 + $0xc20] sm:$0xff]  ;;  %v9014_v44 = vcombine.low %v4567_v13, %v4571_v56  ;;  %v9007_v40 = vcombine.high %v4559_v12, %v4563_v29 }
 0x348   :  { %7509 = vmatprep.subr.bf16.mxu0 %v9039_v55  ;;  %7551 = vmatpush1.bf16.msra.mxu1 %v9174_v57  ;;  %v9142_v55 = vcombine.low %v4695_v17, %v4699_v32  ;;  %v4679_v57 = vld [vmem:[#allocation11 + $0xbc0] sm:$0xff]  ;;  %v9135_v50 = vcombine.high %v4687_v21, %v4691_v36  ;;  %v9134_v14 = vcombine.low %v4687_v21, %v4691_v36 }
 0x349   :  { %v4292_v54 = vmax.f32 %v4105_v24, 0.0  ;;  %7552 = vmatprep.subr.bf16.mxu1 %v9167_v61  ;;  %v4683_v53 = vld [vmem:[#allocation11 + $0xbe0] sm:$0xff]  ;;  %v9006_v61 = vcombine.low %v4559_v12, %v4563_v29 }
 0x34a   :  { %v9127_v34 = vcombine.high %v4679_v57, %v4683_v53  ;;  %v4675_v24 = vld [vmem:[#allocation11 + $0xba0] sm:$0xff] }
 0x34b   :  { %v9768_v33 = vpack.c.bf16 %v4292_v54, %v4284_v3  ;;  %7510 = vmatpush1.bf16.msra.mxu0 %v9038_v2  ;;  %v9255_v2 = vcombine.high %v4807_v58, %v4811_v42  ;;  %v9126_v3 = vcombine.low %v4679_v57, %v4683_v53  ;;  %v9119_v54 = vcombine.high %v4671_v1, %v4675_v24  ;;  %v4663_v37 = vld [vmem:[#allocation11 + $0xb40] sm:$0xff] }
 0x34c   :  { %7511 = vmatprep.subr.bf16.mxu0 %v9031_v6  ;;  %7553 = vmatpush1.bf16.msra.mxu1 %v9166_v22  ;;  %v4799_v6 = vld [vmem:[#allocation11 + $0xf80] sm:$0xff] }
 0x34d   :  { %7535 = vmatprep.mubr.bf16.mxu0 %v9768_v33  ;;  %7554 = vmatprep.subr.bf16.mxu1 %v9159_v41  ;;  %v4803_v22 = vld [vmem:[#allocation11 + $0xfa0] sm:$0xff] }
 0x34e   :  { %v4667_v41 = vld [vmem:[#allocation11 + $0xb60] sm:$0xff]  ;;  %v9247_v38 = vcombine.high %v4799_v6, %v4803_v22  ;;  %v9246_v13 = vcombine.low %v4799_v6, %v4803_v22 }
 0x34f   :  { %7512 = vmatpush1.bf16.msra.mxu0 %v9030_v5  ;;  %v4791_v43 = vld [vmem:[#allocation11 + $0xf40] sm:$0xff] }
 0x350   :  { %7513 = vmatprep.subr.bf16.mxu0 %v9023_v7  ;;  %7555 = vmatpush1.bf16.msra.mxu1 %v9158_v52  ;;  %v4795_v5 = vld [vmem:[#allocation11 + $0xf60] sm:$0xff]  ;;  %v9118_v7 = vcombine.low %v4671_v1, %v4675_v24  ;;  %v9111_v52 = vcombine.high %v4663_v37, %v4667_v41 }
 0x351   :  { %7556 = vmatprep.subr.bf16.mxu1 %v9151_v23  ;;  %v4655_v56 = vld [vmem:[#allocation11 + $0xb00] sm:$0xff]  ;;  %v9239_v17 = vcombine.high %v4791_v43, %v4795_v5  ;;  %v9238_v12 = vcombine.low %v4791_v43, %v4795_v5 }
 0x352   :  { %v4659_v23 = vld [vmem:[#allocation11 + $0xb20] sm:$0xff] }
 0x353   :  { %7514 = vmatpush1.bf16.msra.mxu0 %v9022_v18  ;;  %v4783_v32 = vld [vmem:[#allocation11 + $0xf00] sm:$0xff] }
 0x354   :  { %7515 = vmatprep.subr.bf16.mxu0 %v9015_v31  ;;  %7557 = vmatpush1.bf16.msra.mxu1 %v9150_v26  ;;  %v4787_v18 = vld [vmem:[#allocation11 + $0xf20] sm:$0xff]  ;;  %v9110_v31 = vcombine.low %v4663_v37, %v4667_v41  ;;  %v9103_v26 = vcombine.high %v4655_v56, %v4659_v23 }
 0x355   :  { %7558 = vmatprep.subr.bf16.mxu1 %v9143_v45  ;;  %v4647_v29 = vld [vmem:[#allocation11 + $0xac0] sm:$0xff]  ;;  %v9231_v21 = vcombine.high %v4783_v32, %v4787_v18  ;;  %v9230_v53 = vcombine.low %v4783_v32, %v4787_v18  ;;  %v4364_v18 = vld [vmem:[#allocation11 + $0x1e8] sm:$0xff] }
 0x356   :  { %v4651_v45 = vld [vmem:[#allocation11 + $0xae0] sm:$0xff] }
 0x357   :  { %7516 = vmatpush1.bf16.msra.mxu0 %v9014_v44  ;;  %v4775_v36 = vld [vmem:[#allocation11 + $0xec0] sm:$0xff]  ;;  %v9095_v57 = vcombine.high %v4647_v29, %v4651_v45  ;;  %v9094_v1 = vcombine.low %v4647_v29, %v4651_v45 }
 0x358   :  { %7517 = vmatprep.subr.bf16.mxu0 %v9007_v40  ;;  %7559 = vmatpush1.bf16.msra.mxu1 %v9142_v55  ;;  %v4779_v44 = vld [vmem:[#allocation11 + $0xee0] sm:$0xff]  ;;  %v9102_v40 = vcombine.low %v4655_v56, %v4659_v23  ;;  %v1010_v55 = vrot.slane %v9720_v39, %v9629_v59 }
 0x359   :  { %7560 = vmatprep.subr.bf16.mxu1 %v9135_v50  ;;  %v4639_v50 = vld [vmem:[#allocation11 + $0xa80] sm:$0xff]  ;;  %v9223_v42 = vcombine.high %v4775_v36, %v4779_v44  ;;  %v9222_v22 = vcombine.low %v4775_v36, %v4779_v44  ;;  %v4356_v36 = vld [vmem:[#allocation11 + $0x1a8] sm:$0xff] }
 0x35a   :  { %v4643_v58 = vld [vmem:[#allocation11 + $0xaa0] sm:$0xff]  ;;  %v3970_v24 = vadd.f32 %v9748_v25, %v1010_v55 }
 0x35b   :  { %7518 = vmatpush1.bf16.msra.mxu0 %v9006_v61  ;;  %v3974_v61 = vadd.f32 %v9754_v63, %v1010_v55  ;;  %v4631_v6 = vld [vmem:[#allocation11 + $0xa40] sm:$0xff]  ;;  %v9086_v63 = vcombine.low %v4639_v50, %v4643_v58 }
 0x35c   :  { %7519 = vmatprep.subr.bf16.mxu0 %v9127_v34  ;;  %7561 = vmatpush1.bf16.msra.mxu1 %v9134_v14  ;;  %v4767_v34 = vld [vmem:[#allocation11 + $0xe80] sm:$0xff] }
 0x35d   :  { %7562 = vmatprep.subr.bf16.mxu1 %v9255_v2  ;;  %v4771_v14 = vld [vmem:[#allocation11 + $0xea0] sm:$0xff]  ;;  %v9087_v2 = vcombine.high %v4639_v50, %v4643_v58 }
 0x35e   :  { %v4635_v39 = vld [vmem:[#allocation11 + $0xa60] sm:$0xff]  ;;  %v9214_v25 = vcombine.low %v4767_v34, %v4771_v14 }
 0x35f   :  { %7520 = vmatpush2.bf16.msra.mxu0 %v9126_v3  ;;  %v9215_v3 = vcombine.high %v4767_v34, %v4771_v14  ;;  %v4763_v37 = vld [vmem:[#allocation11 + $0xe60] sm:$0xff]  ;;  %v9079_v41 = vcombine.high %v4631_v6, %v4635_v39  ;;  %v9078_v23 = vcombine.low %v4631_v6, %v4635_v39  ;;  %v4320_v39 = vld [vmem:[#allocation11 + $0x88] sm:$0xff] }
 0x360   :  { %7521 = vmatprep.subr.bf16.mxu0 %v9119_v54  ;;  %7563 = vmatpush2.bf16.msra.mxu1 %v9254_v4  ;;  %v4017_v54 = vadd.f32 %v9756_v35, %v3974_v61  ;;  %v4759_v4 = vld [vmem:[#allocation11 + $0xe40] sm:$0xff]  ;;  %v4340_v61 = vld [vmem:[#allocation11 + $0x128] sm:$0xff] }
 0x361   :  { %7564 = vmatprep.subr.bf16.mxu1 %v9247_v38  ;;  %v4013_v38 = vadd.f32 %v9750_v28, %v3970_v24  ;;  %v4623_v5 = vld [vmem:[#allocation11 + $0xa00] sm:$0xff]  ;;  %v9206_v28 = vcombine.low %v4759_v4, %v4763_v37  ;;  %v4332_v24 = vld [vmem:[#allocation11 + $0xe8] sm:$0xff] }
 0x362   :  { %v4060_v43 = vadd.f32 %v9764_v11, %v4017_v54  ;;  %v4751_v56 = vld [vmem:[#allocation11 + $0xe00] sm:$0xff]  ;;  %v4360_v11 = vld [vmem:[#allocation11 + $0x1c8] sm:$0xff] }
 0x363   :  { %7522 = vmatpush2.bf16.msra.mxu0 %v9118_v7  ;;  %v4627_v7 = vld [vmem:[#allocation11 + $0xa20] sm:$0xff] }
 0x364   :  { %7523 = vmatprep.subr.bf16.mxu0 %v9111_v52  ;;  %7565 = vmatpush2.bf16.msra.mxu1 %v9246_v13  ;;  %v9207_v52 = vcombine.high %v4759_v4, %v4763_v37  ;;  %v4056_v13 = vadd.f32 %v9758_v8, %v4013_v38  ;;  %v4755_v35 = vld [vmem:[#allocation11 + $0xe20] sm:$0xff]  ;;  %v9071_v32 = vcombine.high %v4623_v5, %v4627_v7  ;;  %v4312_v4 = vld [vmem:[#allocation11 + $0x48] sm:$0xff] }
 0x365   :  { %7566 = vmatprep.subr.bf16.mxu1 %v9239_v17  ;;  %v4103_v17 = vadd.f32 %v9766_v20, %v4060_v43  ;;  %v8809_v8 = vcombine.high %v4360_v11, %v4364_v18  ;;  %v9198_v45 = vcombine.low %v4751_v56, %v4755_v35  ;;  %v8937_v20 = vcombine.high %v9770_v9, %v9772_v10  ;;  %v4316_v37 = vld [vmem:[#allocation11 + $0x68] sm:$0xff] }
 0x366   :  { %v4304_v38 = vld [vmem:[#allocation11 + $0x8] sm:$0xff] }
 0x367   :  { %7524 = vmatpush2.bf16.msra.mxu0 %v9110_v31  ;;  %v9199_v31 = vcombine.high %v4751_v56, %v4755_v35  ;;  %v4291_v29 = vmax.f32 %v4103_v17, 0.0  ;;  %v4308_v43 = vld [vmem:[#allocation11 + $0x28] sm:$0xff] }
 0x368   :  { %7525 = vmatprep.subr.bf16.mxu0 %v9103_v26  ;;  %7567 = vmatpush2.bf16.msra.mxu1 %v9238_v12  ;;  %v4099_v26 = vadd.f32 %v9761_v15, %v4056_v13  ;;  %v9070_v12 = vcombine.low %v4623_v5, %v4627_v7  ;;  %v8753_v5 = vcombine.high %v4304_v38, %v4308_v43  ;;  %v4424_v7 = vld [vmem:[#allocation11 + $0x3c8] sm:$0xff] }
 0x369   :  { %7568 = vmatprep.subr.bf16.mxu1 %v9231_v21  ;;  %v4352_v21 = vld [vmem:[#allocation11 + $0x188] sm:$0xff]  ;;  %v8752_v13 = vcombine.low %v4304_v38, %v4308_v43 }
 0x36a   :  { %v4283_v44 = vmax.f32 %v4099_v26, 0.0  ;;  %v8801_v15 = vcombine.high %v4352_v21, %v4356_v36  ;;  %v8800_v50 = vcombine.low %v4352_v21, %v4356_v36  ;;  %v4416_v35 = vld [vmem:[#allocation11 + $0x388] sm:$0xff] }
 0x36b   :  { %7526 = vmatpush2.bf16.msra.mxu0 %v9102_v40  ;;  %v8808_v40 = vcombine.low %v4360_v11, %v4364_v18  ;;  %v4412_v11 = vld [vmem:[#allocation11 + $0x368] sm:$0xff] }
 0x36c   :  { %7527 = vmatprep.subr.bf16.mxu0 %v9095_v57  ;;  %7569 = vmatpush2.bf16.msra.mxu1 %v9230_v53  ;;  %v9789_v55 = vpack.c.bf16 %v4291_v29, %v4283_v44  ;;  %v4344_v57 = vld [vmem:[#allocation11 + $0x148] sm:$0xff] }
 0x36d   :  { %7570 = vmatprep.subr.bf16.mxu1 %v9223_v42  ;;  %v4348_v53 = vld [vmem:[#allocation11 + $0x168] sm:$0xff] }
 0x36e   :  { %v8793_v58 = vcombine.high %v4344_v57, %v4348_v53  ;;  %v4336_v42 = vld [vmem:[#allocation11 + $0x108] sm:$0xff]  ;;  %v8792_v34 = vcombine.low %v4344_v57, %v4348_v53 }
 0x36f   :  { %7528 = vmatpush2.bf16.msra.mxu0 %v9094_v1  ;;  %v8785_v14 = vcombine.high %v4336_v42, %v4340_v61  ;;  %v4328_v1 = vld [vmem:[#allocation11 + $0xc8] sm:$0xff] }
 0x370   :  { %7529 = vmatprep.subr.bf16.mxu0 %v9087_v2  ;;  %7571 = vmatpush2.bf16.msra.mxu1 %v9222_v22  ;;  %v8784_v2 = vcombine.low %v4336_v42, %v4340_v61  ;;  %v8777_v6 = vcombine.high %v4328_v1, %v4332_v24  ;;  %v4324_v22 = vld [vmem:[#allocation11 + $0xa8] sm:$0xff] }
 0x371   :  { %7572 = vmatprep.subr.bf16.mxu1 %v9215_v3  ;;  %v8776_v3 = vcombine.low %v4328_v1, %v4332_v24  ;;  %v8769_v54 = vcombine.high %v4320_v39, %v4324_v22  ;;  %v4400_v26 = vld [vmem:[#allocation11 + $0x308] sm:$0xff] }
 0x372   :  { %v4396_v21 = vld [vmem:[#allocation11 + $0x2e8] sm:$0xff] }
 0x373   :  { %7530 = vmatpush2.bf16.msra.mxu0 %v9086_v63  ;;  %v8768_v63 = vcombine.low %v4320_v39, %v4324_v22  ;;  %v4384_v44 = vld [vmem:[#allocation11 + $0x288] sm:$0xff] }
 0x374   :  { %7531 = vmatprep.subr.bf16.mxu0 %v9079_v41  ;;  %7573 = vmatpush2.bf16.msra.mxu1 %v9214_v25  ;;  %v8761_v41 = vcombine.high %v4312_v4, %v4316_v37  ;;  %v8760_v25 = vcombine.low %v4312_v4, %v4316_v37  ;;  %v4376_v53 = vld [vmem:[#allocation11 + $0x248] sm:$0xff] }
 0x375   :  { %7574 = vmatprep.subr.bf16.mxu1 %v9207_v52  ;;  %v4428_v52 = vld [vmem:[#allocation11 + $0x3e8] sm:$0xff] }
 0x376   :  { %v8873_v56 = vcombine.high %v4424_v7, %v4428_v52  ;;  %v8872_v17 = vcombine.low %v4424_v7, %v4428_v52  ;;  %v4372_v1 = vld [vmem:[#allocation11 + $0x228] sm:$0xff] }
 0x377   :  { %7532 = vmatpush2.bf16.msra.mxu0 %v9078_v23  ;;  %v4420_v23 = vld [vmem:[#allocation11 + $0x3a8] sm:$0xff] }
 0x378   :  { %7533 = vmatprep.subr.bf16.mxu0 %v9071_v32  ;;  %7575 = vmatpush2.bf16.msra.mxu1 %v9206_v28  ;;  %v8865_v32 = vcombine.high %v4416_v35, %v4420_v23  ;;  %v4408_v28 = vld [vmem:[#allocation11 + $0x348] sm:$0xff]  ;;  %v8864_v18 = vcombine.low %v4416_v35, %v4420_v23 }
 0x379   :  { %7576 = vmatprep.subr.bf16.mxu1 %v9199_v31  ;;  %v8857_v31 = vcombine.high %v4408_v28, %v4412_v11  ;;  %v8856_v29 = vcombine.low %v4408_v28, %v4412_v11  ;;  %v4616_v22 = vld [vmem:[#allocation11 + $0x9c8] sm:$0xff] }
 0x37a   :  { %v4604_v28 = vld [vmem:[#allocation11 + $0x968] sm:$0xff] }
 0x37b   :  { %7534 = vmatpush2.bf16.msra.mxu0 %v9070_v12  ;;  %v4404_v12 = vld [vmem:[#allocation11 + $0x328] sm:$0xff] }
 0x37c   :  { %7589 = vmatprep.subr.bf16.mxu0 %v8809_v8  ;;  %7577 = vmatpush2.bf16.msra.mxu1 %v9198_v45  ;;  %v8849_v8 = vcombine.high %v4400_v26, %v4404_v12  ;;  %v4392_v45 = vld [vmem:[#allocation11 + $0x2c8] sm:$0xff]  ;;  %v8848_v36 = vcombine.low %v4400_v26, %v4404_v12 }
 0x37d   :  { %7632 = vmatprep.subr.bf16.mxu1 %v8937_v20  ;;  %v8841_v20 = vcombine.high %v4392_v45, %v4396_v21 }
 0x37e   :  { %7536 = vmatmul.mubr.bf16.vlgmr.msra.gmra.mxu0 %v9789_v55  ;;  %v4141_v42 = vpop.f32.mrf.mxu0 }
 0x37f   :  { %7590 = vmatpush1.bf16.msra.mxu0 %v8808_v40  ;;  %7621 = vmatprep.mubr.bf16.mxu0 %v9740_v30  ;;  %v4388_v40 = vld [vmem:[#allocation11 + $0x2a8] sm:$0xff] }
 0x380   :  { %7591 = vmatprep.subr.bf16.mxu0 %v8801_v15  ;;  %v8840_v15 = vcombine.low %v4392_v45, %v4396_v21  ;;  %v8833_v57 = vcombine.high %v4384_v44, %v4388_v40 }
 0x383   :  { %7592 = vmatpush1.bf16.msra.mxu0 %v8800_v50  ;;  %v4380_v50 = vld [vmem:[#allocation11 + $0x268] sm:$0xff] }
 0x384   :  { %7593 = vmatprep.subr.bf16.mxu0 %v8793_v58  ;;  %v8832_v58 = vcombine.low %v4384_v44, %v4388_v40  ;;  %v8825_v61 = vcombine.high %v4376_v53, %v4380_v50  ;;  %v8824_v24 = vcombine.low %v4376_v53, %v4380_v50  ;;  %v4592_v44 = vld [vmem:[#allocation11 + $0x908] sm:$0xff] }
 0x385   :  { %v4596_v40 = vld [vmem:[#allocation11 + $0x928] sm:$0xff] }
 0x387   :  { %7594 = vmatpush1.bf16.msra.mxu0 %v8792_v34  ;;  %v4184_v34 = vpop.f32.mrf.mxu1 }
 0x388   :  { %7595 = vmatprep.subr.bf16.mxu0 %v8785_v14  ;;  %v4368_v14 = vld [vmem:[#allocation11 + $0x208] sm:$0xff] }
 0x389   :  { %v4186_v39 = vpop.f32.mrf.mxu1  ;;  %v8816_v37 = vcombine.low %v4368_v14, %v4372_v1 }
 0x38b   :  { %7596 = vmatpush1.bf16.msra.mxu0 %v8784_v2  ;;  %v4143_v2 = vpop.f32.mrf.mxu0  ;;  %v4188_v43 = vpop.f32.mrf.mxu1 }
 0x38c   :  { %7597 = vmatprep.subr.bf16.mxu0 %v8777_v6  ;;  %v8817_v6 = vcombine.high %v4368_v14, %v4372_v1  ;;  %v9041_v14 = vcombine.high %v4592_v44, %v4596_v40 }
 0x38f   :  { %7598 = vmatpush1.bf16.msra.mxu0 %v8776_v3  ;;  %v4620_v3 = vld [vmem:[#allocation11 + $0x9e8] sm:$0xff] }
 0x390   :  { %7599 = vmatprep.subr.bf16.mxu0 %v8769_v54  ;;  %v9277_v54 = vld [vmem:[#allocation10] sm:$0xff]  ;;  %v9065_v38 = vcombine.high %v4616_v22, %v4620_v3  ;;  %v9064_v52 = vcombine.low %v4616_v22, %v4620_v3 }
 0x391   :  { %v1022_v4 = vrot.slane %v9277_v54, %v9590_v62 }
 0x393   :  { %7600 = vmatpush1.bf16.msra.mxu0 %v8768_v63  ;;  %v1018_v63 = vrot.slane %v9277_v54, %v9632_v0  ;;  %v4144_v7 = vadd.f32 %v4143_v2, %v1022_v4  ;;  %v4584_v2 = vld [vmem:[#allocation11 + $0x8c8] sm:$0xff]  ;;  %v9040_v54 = vcombine.low %v4592_v44, %v4596_v40 }
 0x394   :  { %7601 = vmatprep.subr.bf16.mxu0 %v8761_v41  ;;  %v4145_v41 = vpop.f32.mrf.mxu0  ;;  %v4460_v44 = vld [vmem:[#allocation11 + $0x4e8] sm:$0xff] }
 0x395   :  { %v4146_v23 = vadd.f32 %v4145_v41, %v1018_v63  ;;  %v4680_v40 = vld [vmem:[#allocation11 + $0xbc8] sm:$0xff] }
 0x397   :  { %7602 = vmatpush1.bf16.msra.mxu0 %v8760_v25  ;;  %v4608_v25 = vld [vmem:[#allocation11 + $0x988] sm:$0xff]  ;;  %v4189_v21 = vadd.f32 %v4188_v43, %v4146_v23 }
 0x398   :  { %7603 = vmatprep.subr.bf16.mxu0 %v8753_v5  ;;  %v4612_v5 = vld [vmem:[#allocation11 + $0x9a8] sm:$0xff] }
 0x399   :  { %v9057_v35 = vcombine.high %v4608_v25, %v4612_v5  ;;  %v9056_v12 = vcombine.low %v4608_v25, %v4612_v5  ;;  %v4484_v43 = vld [vmem:[#allocation11 + $0x5a8] sm:$0xff] }
 0x39a   :  { %v4576_v5 = vld [vmem:[#allocation11 + $0x888] sm:$0xff] }
 0x39b   :  { %7604 = vmatpush1.bf16.msra.mxu0 %v8752_v13  ;;  %v4142_v13 = vadd.f32 %v4141_v42, %v1018_v63 }
 0x39c   :  { %7605 = vmatprep.subr.bf16.mxu0 %v8873_v56  ;;  %v4147_v56 = vpop.f32.mrf.mxu0 }
 0x39f   :  { %7606 = vmatpush2.bf16.msra.mxu0 %v8872_v17  ;;  %v4190_v17 = vpop.f32.mrf.mxu1 }
 0x3a0   :  { %7607 = vmatprep.subr.bf16.mxu0 %v8865_v32  ;;  %v4600_v32 = vld [vmem:[#allocation11 + $0x948] sm:$0xff] }
 0x3a1   :  { %v9049_v45 = vcombine.high %v4600_v32, %v4604_v28  ;;  %v9048_v42 = vcombine.low %v4600_v32, %v4604_v28  ;;  %v4476_v32 = vld [vmem:[#allocation11 + $0x568] sm:$0xff] }
 0x3a2   :  { %v4568_v28 = vld [vmem:[#allocation11 + $0x848] sm:$0xff] }
 0x3a3   :  { %7608 = vmatpush2.bf16.msra.mxu0 %v8864_v18  ;;  %v4187_v18 = vadd.f32 %v4186_v39, %v4144_v7  ;;  %v4580_v7 = vld [vmem:[#allocation11 + $0x8a8] sm:$0xff] }
 0x3a4   :  { %7609 = vmatprep.subr.bf16.mxu0 %v8857_v31  ;;  %v4148_v31 = vadd.f32 %v4147_v56, %v1022_v4  ;;  %v9025_v23 = vcombine.high %v4576_v5, %v4580_v7 }
 0x3a6   :  { %v4191_v53 = vadd.f32 %v4190_v17, %v4148_v31  ;;  %v4472_v17 = vld [vmem:[#allocation11 + $0x548] sm:$0xff]  ;;  %v9024_v31 = vcombine.low %v4576_v5, %v4580_v7 }
 0x3a7   :  { %7610 = vmatpush2.bf16.msra.mxu0 %v8856_v29  ;;  %v4185_v29 = vadd.f32 %v4184_v34, %v4142_v13  ;;  %v4660_v5 = vld [vmem:[#allocation11 + $0xb28] sm:$0xff] }
 0x3a8   :  { %7611 = vmatprep.subr.bf16.mxu0 %v8849_v8 }
 0x3ab   :  { %7612 = vmatpush2.bf16.msra.mxu0 %v8848_v36 }
 0x3ac   :  { %7613 = vmatprep.subr.bf16.mxu0 %v8841_v20 }
 0x3af   :  { %7614 = vmatpush2.bf16.msra.mxu0 %v8840_v15 }
 0x3b0   :  { %7615 = vmatprep.subr.bf16.mxu0 %v8833_v57 }
 0x3b3   :  { %7616 = vmatpush2.bf16.msra.mxu0 %v8832_v58 }
 0x3b4   :  { %7617 = vmatprep.subr.bf16.mxu0 %v8825_v61 }
 0x3b7   :  { %7618 = vmatpush2.bf16.msra.mxu0 %v8824_v24 }
 0x3b8   :  { %7619 = vmatprep.subr.bf16.mxu0 %v8817_v6  ;;  %v4588_v6 = vld [vmem:[#allocation11 + $0x8e8] sm:$0xff] }
 0x3b9   :  { %v9032_v56 = vcombine.low %v4584_v2, %v4588_v6 }
 0x3bb   :  { %7620 = vmatpush2.bf16.msra.mxu0 %v8816_v37  ;;  %v9033_v37 = vcombine.high %v4584_v2, %v4588_v6 }
 0x3bc   :  { %7675 = vmatprep.subr.bf16.mxu0 %v9065_v38  ;;  %v4480_v38 = vld [vmem:[#allocation11 + $0x588] sm:$0xff] }
 0x3be   :  { %v4227_v11 = vpop.f32.mrf.mxu0  ;;  %7622 = vmatmul.mubr.bf16.vlgmr.msra.gmra.mxu0 %v9684_v46 }
 0x3bf   :  { %v4270_v26 = vpop.f32.mrf.mxu1  ;;  %7676 = vmatpush1.bf16.msra.mxu0 %v9064_v52  ;;  %7707 = vmatprep.mubr.bf16.mxu0 %v9768_v33  ;;  %v4228_v15 = vadd.f32 %v4227_v11, %v4185_v29  ;;  %v4572_v11 = vld [vmem:[#allocation11 + $0x868] sm:$0xff] }
 0x3c0   :  { %v4229_v8 = vpop.f32.mrf.mxu0  ;;  %7677 = vmatprep.subr.bf16.mxu0 %v9057_v35  ;;  %v8929_v35 = vcombine.high %v4480_v38, %v4484_v43  ;;  %v4464_v29 = vld [vmem:[#allocation11 + $0x508] sm:$0xff] }
 0x3c1   :  { %v4230_v36 = vadd.f32 %v4229_v8, %v4187_v18  ;;  %v4272_v20 = vpop.f32.mrf.mxu1  ;;  %v4271_v39 = vadd.f32 %v4270_v26, %v4228_v15  ;;  %v8928_v18 = vcombine.low %v4480_v38, %v4484_v43  ;;  %v8921_v26 = vcombine.high %v4472_v17, %v4476_v32  ;;  %v4468_v8 = vld [vmem:[#allocation11 + $0x528] sm:$0xff] }
 0x3c2   :  { %v4231_v57 = vpop.f32.mrf.mxu0  ;;  %v8913_v9 = vcombine.high %v4464_v29, %v4468_v8  ;;  %v4684_v15 = vld [vmem:[#allocation11 + $0xbe8] sm:$0xff] }
 0x3c3   :  { %v4232_v50 = vadd.f32 %v4231_v57, %v4189_v21  ;;  %v4274_v58 = vpop.f32.mrf.mxu1  ;;  %7678 = vmatpush1.bf16.msra.mxu0 %v9056_v12  ;;  %v4273_v1 = vadd.f32 %v4272_v20, %v4230_v36  ;;  %v4285_v25 = vmax.f32 %v4271_v39, 0.0  ;;  %v9017_v12 = vcombine.high %v4568_v28, %v4572_v11  ;;  %v4564_v21 = vld [vmem:[#allocation11 + $0x828] sm:$0xff] }
 0x3c4   :  { %v4233_v61 = vpop.f32.mrf.mxu0  ;;  %7679 = vmatprep.subr.bf16.mxu0 %v9049_v45  ;;  %v4560_v45 = vld [vmem:[#allocation11 + $0x808] sm:$0xff]  ;;  %v8920_v36 = vcombine.low %v4472_v17, %v4476_v32  ;;  %v9016_v20 = vcombine.low %v4568_v28, %v4572_v11  ;;  %v8912_v57 = vcombine.low %v4464_v29, %v4468_v8 }
 0x3c5   :  { %v4275_v34 = vadd.f32 %v4274_v58, %v4232_v50  ;;  %v4234_v24 = vadd.f32 %v4233_v61, %v4191_v53  ;;  %v4276_v22 = vpop.f32.mrf.mxu1  ;;  %v4286_v63 = vmax.f32 %v4273_v1, 0.0  ;;  %v9009_v10 = vcombine.high %v4560_v45, %v4564_v21  ;;  %v4452_v61 = vld [vmem:[#allocation11 + $0x4a8] sm:$0xff] }
 0x3c6   :  { %v9008_v53 = vcombine.low %v4560_v45, %v4564_v21  ;;  %v9129_v58 = vcombine.high %v4680_v40, %v4684_v15  ;;  %v4676_v1 = vld [vmem:[#allocation11 + $0xba8] sm:$0xff] }
 0x3c7   :  { %v4277_v3 = vadd.f32 %v4276_v22, %v4234_v24  ;;  %7680 = vmatpush1.bf16.msra.mxu0 %v9048_v42  ;;  %v4293_v4 = vmax.f32 %v4275_v34, 0.0  ;;  %v4448_v42 = vld [vmem:[#allocation11 + $0x488] sm:$0xff]  ;;  %v9128_v24 = vcombine.low %v4680_v40, %v4684_v15 }
 0x3c8   :  { %7681 = vmatprep.subr.bf16.mxu0 %v9041_v14  ;;  %v4672_v14 = vld [vmem:[#allocation11 + $0xb88] sm:$0xff]  ;;  %v8897_v2 = vcombine.high %v4448_v42, %v4452_v61 }
 0x3c9   :  { %v4294_v41 = vmax.f32 %v4277_v3, 0.0  ;;  %v9799_v13 = vpack.c.bf16 %v4293_v4, %v4285_v25  ;;  %v9121_v6 = vcombine.high %v4672_v14, %v4676_v1  ;;  %v4440_v39 = vld [vmem:[#allocation11 + $0x448] sm:$0xff]  ;;  %v8896_v4 = vcombine.low %v4448_v42, %v4452_v61 }
 0x3ca   :  { %v4444_v22 = vld [vmem:[#allocation11 + $0x468] sm:$0xff] }
 0x3cb   :  { %v9797_v52 = vpack.c.bf16 %v4294_v41, %v4286_v63  ;;  %7682 = vmatpush1.bf16.msra.mxu0 %v9040_v54  ;;  %v4664_v3 = vld [vmem:[#allocation11 + $0xb48] sm:$0xff]  ;;  %v8889_v63 = vcombine.high %v4440_v39, %v4444_v22  ;;  %v8888_v7 = vcombine.low %v4440_v39, %v4444_v22 }
 0x3cc   :  { %7683 = vmatprep.subr.bf16.mxu0 %v9033_v37  ;;  %v4668_v54 = vld [vmem:[#allocation11 + $0xb68] sm:$0xff]  ;;  %v9120_v37 = vcombine.low %v4672_v14, %v4676_v1 }
 0x3cd   :  { %7578 = vmatprep.mubr.bf16.mxu1 %v9797_v52  ;;  %v9113_v41 = vcombine.high %v4664_v3, %v4668_v54  ;;  %v4432_v38 = vld [vmem:[#allocation11 + $0x408] sm:$0xff] }
 0x3ce   :  { %7579 = vmatmul.mubr.bf16.vlgmr.msra.gmra.mxu1 %v9799_v13  ;;  %v4436_v43 = vld [vmem:[#allocation11 + $0x428] sm:$0xff] }
 0x3cf   :  { %7633 = vmatpush1.bf16.msra.mxu1 %v8936_v27  ;;  %7664 = vmatprep.mubr.bf16.mxu1 %v9743_v19  ;;  %v4456_v27 = vld [vmem:[#allocation11 + $0x4c8] sm:$0xff] }
 0x3d0   :  { %7684 = vmatpush1.bf16.msra.mxu0 %v9032_v56  ;;  %7634 = vmatprep.subr.bf16.mxu1 %v8929_v35  ;;  %v8905_v50 = vcombine.high %v4456_v27, %v4460_v44  ;;  %v8904_v34 = vcombine.low %v4456_v27, %v4460_v44  ;;  %v4656_v25 = vld [vmem:[#allocation11 + $0xb08] sm:$0xff]  ;;  %v9112_v56 = vcombine.low %v4664_v3, %v4668_v54  ;;  %v4361_v3 = vld [vmem:[#allocation11 + $0x1d0] sm:$0xff] }
 0x3d1   :  { %7685 = vmatprep.subr.bf16.mxu0 %v9025_v23  ;;  %v8881_v35 = vcombine.high %v4432_v38, %v4436_v43  ;;  %v9105_v23 = vcombine.high %v4656_v25, %v4660_v5  ;;  %v4552_v17 = vld [vmem:[#allocation11 + $0x7c8] sm:$0xff]  ;;  %v4365_v54 = vld [vmem:[#allocation11 + $0x1f0] sm:$0xff] }
 0x3d2   :  { %v4556_v32 = vld [vmem:[#allocation11 + $0x7e8] sm:$0xff] }
 0x3d3   :  { %7635 = vmatpush1.bf16.msra.mxu1 %v8928_v18  ;;  %v4648_v28 = vld [vmem:[#allocation11 + $0xac8] sm:$0xff]  ;;  %v8880_v18 = vcombine.low %v4432_v38, %v4436_v43 }
 0x3d4   :  { %7686 = vmatpush1.bf16.msra.mxu0 %v9024_v31  ;;  %7636 = vmatprep.subr.bf16.mxu1 %v8921_v26  ;;  %v4652_v11 = vld [vmem:[#allocation11 + $0xae8] sm:$0xff]  ;;  %v9104_v31 = vcombine.low %v4656_v25, %v4660_v5  ;;  %v9001_v26 = vcombine.high %v4552_v17, %v4556_v32  ;;  %v4353_v25 = vld [vmem:[#allocation11 + $0x190] sm:$0xff] }
 0x3d5   :  { %7687 = vmatprep.subr.bf16.mxu0 %v9017_v12  ;;  %v9097_v12 = vcombine.high %v4648_v28, %v4652_v11  ;;  %v4544_v29 = vld [vmem:[#allocation11 + $0x788] sm:$0xff]  ;;  %v4357_v5 = vld [vmem:[#allocation11 + $0x1b0] sm:$0xff] }
 0x3d6   :  { %v4548_v8 = vld [vmem:[#allocation11 + $0x7a8] sm:$0xff] }
 0x3d7   :  { %7637 = vmatpush1.bf16.msra.mxu1 %v8920_v36  ;;  %v4640_v45 = vld [vmem:[#allocation11 + $0xa88] sm:$0xff]  ;;  %v9000_v36 = vcombine.low %v4552_v17, %v4556_v32 }
 0x3d8   :  { %7688 = vmatpush1.bf16.msra.mxu0 %v9016_v20  ;;  %7638 = vmatprep.subr.bf16.mxu1 %v8913_v9  ;;  %v4644_v21 = vld [vmem:[#allocation11 + $0xaa8] sm:$0xff]  ;;  %v9096_v20 = vcombine.low %v4648_v28, %v4652_v11  ;;  %v8993_v9 = vcombine.high %v4544_v29, %v4548_v8  ;;  %v4345_v28 = vld [vmem:[#allocation11 + $0x150] sm:$0xff] }
 0x3d9   :  { %7689 = vmatprep.subr.bf16.mxu0 %v9009_v10  ;;  %v9089_v10 = vcombine.high %v4640_v45, %v4644_v21  ;;  %v4536_v27 = vld [vmem:[#allocation11 + $0x748] sm:$0xff]  ;;  %v4349_v11 = vld [vmem:[#allocation11 + $0x170] sm:$0xff] }
 0x3da   :  { %v4540_v44 = vld [vmem:[#allocation11 + $0x768] sm:$0xff] }
 0x3db   :  { %7639 = vmatpush1.bf16.msra.mxu1 %v8912_v57  ;;  %v4632_v40 = vld [vmem:[#allocation11 + $0xa48] sm:$0xff]  ;;  %v8992_v57 = vcombine.low %v4544_v29, %v4548_v8 }
 0x3dc   :  { %7690 = vmatpush1.bf16.msra.mxu0 %v9008_v53  ;;  %7640 = vmatprep.subr.bf16.mxu1 %v8905_v50  ;;  %v4636_v15 = vld [vmem:[#allocation11 + $0xa68] sm:$0xff]  ;;  %v9088_v53 = vcombine.low %v4640_v45, %v4644_v21  ;;  %v8985_v50 = vcombine.high %v4536_v27, %v4540_v44  ;;  %v4337_v45 = vld [vmem:[#allocation11 + $0x110] sm:$0xff] }
 0x3dd   :  { %7691 = vmatprep.subr.bf16.mxu0 %v9129_v58  ;;  %v9081_v58 = vcombine.high %v4632_v40, %v4636_v15  ;;  %v4528_v42 = vld [vmem:[#allocation11 + $0x708] sm:$0xff]  ;;  %v4341_v21 = vld [vmem:[#allocation11 + $0x130] sm:$0xff] }
 0x3de   :  { %v4532_v61 = vld [vmem:[#allocation11 + $0x728] sm:$0xff] }
 0x3df   :  { %7641 = vmatpush1.bf16.msra.mxu1 %v8904_v34  ;;  %v4624_v14 = vld [vmem:[#allocation11 + $0xa08] sm:$0xff]  ;;  %v8984_v34 = vcombine.low %v4536_v27, %v4540_v44 }
 0x3e0   :  { %7692 = vmatpush2.bf16.msra.mxu0 %v9128_v24  ;;  %7642 = vmatprep.subr.bf16.mxu1 %v8897_v2  ;;  %v4628_v1 = vld [vmem:[#allocation11 + $0xa28] sm:$0xff]  ;;  %v9080_v24 = vcombine.low %v4632_v40, %v4636_v15  ;;  %v8977_v2 = vcombine.high %v4528_v42, %v4532_v61  ;;  %v4329_v40 = vld [vmem:[#allocation11 + $0xd0] sm:$0xff] }
 0x3e1   :  { %7693 = vmatprep.subr.bf16.mxu0 %v9121_v6  ;;  %v9073_v6 = vcombine.high %v4624_v14, %v4628_v1  ;;  %v4520_v39 = vld [vmem:[#allocation11 + $0x6c8] sm:$0xff]  ;;  %v4333_v15 = vld [vmem:[#allocation11 + $0xf0] sm:$0xff] }
 0x3e2   :  { %v4524_v22 = vld [vmem:[#allocation11 + $0x6e8] sm:$0xff] }
 0x3e3   :  { %7643 = vmatpush1.bf16.msra.mxu1 %v8896_v4  ;;  %v8976_v4 = vcombine.low %v4528_v42, %v4532_v61  ;;  %v4512_v38 = vld [vmem:[#allocation11 + $0x688] sm:$0xff] }
 0x3e4   :  { %7694 = vmatpush2.bf16.msra.mxu0 %v9120_v37  ;;  %7644 = vmatprep.subr.bf16.mxu1 %v8889_v63  ;;  %v9072_v37 = vcombine.low %v4624_v14, %v4628_v1  ;;  %v8969_v63 = vcombine.high %v4520_v39, %v4524_v22  ;;  %v4516_v43 = vld [vmem:[#allocation11 + $0x6a8] sm:$0xff]  ;;  %v4321_v14 = vld [vmem:[#allocation11 + $0x90] sm:$0xff] }
 0x3e5   :  { %7695 = vmatprep.subr.bf16.mxu0 %v9113_v41  ;;  %v8811_v41 = vcombine.high %v4361_v3, %v4365_v54  ;;  %v4504_v17 = vld [vmem:[#allocation11 + $0x648] sm:$0xff]  ;;  %v4325_v1 = vld [vmem:[#allocation11 + $0xb0] sm:$0xff] }
 0x3e6   :  { %v4508_v32 = vld [vmem:[#allocation11 + $0x668] sm:$0xff] }
 0x3e7   :  { %7645 = vmatpush1.bf16.msra.mxu1 %v8888_v7  ;;  %v8968_v7 = vcombine.low %v4520_v39, %v4524_v22  ;;  %v4496_v29 = vld [vmem:[#allocation11 + $0x608] sm:$0xff] }
 0x3e8   :  { %7696 = vmatpush2.bf16.msra.mxu0 %v9112_v56  ;;  %7646 = vmatprep.subr.bf16.mxu1 %v8881_v35  ;;  %v8810_v56 = vcombine.low %v4361_v3, %v4365_v54  ;;  %v8961_v35 = vcombine.high %v4512_v38, %v4516_v43  ;;  %v4500_v8 = vld [vmem:[#allocation11 + $0x628] sm:$0xff]  ;;  %v4313_v3 = vld [vmem:[#allocation11 + $0x50] sm:$0xff] }
 0x3e9   :  { %7697 = vmatprep.subr.bf16.mxu0 %v9105_v23  ;;  %v8803_v23 = vcombine.high %v4353_v25, %v4357_v5  ;;  %v4744_v27 = vld [vmem:[#allocation11 + $0xdc8] sm:$0xff]  ;;  %v4317_v54 = vld [vmem:[#allocation11 + $0x70] sm:$0xff] }
 0x3ea   :  { %v4748_v44 = vld [vmem:[#allocation11 + $0xde8] sm:$0xff] }
 0x3eb   :  { %7647 = vmatpush1.bf16.msra.mxu1 %v8880_v18  ;;  %v8960_v18 = vcombine.low %v4512_v38, %v4516_v43  ;;  %v4736_v42 = vld [vmem:[#allocation11 + $0xd88] sm:$0xff] }
 0x3ec   :  { %7698 = vmatpush2.bf16.msra.mxu0 %v9104_v31  ;;  %7648 = vmatprep.subr.bf16.mxu1 %v9001_v26  ;;  %v8802_v31 = vcombine.low %v4353_v25, %v4357_v5  ;;  %v8953_v26 = vcombine.high %v4504_v17, %v4508_v32  ;;  %v4740_v61 = vld [vmem:[#allocation11 + $0xda8] sm:$0xff]  ;;  %v4305_v25 = vld [vmem:[#allocation11 + $0x10] sm:$0xff] }
 0x3ed   :  { %7699 = vmatprep.subr.bf16.mxu0 %v9097_v12  ;;  %v8795_v12 = vcombine.high %v4345_v28, %v4349_v11  ;;  %v4728_v39 = vld [vmem:[#allocation11 + $0xd48] sm:$0xff]  ;;  %v4309_v5 = vld [vmem:[#allocation11 + $0x30] sm:$0xff] }
 0x3ee   :  { %v4732_v22 = vld [vmem:[#allocation11 + $0xd68] sm:$0xff] }
 0x3ef   :  { %7649 = vmatpush2.bf16.msra.mxu1 %v9000_v36  ;;  %v8952_v36 = vcombine.low %v4504_v17, %v4508_v32  ;;  %v4720_v38 = vld [vmem:[#allocation11 + $0xd08] sm:$0xff] }
 0x3f0   :  { %7700 = vmatpush2.bf16.msra.mxu0 %v9096_v20  ;;  %7650 = vmatprep.subr.bf16.mxu1 %v8993_v9  ;;  %v8794_v20 = vcombine.low %v4345_v28, %v4349_v11  ;;  %v8945_v9 = vcombine.high %v4496_v29, %v4500_v8  ;;  %v4724_v43 = vld [vmem:[#allocation11 + $0xd28] sm:$0xff]  ;;  %v4425_v28 = vld [vmem:[#allocation11 + $0x3d0] sm:$0xff] }
 0x3f1   :  { %7701 = vmatprep.subr.bf16.mxu0 %v9089_v10  ;;  %v8787_v10 = vcombine.high %v4337_v45, %v4341_v21  ;;  %v4712_v17 = vld [vmem:[#allocation11 + $0xcc8] sm:$0xff]  ;;  %v4429_v11 = vld [vmem:[#allocation11 + $0x3f0] sm:$0xff] }
 0x3f2   :  { %v4716_v32 = vld [vmem:[#allocation11 + $0xce8] sm:$0xff] }
 0x3f3   :  { %7651 = vmatpush2.bf16.msra.mxu1 %v8992_v57  ;;  %v8944_v57 = vcombine.low %v4496_v29, %v4500_v8  ;;  %v4704_v29 = vld [vmem:[#allocation11 + $0xc88] sm:$0xff] }
 0x3f4   :  { %7702 = vmatpush2.bf16.msra.mxu0 %v9088_v53  ;;  %7652 = vmatprep.subr.bf16.mxu1 %v8985_v50  ;;  %v8786_v53 = vcombine.low %v4337_v45, %v4341_v21  ;;  %v9193_v50 = vcombine.high %v4744_v27, %v4748_v44  ;;  %v4708_v8 = vld [vmem:[#allocation11 + $0xca8] sm:$0xff]  ;;  %v4417_v45 = vld [vmem:[#allocation11 + $0x390] sm:$0xff] }
 0x3f5   :  { %7703 = vmatprep.subr.bf16.mxu0 %v9081_v58  ;;  %v8779_v58 = vcombine.high %v4329_v40, %v4333_v15  ;;  %v4421_v21 = vld [vmem:[#allocation11 + $0x3b0] sm:$0xff] }
 0x3f7   :  { %7653 = vmatpush2.bf16.msra.mxu1 %v8984_v34  ;;  %v9192_v34 = vcombine.low %v4744_v27, %v4748_v44  ;;  %v4696_v27 = vld [vmem:[#allocation11 + $0xc48] sm:$0xff] }
 0x3f8   :  { %7704 = vmatpush2.bf16.msra.mxu0 %v9080_v24  ;;  %7654 = vmatprep.subr.bf16.mxu1 %v8977_v2  ;;  %v8778_v24 = vcombine.low %v4329_v40, %v4333_v15  ;;  %v9185_v2 = vcombine.high %v4736_v42, %v4740_v61  ;;  %v4700_v44 = vld [vmem:[#allocation11 + $0xc68] sm:$0xff]  ;;  %v4409_v40 = vld [vmem:[#allocation11 + $0x350] sm:$0xff] }
 0x3f9   :  { %7705 = vmatprep.subr.bf16.mxu0 %v9073_v6  ;;  %v8771_v6 = vcombine.high %v4321_v14, %v4325_v1  ;;  %v4413_v15 = vld [vmem:[#allocation11 + $0x370] sm:$0xff] }
 0x3fb   :  { %7655 = vmatpush2.bf16.msra.mxu1 %v8976_v4  ;;  %v9184_v4 = vcombine.low %v4736_v42, %v4740_v61  ;;  %v4688_v42 = vld [vmem:[#allocation11 + $0xc08] sm:$0xff] }
 0x3fc   :  { %7706 = vmatpush2.bf16.msra.mxu0 %v9072_v37  ;;  %7656 = vmatprep.subr.bf16.mxu1 %v8969_v63  ;;  %v8770_v37 = vcombine.low %v4321_v14, %v4325_v1  ;;  %v9177_v63 = vcombine.high %v4728_v39, %v4732_v22  ;;  %v4692_v61 = vld [vmem:[#allocation11 + $0xc28] sm:$0xff]  ;;  %v4401_v14 = vld [vmem:[#allocation11 + $0x310] sm:$0xff] }
 0x3fd   :  { %7761 = vmatprep.subr.bf16.mxu0 %v8811_v41  ;;  %v8763_v41 = vcombine.high %v4313_v3, %v4317_v54  ;;  %v4405_v1 = vld [vmem:[#allocation11 + $0x330] sm:$0xff] }
 0x3ff   :  { %7657 = vmatpush2.bf16.msra.mxu1 %v8968_v7  ;;  %7708 = vmatmul.mubr.bf16.vlgmr.msra.gmra.mxu0 %v9789_v55  ;;  %v9176_v7 = vcombine.low %v4728_v39, %v4732_v22  ;;  %v4808_v39 = vld [vmem:[#allocation11 + $0xfc8] sm:$0xff] }
 0x400   :  { %7762 = vmatpush1.bf16.msra.mxu0 %v8810_v56  ;;  %7793 = vmatprep.mubr.bf16.mxu0 %v9740_v30  ;;  %v8762_v56 = vcombine.low %v4313_v3, %v4317_v54  ;;  %v4812_v22 = vld [vmem:[#allocation11 + $0xfe8] sm:$0xff]  ;;  %v4393_v3 = vld [vmem:[#allocation11 + $0x2d0] sm:$0xff] }
 0x401   :  { %7658 = vmatprep.subr.bf16.mxu1 %v8961_v35  ;;  %7763 = vmatprep.subr.bf16.mxu0 %v8803_v23  ;;  %v9169_v35 = vcombine.high %v4720_v38, %v4724_v43  ;;  %v8755_v23 = vcombine.high %v4305_v25, %v4309_v5  ;;  %v4397_v54 = vld [vmem:[#allocation11 + $0x2f0] sm:$0xff] }
 0x403   :  { %7659 = vmatpush2.bf16.msra.mxu1 %v8960_v18  ;;  %v9168_v18 = vcombine.low %v4720_v38, %v4724_v43  ;;  %v4800_v38 = vld [vmem:[#allocation11 + $0xf88] sm:$0xff] }
 0x404   :  { %7764 = vmatpush1.bf16.msra.mxu0 %v8802_v31  ;;  %7660 = vmatprep.subr.bf16.mxu1 %v8953_v26  ;;  %v8754_v31 = vcombine.low %v4305_v25, %v4309_v5  ;;  %v9161_v26 = vcombine.high %v4712_v17, %v4716_v32  ;;  %v4804_v43 = vld [vmem:[#allocation11 + $0xfa8] sm:$0xff]  ;;  %v4385_v25 = vld [vmem:[#allocation11 + $0x290] sm:$0xff] }
 0x405   :  { %7765 = vmatprep.subr.bf16.mxu0 %v8795_v12  ;;  %v8875_v12 = vcombine.high %v4425_v28, %v4429_v11  ;;  %v4389_v5 = vld [vmem:[#allocation11 + $0x2b0] sm:$0xff] }
 0x407   :  { %7661 = vmatpush2.bf16.msra.mxu1 %v8952_v36  ;;  %v9160_v36 = vcombine.low %v4712_v17, %v4716_v32  ;;  %v4792_v17 = vld [vmem:[#allocation11 + $0xf48] sm:$0xff] }
 0x408   :  { %7766 = vmatpush1.bf16.msra.mxu0 %v8794_v20  ;;  %7662 = vmatprep.subr.bf16.mxu1 %v8945_v9  ;;  %v8874_v20 = vcombine.low %v4425_v28, %v4429_v11  ;;  %v9153_v9 = vcombine.high %v4704_v29, %v4708_v8  ;;  %v4796_v32 = vld [vmem:[#allocation11 + $0xf68] sm:$0xff]  ;;  %v4377_v28 = vld [vmem:[#allocation11 + $0x250] sm:$0xff] }
 0x409   :  { %7767 = vmatprep.subr.bf16.mxu0 %v8787_v10  ;;  %v8867_v10 = vcombine.high %v4417_v45, %v4421_v21  ;;  %v4381_v11 = vld [vmem:[#allocation11 + $0x270] sm:$0xff] }
 0x40b   :  { %7663 = vmatpush2.bf16.msra.mxu1 %v8944_v57  ;;  %v9152_v57 = vcombine.low %v4704_v29, %v4708_v8  ;;  %v4784_v29 = vld [vmem:[#allocation11 + $0xf08] sm:$0xff] }
 0x40c   :  { %7768 = vmatpush1.bf16.msra.mxu0 %v8786_v53  ;;  %7718 = vmatprep.subr.bf16.mxu1 %v9193_v50  ;;  %v8866_v53 = vcombine.low %v4417_v45, %v4421_v21  ;;  %v9145_v50 = vcombine.high %v4696_v27, %v4700_v44  ;;  %v4788_v8 = vld [vmem:[#allocation11 + $0xf28] sm:$0xff]  ;;  %v4369_v45 = vld [vmem:[#allocation11 + $0x210] sm:$0xff] }
 0x40d   :  { %7769 = vmatprep.subr.bf16.mxu0 %v8779_v58  ;;  %v8859_v58 = vcombine.high %v4409_v40, %v4413_v15  ;;  %v4373_v21 = vld [vmem:[#allocation11 + $0x230] sm:$0xff] }
 0x40e   :  { %7665 = vmatmul.mubr.bf16.vlgmr.msra.gmra.mxu1 %v9718_v16 }
 0x40f   :  { %7719 = vmatpush1.bf16.msra.mxu1 %v9192_v34  ;;  %7750 = vmatprep.mubr.bf16.mxu1 %v9797_v52  ;;  %v9144_v34 = vcombine.low %v4696_v27, %v4700_v44  ;;  %v4776_v27 = vld [vmem:[#allocation11 + $0xec8] sm:$0xff] }
 0x410   :  { %7770 = vmatpush1.bf16.msra.mxu0 %v8778_v24  ;;  %7720 = vmatprep.subr.bf16.mxu1 %v9185_v2  ;;  %v8858_v24 = vcombine.low %v4409_v40, %v4413_v15  ;;  %v9137_v2 = vcombine.high %v4688_v42, %v4692_v61  ;;  %v4780_v44 = vld [vmem:[#allocation11 + $0xee8] sm:$0xff]  ;;  %v4617_v40 = vld [vmem:[#allocation11 + $0x9d0] sm:$0xff] }
 0x411   :  { %7771 = vmatprep.subr.bf16.mxu0 %v8771_v6  ;;  %v8851_v6 = vcombine.high %v4401_v14, %v4405_v1  ;;  %v4621_v15 = vld [vmem:[#allocation11 + $0x9f0] sm:$0xff] }
 0x413   :  { %7721 = vmatpush1.bf16.msra.mxu1 %v9184_v4  ;;  %v9136_v4 = vcombine.low %v4688_v42, %v4692_v61  ;;  %v4768_v42 = vld [vmem:[#allocation11 + $0xe88] sm:$0xff] }
 0x414   :  { %7772 = vmatpush1.bf16.msra.mxu0 %v8770_v37  ;;  %7722 = vmatprep.subr.bf16.mxu1 %v9177_v63  ;;  %v8850_v37 = vcombine.low %v4401_v14, %v4405_v1  ;;  %v9257_v63 = vcombine.high %v4808_v39, %v4812_v22  ;;  %v4772_v61 = vld [vmem:[#allocation11 + $0xea8] sm:$0xff]  ;;  %v4609_v14 = vld [vmem:[#allocation11 + $0x990] sm:$0xff] }
 0x415   :  { %7773 = vmatprep.subr.bf16.mxu0 %v8763_v41  ;;  %v8843_v41 = vcombine.high %v4393_v3, %v4397_v54  ;;  %v4613_v1 = vld [vmem:[#allocation11 + $0x9b0] sm:$0xff] }
 0x417   :  { %7723 = vmatpush1.bf16.msra.mxu1 %v9176_v7  ;;  %v9256_v7 = vcombine.low %v4808_v39, %v4812_v22  ;;  %v4760_v39 = vld [vmem:[#allocation11 + $0xe48] sm:$0xff] }
 0x418   :  { %7774 = vmatpush1.bf16.msra.mxu0 %v8762_v56  ;;  %7724 = vmatprep.subr.bf16.mxu1 %v9169_v35  ;;  %v8842_v56 = vcombine.low %v4393_v3, %v4397_v54  ;;  %v9249_v35 = vcombine.high %v4800_v38, %v4804_v43  ;;  %v4764_v22 = vld [vmem:[#allocation11 + $0xe68] sm:$0xff]  ;;  %v4601_v3 = vld [vmem:[#allocation11 + $0x950] sm:$0xff] }
 0x419   :  { %7775 = vmatprep.subr.bf16.mxu0 %v8755_v23  ;;  %v8835_v23 = vcombine.high %v4385_v25, %v4389_v5  ;;  %v4605_v54 = vld [vmem:[#allocation11 + $0x970] sm:$0xff] }
 0x41b   :  { %7725 = vmatpush1.bf16.msra.mxu1 %v9168_v18  ;;  %v9248_v18 = vcombine.low %v4800_v38, %v4804_v43  ;;  %v4752_v38 = vld [vmem:[#allocation11 + $0xe08] sm:$0xff] }
 0x41c   :  { %7776 = vmatpush1.bf16.msra.mxu0 %v8754_v31  ;;  %7726 = vmatprep.subr.bf16.mxu1 %v9161_v26  ;;  %v8834_v31 = vcombine.low %v4385_v25, %v4389_v5  ;;  %v9241_v26 = vcombine.high %v4792_v17, %v4796_v32  ;;  %v4756_v43 = vld [vmem:[#allocation11 + $0xe28] sm:$0xff]  ;;  %v4593_v25 = vld [vmem:[#allocation11 + $0x910] sm:$0xff] }
 0x41d   :  { %7777 = vmatprep.subr.bf16.mxu0 %v8875_v12  ;;  %v8827_v12 = vcombine.high %v4377_v28, %v4381_v11  ;;  %v4597_v5 = vld [vmem:[#allocation11 + $0x930] sm:$0xff] }
 0x41f   :  { %7727 = vmatpush1.bf16.msra.mxu1 %v9160_v36  ;;  %v9240_v36 = vcombine.low %v4792_v17, %v4796_v32  ;;  %v4489_v17 = vld [vmem:[#allocation11 + $0x5d0] sm:$0xff] }
 0x420   :  { %7778 = vmatpush2.bf16.msra.mxu0 %v8874_v20  ;;  %7728 = vmatprep.subr.bf16.mxu1 %v9153_v9  ;;  %v8826_v20 = vcombine.low %v4377_v28, %v4381_v11  ;;  %v9233_v9 = vcombine.high %v4784_v29, %v4788_v8  ;;  %v4493_v32 = vld [vmem:[#allocation11 + $0x5f0] sm:$0xff] }
 0x421   :  { %7779 = vmatprep.subr.bf16.mxu0 %v8867_v10  ;;  %v8819_v10 = vcombine.high %v4369_v45, %v4373_v21  ;;  %v4585_v28 = vld [vmem:[#allocation11 + $0x8d0] sm:$0xff] }
 0x422   :  { %v4589_v11 = vld [vmem:[#allocation11 + $0x8f0] sm:$0xff] }
 0x423   :  { %7729 = vmatpush1.bf16.msra.mxu1 %v9152_v57  ;;  %v9232_v57 = vcombine.low %v4784_v29, %v4788_v8  ;;  %v4481_v29 = vld [vmem:[#allocation11 + $0x590] sm:$0xff] }
 0x424   :  { %7780 = vmatpush2.bf16.msra.mxu0 %v8866_v53  ;;  %7730 = vmatprep.subr.bf16.mxu1 %v9145_v50  ;;  %v8818_v53 = vcombine.low %v4369_v45, %v4373_v21  ;;  %v9225_v50 = vcombine.high %v4776_v27, %v4780_v44  ;;  %v4485_v8 = vld [vmem:[#allocation11 + $0x5b0] sm:$0xff] }
 0x425   :  { %7781 = vmatprep.subr.bf16.mxu0 %v8859_v58  ;;  %v9067_v58 = vcombine.high %v4617_v40, %v4621_v15  ;;  %v4577_v45 = vld [vmem:[#allocation11 + $0x890] sm:$0xff] }
 0x426   :  { %v4581_v21 = vld [vmem:[#allocation11 + $0x8b0] sm:$0xff] }
 0x427   :  { %7731 = vmatpush1.bf16.msra.mxu1 %v9144_v34  ;;  %v9224_v34 = vcombine.low %v4776_v27, %v4780_v44  ;;  %v4473_v27 = vld [vmem:[#allocation11 + $0x550] sm:$0xff] }
 0x428   :  { %7782 = vmatpush2.bf16.msra.mxu0 %v8858_v24  ;;  %7732 = vmatprep.subr.bf16.mxu1 %v9137_v2  ;;  %v9066_v24 = vcombine.low %v4617_v40, %v4621_v15  ;;  %v9217_v2 = vcombine.high %v4768_v42, %v4772_v61  ;;  %v4477_v44 = vld [vmem:[#allocation11 + $0x570] sm:$0xff] }
 0x429   :  { %7783 = vmatprep.subr.bf16.mxu0 %v8851_v6  ;;  %v9059_v6 = vcombine.high %v4609_v14, %v4613_v1  ;;  %v4569_v40 = vld [vmem:[#allocation11 + $0x850] sm:$0xff] }
 0x42a   :  { %v4573_v15 = vld [vmem:[#allocation11 + $0x870] sm:$0xff] }
 0x42b   :  { %7733 = vmatpush1.bf16.msra.mxu1 %v9136_v4  ;;  %v9216_v4 = vcombine.low %v4768_v42, %v4772_v61  ;;  %v4465_v42 = vld [vmem:[#allocation11 + $0x510] sm:$0xff] }
 0x42c   :  { %7784 = vmatpush2.bf16.msra.mxu0 %v8850_v37  ;;  %7734 = vmatprep.subr.bf16.mxu1 %v9257_v63  ;;  %v9058_v37 = vcombine.low %v4609_v14, %v4613_v1  ;;  %v9209_v63 = vcombine.high %v4760_v39, %v4764_v22  ;;  %v4469_v61 = vld [vmem:[#allocation11 + $0x530] sm:$0xff] }
 0x42d   :  { %7785 = vmatprep.subr.bf16.mxu0 %v8843_v41  ;;  %v9051_v41 = vcombine.high %v4601_v3, %v4605_v54  ;;  %v4561_v14 = vld [vmem:[#allocation11 + $0x810] sm:$0xff] }
 0x42e   :  { %v4565_v1 = vld [vmem:[#allocation11 + $0x830] sm:$0xff] }
 0x42f   :  { %7735 = vmatpush2.bf16.msra.mxu1 %v9256_v7  ;;  %v9208_v7 = vcombine.low %v4760_v39, %v4764_v22  ;;  %v4457_v39 = vld [vmem:[#allocation11 + $0x4d0] sm:$0xff] }
 0x430   :  { %7786 = vmatpush2.bf16.msra.mxu0 %v8842_v56  ;;  %7736 = vmatprep.subr.bf16.mxu1 %v9249_v35  ;;  %v9050_v56 = vcombine.low %v4601_v3, %v4605_v54  ;;  %v9201_v35 = vcombine.high %v4752_v38, %v4756_v43  ;;  %v4461_v22 = vld [vmem:[#allocation11 + $0x4f0] sm:$0xff] }
 0x431   :  { %7787 = vmatprep.subr.bf16.mxu0 %v8835_v23  ;;  %v9043_v23 = vcombine.high %v4593_v25, %v4597_v5  ;;  %v4681_v3 = vld [vmem:[#allocation11 + $0xbd0] sm:$0xff] }
 0x432   :  { %v4685_v54 = vld [vmem:[#allocation11 + $0xbf0] sm:$0xff] }
 0x433   :  { %7737 = vmatpush2.bf16.msra.mxu1 %v9248_v18  ;;  %v9200_v18 = vcombine.low %v4752_v38, %v4756_v43  ;;  %v4449_v38 = vld [vmem:[#allocation11 + $0x490] sm:$0xff] }
 0x434   :  { %7788 = vmatpush2.bf16.msra.mxu0 %v8834_v31  ;;  %7738 = vmatprep.subr.bf16.mxu1 %v9241_v26  ;;  %v9042_v31 = vcombine.low %v4593_v25, %v4597_v5  ;;  %v8939_v26 = vcombine.high %v4489_v17, %v4493_v32  ;;  %v4453_v43 = vld [vmem:[#allocation11 + $0x4b0] sm:$0xff] }
 0x435   :  { %7789 = vmatprep.subr.bf16.mxu0 %v8827_v12  ;;  %v9035_v12 = vcombine.high %v4585_v28, %v4589_v11  ;;  %v4673_v25 = vld [vmem:[#allocation11 + $0xb90] sm:$0xff] }
 0x436   :  { %v4677_v5 = vld [vmem:[#allocation11 + $0xbb0] sm:$0xff] }
 0x437   :  { %7739 = vmatpush2.bf16.msra.mxu1 %v9240_v36  ;;  %v8938_v36 = vcombine.low %v4489_v17, %v4493_v32  ;;  %v4441_v17 = vld [vmem:[#allocation11 + $0x450] sm:$0xff] }
 0x438   :  { %7790 = vmatpush2.bf16.msra.mxu0 %v8826_v20  ;;  %7740 = vmatprep.subr.bf16.mxu1 %v9233_v9  ;;  %v9034_v20 = vcombine.low %v4585_v28, %v4589_v11  ;;  %v8931_v9 = vcombine.high %v4481_v29, %v4485_v8  ;;  %v4445_v32 = vld [vmem:[#allocation11 + $0x470] sm:$0xff] }
 0x439   :  { %7791 = vmatprep.subr.bf16.mxu0 %v8819_v10  ;;  %v9027_v10 = vcombine.high %v4577_v45, %v4581_v21  ;;  %v4665_v28 = vld [vmem:[#allocation11 + $0xb50] sm:$0xff] }
 0x43a   :  { %v4669_v11 = vld [vmem:[#allocation11 + $0xb70] sm:$0xff] }
 0x43b   :  { %7741 = vmatpush2.bf16.msra.mxu1 %v9232_v57  ;;  %v8930_v57 = vcombine.low %v4481_v29, %v4485_v8  ;;  %v4433_v29 = vld [vmem:[#allocation11 + $0x410] sm:$0xff] }
 0x43c   :  { %7792 = vmatpush2.bf16.msra.mxu0 %v8818_v53  ;;  %7742 = vmatprep.subr.bf16.mxu1 %v9225_v50  ;;  %v9026_v53 = vcombine.low %v4577_v45, %v4581_v21  ;;  %v8923_v50 = vcombine.high %v4473_v27, %v4477_v44  ;;  %v4437_v8 = vld [vmem:[#allocation11 + $0x430] sm:$0xff] }
 0x43d   :  { %7847 = vmatprep.subr.bf16.mxu0 %v9067_v58  ;;  %v9019_v58 = vcombine.high %v4569_v40, %v4573_v15  ;;  %v4657_v45 = vld [vmem:[#allocation11 + $0xb10] sm:$0xff] }
 0x43e   :  { %v4661_v21 = vld [vmem:[#allocation11 + $0xb30] sm:$0xff] }
 0x43f   :  { %7743 = vmatpush2.bf16.msra.mxu1 %v9224_v34  ;;  %7794 = vmatmul.mubr.bf16.vlgmr.msra.gmra.mxu0 %v9684_v46  ;;  %v8922_v34 = vcombine.low %v4473_v27, %v4477_v44  ;;  %v4553_v27 = vld [vmem:[#allocation11 + $0x7d0] sm:$0xff] }
 0x440   :  { %7848 = vmatpush1.bf16.msra.mxu0 %v9066_v24  ;;  %7879 = vmatprep.mubr.bf16.mxu0 %v9768_v33  ;;  %v9018_v24 = vcombine.low %v4569_v40, %v4573_v15  ;;  %v4557_v44 = vld [vmem:[#allocation11 + $0x7f0] sm:$0xff] }
 0x441   :  { %7744 = vmatprep.subr.bf16.mxu1 %v9217_v2  ;;  %7849 = vmatprep.subr.bf16.mxu0 %v9059_v6  ;;  %v8915_v2 = vcombine.high %v4465_v42, %v4469_v61  ;;  %v9011_v6 = vcombine.high %v4561_v14, %v4565_v1  ;;  %v4649_v40 = vld [vmem:[#allocation11 + $0xad0] sm:$0xff] }
 0x442   :  { %v4653_v15 = vld [vmem:[#allocation11 + $0xaf0] sm:$0xff] }
 0x443   :  { %7745 = vmatpush2.bf16.msra.mxu1 %v9216_v4  ;;  %v8914_v4 = vcombine.low %v4465_v42, %v4469_v61  ;;  %v4545_v42 = vld [vmem:[#allocation11 + $0x790] sm:$0xff] }
 0x444   :  { %7850 = vmatpush1.bf16.msra.mxu0 %v9058_v37  ;;  %7746 = vmatprep.subr.bf16.mxu1 %v9209_v63  ;;  %v9010_v37 = vcombine.low %v4561_v14, %v4565_v1  ;;  %v8907_v63 = vcombine.high %v4457_v39, %v4461_v22  ;;  %v4549_v61 = vld [vmem:[#allocation11 + $0x7b0] sm:$0xff] }
 0x445   :  { %7851 = vmatprep.subr.bf16.mxu0 %v9051_v41  ;;  %v9131_v41 = vcombine.high %v4681_v3, %v4685_v54  ;;  %v4641_v14 = vld [vmem:[#allocation11 + $0xa90] sm:$0xff] }
 0x446   :  { %v4645_v1 = vld [vmem:[#allocation11 + $0xab0] sm:$0xff] }
 0x447   :  { %7747 = vmatpush2.bf16.msra.mxu1 %v9208_v7  ;;  %v8906_v7 = vcombine.low %v4457_v39, %v4461_v22  ;;  %v4537_v39 = vld [vmem:[#allocation11 + $0x750] sm:$0xff] }
 0x448   :  { %7852 = vmatpush1.bf16.msra.mxu0 %v9050_v56  ;;  %7748 = vmatprep.subr.bf16.mxu1 %v9201_v35  ;;  %v9130_v56 = vcombine.low %v4681_v3, %v4685_v54  ;;  %v8899_v35 = vcombine.high %v4449_v38, %v4453_v43  ;;  %v4541_v22 = vld [vmem:[#allocation11 + $0x770] sm:$0xff] }
 0x449   :  { %7853 = vmatprep.subr.bf16.mxu0 %v9043_v23  ;;  %v9123_v23 = vcombine.high %v4673_v25, %v4677_v5  ;;  %v4633_v3 = vld [vmem:[#allocation11 + $0xa50] sm:$0xff] }
 0x44a   :  { %v4637_v54 = vld [vmem:[#allocation11 + $0xa70] sm:$0xff] }
 0x44b   :  { %7749 = vmatpush2.bf16.msra.mxu1 %v9200_v18  ;;  %v8898_v18 = vcombine.low %v4449_v38, %v4453_v43  ;;  %v4529_v38 = vld [vmem:[#allocation11 + $0x710] sm:$0xff] }
 0x44c   :  { %7854 = vmatpush1.bf16.msra.mxu0 %v9042_v31  ;;  %7804 = vmatprep.subr.bf16.mxu1 %v8939_v26  ;;  %v9122_v31 = vcombine.low %v4673_v25, %v4677_v5  ;;  %v8891_v26 = vcombine.high %v4441_v17, %v4445_v32  ;;  %v4533_v43 = vld [vmem:[#allocation11 + $0x730] sm:$0xff] }
 0x44d   :  { %7855 = vmatprep.subr.bf16.mxu0 %v9035_v12  ;;  %v9115_v12 = vcombine.high %v4665_v28, %v4669_v11  ;;  %v4625_v25 = vld [vmem:[#allocation11 + $0xa10] sm:$0xff] }
 0x44e   :  { %7751 = vmatmul.mubr.bf16.vlgmr.msra.gmra.mxu1 %v9799_v13  ;;  %v4629_v5 = vld [vmem:[#allocation11 + $0xa30] sm:$0xff] }
 0x44f   :  { %7805 = vmatpush1.bf16.msra.mxu1 %v8938_v36  ;;  %7836 = vmatprep.mubr.bf16.mxu1 %v9743_v19  ;;  %v8890_v36 = vcombine.low %v4441_v17, %v4445_v32  ;;  %v4521_v17 = vld [vmem:[#allocation11 + $0x6d0] sm:$0xff] }
 0x450   :  { %7856 = vmatpush1.bf16.msra.mxu0 %v9034_v20  ;;  %7806 = vmatprep.subr.bf16.mxu1 %v8931_v9  ;;  %v9114_v20 = vcombine.low %v4665_v28, %v4669_v11  ;;  %v8883_v9 = vcombine.high %v4433_v29, %v4437_v8  ;;  %v4525_v32 = vld [vmem:[#allocation11 + $0x6f0] sm:$0xff]  ;;  %v4362_v28 = vld [vmem:[#allocation11 + $0x1d8] sm:$0xff] }
 0x451   :  { %7857 = vmatprep.subr.bf16.mxu0 %v9027_v10  ;;  %v9107_v10 = vcombine.high %v4657_v45, %v4661_v21  ;;  %v4366_v11 = vld [vmem:[#allocation11 + $0x1f8] sm:$0xff] }
 0x453   :  { %7807 = vmatpush1.bf16.msra.mxu1 %v8930_v57  ;;  %v8882_v57 = vcombine.low %v4433_v29, %v4437_v8  ;;  %v4513_v29 = vld [vmem:[#allocation11 + $0x690] sm:$0xff] }
 0x454   :  { %7858 = vmatpush1.bf16.msra.mxu0 %v9026_v53  ;;  %7808 = vmatprep.subr.bf16.mxu1 %v8923_v50  ;;  %v9106_v53 = vcombine.low %v4657_v45, %v4661_v21  ;;  %v9003_v50 = vcombine.high %v4553_v27, %v4557_v44  ;;  %v4517_v8 = vld [vmem:[#allocation11 + $0x6b0] sm:$0xff]  ;;  %v4354_v45 = vld [vmem:[#allocation11 + $0x198] sm:$0xff] }
 0x455   :  { %7859 = vmatprep.subr.bf16.mxu0 %v9019_v58  ;;  %v9099_v58 = vcombine.high %v4649_v40, %v4653_v15  ;;  %v4358_v21 = vld [vmem:[#allocation11 + $0x1b8] sm:$0xff] }
 0x457   :  { %7809 = vmatpush1.bf16.msra.mxu1 %v8922_v34  ;;  %v9002_v34 = vcombine.low %v4553_v27, %v4557_v44  ;;  %v4505_v27 = vld [vmem:[#allocation11 + $0x650] sm:$0xff] }
 0x458   :  { %7860 = vmatpush1.bf16.msra.mxu0 %v9018_v24  ;;  %7810 = vmatprep.subr.bf16.mxu1 %v8915_v2  ;;  %v9098_v24 = vcombine.low %v4649_v40, %v4653_v15  ;;  %v8995_v2 = vcombine.high %v4545_v42, %v4549_v61  ;;  %v4509_v44 = vld [vmem:[#allocation11 + $0x670] sm:$0xff]  ;;  %v4346_v40 = vld [vmem:[#allocation11 + $0x158] sm:$0xff] }
 0x459   :  { %7861 = vmatprep.subr.bf16.mxu0 %v9011_v6  ;;  %v9091_v6 = vcombine.high %v4641_v14, %v4645_v1  ;;  %v4350_v15 = vld [vmem:[#allocation11 + $0x178] sm:$0xff] }
 0x45b   :  { %7811 = vmatpush1.bf16.msra.mxu1 %v8914_v4  ;;  %v8994_v4 = vcombine.low %v4545_v42, %v4549_v61  ;;  %v4497_v42 = vld [vmem:[#allocation11 + $0x610] sm:$0xff] }
 0x45c   :  { %7862 = vmatpush1.bf16.msra.mxu0 %v9010_v37  ;;  %7812 = vmatprep.subr.bf16.mxu1 %v8907_v63  ;;  %v9090_v37 = vcombine.low %v4641_v14, %v4645_v1  ;;  %v8987_v63 = vcombine.high %v4537_v39, %v4541_v22  ;;  %v4501_v61 = vld [vmem:[#allocation11 + $0x630] sm:$0xff]  ;;  %v4338_v14 = vld [vmem:[#allocation11 + $0x118] sm:$0xff] }
 0x45d   :  { %7863 = vmatprep.subr.bf16.mxu0 %v9131_v41  ;;  %v9083_v41 = vcombine.high %v4633_v3, %v4637_v54  ;;  %v4342_v1 = vld [vmem:[#allocation11 + $0x138] sm:$0xff] }
 0x45f   :  { %7813 = vmatpush1.bf16.msra.mxu1 %v8906_v7  ;;  %v8986_v7 = vcombine.low %v4537_v39, %v4541_v22  ;;  %v4745_v39 = vld [vmem:[#allocation11 + $0xdd0] sm:$0xff] }
 0x460   :  { %7864 = vmatpush2.bf16.msra.mxu0 %v9130_v56  ;;  %7814 = vmatprep.subr.bf16.mxu1 %v8899_v35  ;;  %v9082_v56 = vcombine.low %v4633_v3, %v4637_v54  ;;  %v8979_v35 = vcombine.high %v4529_v38, %v4533_v43  ;;  %v4749_v22 = vld [vmem:[#allocation11 + $0xdf0] sm:$0xff]  ;;  %v4334_v3 = vld [vmem:[#allocation11 + $0xf8] sm:$0xff]  ;;  %v8946_v54 = vcombine.low %v4497_v42, %v4501_v61 }
 0x461   :  { %7865 = vmatprep.subr.bf16.mxu0 %v9123_v23  ;;  %v9075_v23 = vcombine.high %v4625_v25, %v4629_v5 }
 0x463   :  { %7815 = vmatpush1.bf16.msra.mxu1 %v8898_v18  ;;  %v8978_v18 = vcombine.low %v4529_v38, %v4533_v43  ;;  %v4741_v38 = vld [vmem:[#allocation11 + $0xdb0] sm:$0xff]  ;;  %v4322_v43 = vld [vmem:[#allocation11 + $0x98] sm:$0xff] }
 0x464   :  { %7866 = vmatpush2.bf16.msra.mxu0 %v9122_v31  ;;  %7816 = vmatprep.subr.bf16.mxu1 %v8891_v26  ;;  %v9074_v31 = vcombine.low %v4625_v25, %v4629_v5  ;;  %v8971_v26 = vcombine.high %v4521_v17, %v4525_v32  ;;  %v4326_v25 = vld [vmem:[#allocation11 + $0xb8] sm:$0xff]  ;;  %v9194_v5 = vcombine.low %v4745_v39, %v4749_v22 }
 0x465   :  { %7867 = vmatprep.subr.bf16.mxu0 %v9115_v12  ;;  %v8813_v12 = vcombine.high %v4362_v28, %v4366_v11 }
 0x467   :  { %7817 = vmatpush1.bf16.msra.mxu1 %v8890_v36  ;;  %v8970_v36 = vcombine.low %v4521_v17, %v4525_v32  ;;  %v4733_v17 = vld [vmem:[#allocation11 + $0xd70] sm:$0xff]  ;;  %v4314_v32 = vld [vmem:[#allocation11 + $0x58] sm:$0xff] }
 0x468   :  { %7868 = vmatpush2.bf16.msra.mxu0 %v9114_v20  ;;  %7818 = vmatprep.subr.bf16.mxu1 %v8883_v9  ;;  %v8812_v20 = vcombine.low %v4362_v28, %v4366_v11  ;;  %v8963_v9 = vcombine.high %v4513_v29, %v4517_v8  ;;  %v4318_v28 = vld [vmem:[#allocation11 + $0x78] sm:$0xff] }
 0x469   :  { %7869 = vmatprep.subr.bf16.mxu0 %v9107_v10  ;;  %v8805_v10 = vcombine.high %v4354_v45, %v4358_v21 }
 0x46b   :  { %7819 = vmatpush1.bf16.msra.mxu1 %v8882_v57  ;;  %v8962_v57 = vcombine.low %v4513_v29, %v4517_v8  ;;  %v4725_v29 = vld [vmem:[#allocation11 + $0xd30] sm:$0xff]  ;;  %v4306_v8 = vld [vmem:[#allocation11 + $0x18] sm:$0xff] }
 0x46c   :  { %7870 = vmatpush2.bf16.msra.mxu0 %v9106_v53  ;;  %7820 = vmatprep.subr.bf16.mxu1 %v9003_v50  ;;  %v8804_v53 = vcombine.low %v4354_v45, %v4358_v21  ;;  %v8955_v50 = vcombine.high %v4505_v27, %v4509_v44  ;;  %v4310_v45 = vld [vmem:[#allocation11 + $0x38] sm:$0xff] }
 0x46d   :  { %7871 = vmatprep.subr.bf16.mxu0 %v9099_v58  ;;  %v8797_v58 = vcombine.high %v4346_v40, %v4350_v15 }
 0x46f   :  { %7821 = vmatpush2.bf16.msra.mxu1 %v9002_v34  ;;  %v8954_v34 = vcombine.low %v4505_v27, %v4509_v44  ;;  %v4717_v27 = vld [vmem:[#allocation11 + $0xcf0] sm:$0xff]  ;;  %v4426_v44 = vld [vmem:[#allocation11 + $0x3d8] sm:$0xff] }
 0x470   :  { %7872 = vmatpush2.bf16.msra.mxu0 %v9098_v24  ;;  %7822 = vmatprep.subr.bf16.mxu1 %v8995_v2  ;;  %v8796_v24 = vcombine.low %v4346_v40, %v4350_v15  ;;  %v8947_v2 = vcombine.high %v4497_v42, %v4501_v61  ;;  %v4430_v40 = vld [vmem:[#allocation11 + $0x3f8] sm:$0xff]  ;;  %v4709_v42 = vld [vmem:[#allocation11 + $0xcb0] sm:$0xff] }
 0x471   :  { %7873 = vmatprep.subr.bf16.mxu0 %v9091_v6  ;;  %v8789_v6 = vcombine.high %v4338_v14, %v4342_v1  ;;  %v4418_v61 = vld [vmem:[#allocation11 + $0x398] sm:$0xff] }
 0x473   :  { %7823 = vmatpush2.bf16.msra.mxu1 %v8994_v4  ;;  %v8788_v4 = vcombine.low %v4338_v14, %v4342_v1  ;;  %v4422_v14 = vld [vmem:[#allocation11 + $0x3b8] sm:$0xff] }
 0x474   :  { %7874 = vmatpush2.bf16.msra.mxu0 %v9090_v37  ;;  %7824 = vmatprep.subr.bf16.mxu1 %v8987_v63  ;;  %v9195_v37 = vcombine.high %v4745_v39, %v4749_v22  ;;  %v4701_v39 = vld [vmem:[#allocation11 + $0xc70] sm:$0xff]  ;;  %v4410_v22 = vld [vmem:[#allocation11 + $0x358] sm:$0xff] }
 0x475   :  { %7875 = vmatprep.subr.bf16.mxu0 %v9083_v41  ;;  %v4737_v41 = vld [vmem:[#allocation11 + $0xd90] sm:$0xff] }
 0x476   :  { %v9186_v11 = vcombine.low %v4737_v41, %v4741_v38 }
 0x477   :  { %7825 = vmatpush2.bf16.msra.mxu1 %v8986_v7 }
 0x478   :  { %7876 = vmatpush2.bf16.msra.mxu0 %v9082_v56  ;;  %7826 = vmatprep.subr.bf16.mxu1 %v8979_v35  ;;  %v9187_v56 = vcombine.high %v4737_v41, %v4741_v38  ;;  %v8773_v35 = vcombine.high %v4322_v43, %v4326_v25  ;;  %v4693_v41 = vld [vmem:[#allocation11 + $0xc30] sm:$0xff]  ;;  %v4402_v38 = vld [vmem:[#allocation11 + $0x318] sm:$0xff] }
 0x479   :  { %7877 = vmatprep.subr.bf16.mxu0 %v9075_v23  ;;  %v4729_v23 = vld [vmem:[#allocation11 + $0xd50] sm:$0xff] }
 0x47a   :  { %v9178_v21 = vcombine.low %v4729_v23, %v4733_v17 }
 0x47b   :  { %7827 = vmatpush2.bf16.msra.mxu1 %v8978_v18  ;;  %v8772_v18 = vcombine.low %v4322_v43, %v4326_v25  ;;  %v4406_v43 = vld [vmem:[#allocation11 + $0x338] sm:$0xff] }
 0x47c   :  { %7878 = vmatpush2.bf16.msra.mxu0 %v9074_v31  ;;  %7828 = vmatprep.subr.bf16.mxu1 %v8971_v26  ;;  %v9179_v31 = vcombine.high %v4729_v23, %v4733_v17  ;;  %v8765_v26 = vcombine.high %v4314_v32, %v4318_v28  ;;  %v4813_v23 = vld [vmem:[#allocation11 + $0xff0] sm:$0xff]  ;;  %v4394_v17 = vld [vmem:[#allocation11 + $0x2d8] sm:$0xff] }
 0x47d   :  { %7933 = vmatprep.subr.bf16.mxu0 %v8813_v12  ;;  %v4721_v12 = vld [vmem:[#allocation11 + $0xd10] sm:$0xff] }
 0x47e   :  { %v9170_v15 = vcombine.low %v4721_v12, %v4725_v29 }
 0x47f   :  { %7829 = vmatpush2.bf16.msra.mxu1 %v8970_v36  ;;  %7880 = vmatmul.mubr.bf16.vlgmr.msra.gmra.mxu0 %v9789_v55  ;;  %v8764_v36 = vcombine.low %v4314_v32, %v4318_v28  ;;  %v4398_v32 = vld [vmem:[#allocation11 + $0x2f8] sm:$0xff] }
 0x480   :  { %7934 = vmatpush1.bf16.msra.mxu0 %v8812_v20  ;;  %7965 = vmatprep.mubr.bf16.mxu0 %v9740_v30  ;;  %v4330_v30 = vld [vmem:[#allocation11 + $0xd8] sm:$0xff]  ;;  %v9171_v20 = vcombine.high %v4721_v12, %v4725_v29  ;;  %v4805_v12 = vld [vmem:[#allocation11 + $0xfb0] sm:$0xff] }
 0x481   :  { %7830 = vmatprep.subr.bf16.mxu1 %v8963_v9  ;;  %7935 = vmatprep.subr.bf16.mxu0 %v8805_v10  ;;  %v8781_v63 = vcombine.high %v4330_v30, %v4334_v3  ;;  %v8780_v7 = vcombine.low %v4330_v30, %v4334_v3  ;;  %v8757_v9 = vcombine.high %v4306_v8, %v4310_v45  ;;  %v4713_v10 = vld [vmem:[#allocation11 + $0xcd0] sm:$0xff]  ;;  %v4414_v30 = vld [vmem:[#allocation11 + $0x378] sm:$0xff] }
 0x482   :  { %v9162_v1 = vcombine.low %v4713_v10, %v4717_v27  ;;  %v4386_v29 = vld [vmem:[#allocation11 + $0x298] sm:$0xff] }
 0x483   :  { %7831 = vmatpush2.bf16.msra.mxu1 %v8962_v57  ;;  %v8756_v57 = vcombine.low %v4306_v8, %v4310_v45  ;;  %v4390_v8 = vld [vmem:[#allocation11 + $0x2b8] sm:$0xff] }
 0x484   :  { %7936 = vmatpush1.bf16.msra.mxu0 %v8804_v53  ;;  %7832 = vmatprep.subr.bf16.mxu1 %v8955_v50  ;;  %v9163_v53 = vcombine.high %v4713_v10, %v4717_v27  ;;  %v8877_v50 = vcombine.high %v4426_v44, %v4430_v40  ;;  %v4797_v10 = vld [vmem:[#allocation11 + $0xf70] sm:$0xff]  ;;  %v4378_v27 = vld [vmem:[#allocation11 + $0x258] sm:$0xff] }
 0x485   :  { %7937 = vmatprep.subr.bf16.mxu0 %v8797_v58  ;;  %v4705_v58 = vld [vmem:[#allocation11 + $0xc90] sm:$0xff] }
 0x486   :  { %v9154_v3 = vcombine.low %v4705_v58, %v4709_v42 }
 0x487   :  { %7833 = vmatpush2.bf16.msra.mxu1 %v8954_v34  ;;  %v8876_v34 = vcombine.low %v4426_v44, %v4430_v40  ;;  %v4382_v44 = vld [vmem:[#allocation11 + $0x278] sm:$0xff] }
 0x488   :  { %7938 = vmatpush1.bf16.msra.mxu0 %v8796_v24  ;;  %7834 = vmatprep.subr.bf16.mxu1 %v8947_v2  ;;  %v9155_v24 = vcombine.high %v4705_v58, %v4709_v42  ;;  %v8869_v2 = vcombine.high %v4418_v61, %v4422_v14  ;;  %v4789_v58 = vld [vmem:[#allocation11 + $0xf30] sm:$0xff]  ;;  %v4370_v42 = vld [vmem:[#allocation11 + $0x218] sm:$0xff] }
 0x489   :  { %7939 = vmatprep.subr.bf16.mxu0 %v8789_v6  ;;  %v4697_v6 = vld [vmem:[#allocation11 + $0xc50] sm:$0xff] }
 0x48a   :  { %v9146_v25 = vcombine.low %v4697_v6, %v4701_v39 }
 0x48b   :  { %7835 = vmatpush2.bf16.msra.mxu1 %v8946_v54  ;;  %v8868_v54 = vcombine.low %v4418_v61, %v4422_v14  ;;  %v4374_v61 = vld [vmem:[#allocation11 + $0x238] sm:$0xff] }
 0x48c   :  { %7940 = vmatpush1.bf16.msra.mxu0 %v8788_v4  ;;  %7890 = vmatprep.subr.bf16.mxu1 %v9195_v37  ;;  %v9147_v4 = vcombine.high %v4697_v6, %v4701_v39  ;;  %v8861_v37 = vcombine.high %v4410_v22, %v4414_v30  ;;  %v4781_v6 = vld [vmem:[#allocation11 + $0xef0] sm:$0xff]  ;;  %v4618_v39 = vld [vmem:[#allocation11 + $0x9d8] sm:$0xff] }
 0x48d   :  { %7941 = vmatprep.subr.bf16.mxu0 %v8781_v63  ;;  %v4689_v63 = vld [vmem:[#allocation11 + $0xc10] sm:$0xff] }
 0x48e   :  { %7837 = vmatmul.mubr.bf16.vlgmr.msra.gmra.mxu1 %v9718_v16  ;;  %v9138_v28 = vcombine.low %v4689_v63, %v4693_v41 }
 0x48f   :  { %7891 = vmatpush1.bf16.msra.mxu1 %v9194_v5  ;;  %7922 = vmatprep.mubr.bf16.mxu1 %v9797_v52  ;;  %v8860_v5 = vcombine.low %v4410_v22, %v4414_v30  ;;  %v4622_v22 = vld [vmem:[#allocation11 + $0x9f8] sm:$0xff] }
 0x490   :  { %7942 = vmatpush1.bf16.msra.mxu0 %v8780_v7  ;;  %7892 = vmatprep.subr.bf16.mxu1 %v9187_v56  ;;  %v9139_v7 = vcombine.high %v4689_v63, %v4693_v41  ;;  %v8853_v56 = vcombine.high %v4402_v38, %v4406_v43  ;;  %v4773_v63 = vld [vmem:[#allocation11 + $0xeb0] sm:$0xff]  ;;  %v4610_v41 = vld [vmem:[#allocation11 + $0x998] sm:$0xff] }
 0x491   :  { %7943 = vmatprep.subr.bf16.mxu0 %v8773_v35  ;;  %v4809_v35 = vld [vmem:[#allocation11 + $0xfd0] sm:$0xff] }
 0x492   :  { %v9258_v45 = vcombine.low %v4809_v35, %v4813_v23 }
 0x493   :  { %7893 = vmatpush1.bf16.msra.mxu1 %v9186_v11  ;;  %v8852_v11 = vcombine.low %v4402_v38, %v4406_v43  ;;  %v4614_v38 = vld [vmem:[#allocation11 + $0x9b8] sm:$0xff] }
 0x494   :  { %7944 = vmatpush1.bf16.msra.mxu0 %v8772_v18  ;;  %7894 = vmatprep.subr.bf16.mxu1 %v9179_v31  ;;  %v9259_v18 = vcombine.high %v4809_v35, %v4813_v23  ;;  %v8845_v31 = vcombine.high %v4394_v17, %v4398_v32  ;;  %v4765_v35 = vld [vmem:[#allocation11 + $0xe70] sm:$0xff]  ;;  %v4602_v23 = vld [vmem:[#allocation11 + $0x958] sm:$0xff] }
 0x495   :  { %7945 = vmatprep.subr.bf16.mxu0 %v8765_v26  ;;  %v4801_v26 = vld [vmem:[#allocation11 + $0xf90] sm:$0xff] }
 0x496   :  { %v9250_v40 = vcombine.low %v4801_v26, %v4805_v12 }
 0x497   :  { %7895 = vmatpush1.bf16.msra.mxu1 %v9178_v21  ;;  %v8844_v21 = vcombine.low %v4394_v17, %v4398_v32  ;;  %v4606_v17 = vld [vmem:[#allocation11 + $0x978] sm:$0xff] }
 0x498   :  { %7946 = vmatpush1.bf16.msra.mxu0 %v8764_v36  ;;  %7896 = vmatprep.subr.bf16.mxu1 %v9171_v20  ;;  %v9251_v36 = vcombine.high %v4801_v26, %v4805_v12  ;;  %v8837_v20 = vcombine.high %v4386_v29, %v4390_v8  ;;  %v4757_v26 = vld [vmem:[#allocation11 + $0xe30] sm:$0xff]  ;;  %v4594_v12 = vld [vmem:[#allocation11 + $0x918] sm:$0xff] }
 0x499   :  { %7947 = vmatprep.subr.bf16.mxu0 %v8757_v9  ;;  %v4793_v9 = vld [vmem:[#allocation11 + $0xf50] sm:$0xff] }
 0x49a   :  { %v9242_v14 = vcombine.low %v4793_v9, %v4797_v10 }
 0x49b   :  { %7897 = vmatpush1.bf16.msra.mxu1 %v9170_v15  ;;  %v8836_v15 = vcombine.low %v4386_v29, %v4390_v8  ;;  %v4598_v29 = vld [vmem:[#allocation11 + $0x938] sm:$0xff] }
 0x49c   :  { %7948 = vmatpush1.bf16.msra.mxu0 %v8756_v57  ;;  %7898 = vmatprep.subr.bf16.mxu1 %v9163_v53  ;;  %v9243_v57 = vcombine.high %v4793_v9, %v4797_v10  ;;  %v8829_v53 = vcombine.high %v4378_v27, %v4382_v44  ;;  %v4590_v9 = vld [vmem:[#allocation11 + $0x8f8] sm:$0xff] }
 0x49d   :  { %7949 = vmatprep.subr.bf16.mxu0 %v8877_v50  ;;  %v4785_v50 = vld [vmem:[#allocation11 + $0xf10] sm:$0xff] }
 0x49e   :  { %v9234_v30 = vcombine.low %v4785_v50, %v4789_v58 }
 0x49f   :  { %7899 = vmatpush1.bf16.msra.mxu1 %v9162_v1  ;;  %v8828_v1 = vcombine.low %v4378_v27, %v4382_v44  ;;  %v9044_v27 = vcombine.low %v4594_v12, %v4598_v29 }
 0x4a0   :  { %7950 = vmatpush2.bf16.msra.mxu0 %v8876_v34  ;;  %7900 = vmatprep.subr.bf16.mxu1 %v9155_v24  ;;  %v9235_v34 = vcombine.high %v4785_v50, %v4789_v58  ;;  %v8821_v24 = vcombine.high %v4370_v42, %v4374_v61  ;;  %v4582_v50 = vld [vmem:[#allocation11 + $0x8b8] sm:$0xff] }
 0x4a1   :  { %7951 = vmatprep.subr.bf16.mxu0 %v8869_v2  ;;  %v4777_v2 = vld [vmem:[#allocation11 + $0xed0] sm:$0xff] }
 0x4a2   :  { %v9226_v43 = vcombine.low %v4777_v2, %v4781_v6 }
 0x4a3   :  { %7901 = vmatpush1.bf16.msra.mxu1 %v9154_v3  ;;  %v8820_v3 = vcombine.low %v4370_v42, %v4374_v61 }
 0x4a4   :  { %7952 = vmatpush2.bf16.msra.mxu0 %v8868_v54  ;;  %7902 = vmatprep.subr.bf16.mxu1 %v9147_v4  ;;  %v9227_v54 = vcombine.high %v4777_v2, %v4781_v6  ;;  %v9069_v4 = vcombine.high %v4618_v39, %v4622_v22  ;;  %v4574_v2 = vld [vmem:[#allocation11 + $0x878] sm:$0xff] }
 0x4a5   :  { %7953 = vmatprep.subr.bf16.mxu0 %v8861_v37  ;;  %v4769_v37 = vld [vmem:[#allocation11 + $0xe90] sm:$0xff] }
 0x4a6   :  { %v9218_v32 = vcombine.low %v4769_v37, %v4773_v63 }
 0x4a7   :  { %7903 = vmatpush1.bf16.msra.mxu1 %v9146_v25  ;;  %v9068_v25 = vcombine.low %v4618_v39, %v4622_v22 }
 0x4a8   :  { %7954 = vmatpush2.bf16.msra.mxu0 %v8860_v5  ;;  %7904 = vmatprep.subr.bf16.mxu1 %v9139_v7  ;;  %v9219_v5 = vcombine.high %v4769_v37, %v4773_v63  ;;  %v9061_v7 = vcombine.high %v4610_v41, %v4614_v38  ;;  %v4566_v37 = vld [vmem:[#allocation11 + $0x838] sm:$0xff] }
 0x4a9   :  { %7955 = vmatprep.subr.bf16.mxu0 %v8853_v56  ;;  %v4761_v56 = vld [vmem:[#allocation11 + $0xe50] sm:$0xff] }
 0x4aa   :  { %v9210_v8 = vcombine.low %v4761_v56, %v4765_v35 }
 0x4ab   :  { %7905 = vmatpush1.bf16.msra.mxu1 %v9138_v28  ;;  %v9060_v28 = vcombine.low %v4610_v41, %v4614_v38 }
 0x4ac   :  { %7956 = vmatpush2.bf16.msra.mxu0 %v8852_v11  ;;  %7906 = vmatprep.subr.bf16.mxu1 %v9259_v18  ;;  %v9211_v11 = vcombine.high %v4761_v56, %v4765_v35  ;;  %v9053_v18 = vcombine.high %v4602_v23, %v4606_v17 }
 0x4ad   :  { %7957 = vmatprep.subr.bf16.mxu0 %v8845_v31  ;;  %v4753_v31 = vld [vmem:[#allocation11 + $0xe10] sm:$0xff] }
 0x4ae   :  { %v9202_v10 = vcombine.low %v4753_v31, %v4757_v26 }
 0x4af   :  { %7907 = vmatpush2.bf16.msra.mxu1 %v9258_v45  ;;  %v9052_v45 = vcombine.low %v4602_v23, %v4606_v17 }
 0x4b0   :  { %7958 = vmatpush2.bf16.msra.mxu0 %v8844_v21  ;;  %7908 = vmatprep.subr.bf16.mxu1 %v9251_v36  ;;  %v9203_v21 = vcombine.high %v4753_v31, %v4757_v26  ;;  %v4490_v36 = vld [vmem:[#allocation11 + $0x5d8] sm:$0xff] }
 0x4b1   :  { %7959 = vmatprep.subr.bf16.mxu0 %v8837_v20  ;;  %v4494_v20 = vld [vmem:[#allocation11 + $0x5f8] sm:$0xff] }
 0x4b2   :  { %v8941_v44 = vcombine.high %v4490_v36, %v4494_v20  ;;  %v8940_v58 = vcombine.low %v4490_v36, %v4494_v20 }
 0x4b3   :  { %7909 = vmatpush2.bf16.msra.mxu1 %v9250_v40 }
 0x4b4   :  { %7960 = vmatpush2.bf16.msra.mxu0 %v8836_v15  ;;  %7910 = vmatprep.subr.bf16.mxu1 %v9243_v57  ;;  %v4482_v15 = vld [vmem:[#allocation11 + $0x598] sm:$0xff] }
 0x4b5   :  { %7961 = vmatprep.subr.bf16.mxu0 %v8829_v53  ;;  %v4486_v57 = vld [vmem:[#allocation11 + $0x5b8] sm:$0xff] }
 0x4b6   :  { %v4578_v53 = vld [vmem:[#allocation11 + $0x898] sm:$0xff]  ;;  %v8933_v61 = vcombine.high %v4482_v15, %v4486_v57  ;;  %v8932_v6 = vcombine.low %v4482_v15, %v4486_v57 }
 0x4b7   :  { %7911 = vmatpush2.bf16.msra.mxu1 %v9242_v14  ;;  %v9029_v14 = vcombine.high %v4578_v53, %v4582_v50  ;;  %v9028_v39 = vcombine.low %v4578_v53, %v4582_v50 }
 0x4b8   :  { %7962 = vmatpush2.bf16.msra.mxu0 %v8828_v1  ;;  %7912 = vmatprep.subr.bf16.mxu1 %v9235_v34  ;;  %v4474_v1 = vld [vmem:[#allocation11 + $0x558] sm:$0xff] }
 0x4b9   :  { %7963 = vmatprep.subr.bf16.mxu0 %v8821_v24  ;;  %v4478_v34 = vld [vmem:[#allocation11 + $0x578] sm:$0xff] }
 0x4ba   :  { %v4570_v24 = vld [vmem:[#allocation11 + $0x858] sm:$0xff]  ;;  %v8925_v22 = vcombine.high %v4474_v1, %v4478_v34  ;;  %v8924_v63 = vcombine.low %v4474_v1, %v4478_v34 }
 0x4bb   :  { %7913 = vmatpush2.bf16.msra.mxu1 %v9234_v30  ;;  %v9021_v30 = vcombine.high %v4570_v24, %v4574_v2  ;;  %v9020_v41 = vcombine.low %v4570_v24, %v4574_v2 }
 0x4bc   :  { %7964 = vmatpush2.bf16.msra.mxu0 %v8820_v3  ;;  %7914 = vmatprep.subr.bf16.mxu1 %v9227_v54  ;;  %v4466_v3 = vld [vmem:[#allocation11 + $0x518] sm:$0xff] }
 0x4bd   :  { %8019 = vmatprep.subr.bf16.mxu0 %v9069_v4  ;;  %v4470_v54 = vld [vmem:[#allocation11 + $0x538] sm:$0xff] }
 0x4be   :  { %v4562_v4 = vld [vmem:[#allocation11 + $0x818] sm:$0xff]  ;;  %v8917_v38 = vcombine.high %v4466_v3, %v4470_v54  ;;  %v8916_v56 = vcombine.low %v4466_v3, %v4470_v54 }
 0x4bf   :  { %7915 = vmatpush2.bf16.msra.mxu1 %v9226_v43  ;;  %7966 = vmatmul.mubr.bf16.vlgmr.msra.gmra.mxu0 %v9684_v46  ;;  %v9045_v46 = vcombine.high %v4594_v12, %v4598_v29  ;;  %v9013_v43 = vcombine.high %v4562_v4, %v4566_v37  ;;  %v9012_v35 = vcombine.low %v4562_v4, %v4566_v37 }
 0x4c0   :  { %8020 = vmatpush1.bf16.msra.mxu0 %v9068_v25  ;;  %8051 = vmatprep.mubr.bf16.mxu0 %v9768_v33  ;;  %v4586_v33 = vld [vmem:[#allocation11 + $0x8d8] sm:$0xff] }
 0x4c1   :  { %7916 = vmatprep.subr.bf16.mxu1 %v9219_v5  ;;  %8021 = vmatprep.subr.bf16.mxu0 %v9061_v7  ;;  %v9037_v40 = vcombine.high %v4586_v33, %v4590_v9  ;;  %v9036_v42 = vcombine.low %v4586_v33, %v4590_v9  ;;  %v4462_v25 = vld [vmem:[#allocation11 + $0x4f8] sm:$0xff] }
 0x4c2   :  { %v4682_v5 = vld [vmem:[#allocation11 + $0xbd8] sm:$0xff] }
 0x4c3   :  { %7917 = vmatpush2.bf16.msra.mxu1 %v9218_v32  ;;  %v4686_v7 = vld [vmem:[#allocation11 + $0xbf8] sm:$0xff] }
 0x4c4   :  { %8022 = vmatpush1.bf16.msra.mxu0 %v9060_v28  ;;  %7918 = vmatprep.subr.bf16.mxu1 %v9211_v11  ;;  %v9133_v17 = vcombine.high %v4682_v5, %v4686_v7  ;;  %v4450_v32 = vld [vmem:[#allocation11 + $0x498] sm:$0xff]  ;;  %v9132_v26 = vcombine.low %v4682_v5, %v4686_v7 }
 0x4c5   :  { %8023 = vmatprep.subr.bf16.mxu0 %v9053_v18  ;;  %v4454_v28 = vld [vmem:[#allocation11 + $0x4b8] sm:$0xff] }
 0x4c6   :  { %v4674_v11 = vld [vmem:[#allocation11 + $0xb98] sm:$0xff]  ;;  %v8901_v12 = vcombine.high %v4450_v32, %v4454_v28  ;;  %v8900_v36 = vcombine.low %v4450_v32, %v4454_v28 }
 0x4c7   :  { %7919 = vmatpush2.bf16.msra.mxu1 %v9210_v8  ;;  %v4678_v18 = vld [vmem:[#allocation11 + $0xbb8] sm:$0xff] }
 0x4c8   :  { %8024 = vmatpush1.bf16.msra.mxu0 %v9052_v45  ;;  %7920 = vmatprep.subr.bf16.mxu1 %v9203_v21  ;;  %v9125_v29 = vcombine.high %v4674_v11, %v4678_v18  ;;  %v4442_v8 = vld [vmem:[#allocation11 + $0x458] sm:$0xff]  ;;  %v9124_v20 = vcombine.low %v4674_v11, %v4678_v18 }
 0x4c9   :  { %8025 = vmatprep.subr.bf16.mxu0 %v9045_v46  ;;  %v4446_v45 = vld [vmem:[#allocation11 + $0x478] sm:$0xff] }
 0x4ca   :  { %v4666_v21 = vld [vmem:[#allocation11 + $0xb58] sm:$0xff]  ;;  %v8893_v33 = vcombine.high %v4442_v8, %v4446_v45  ;;  %v8892_v15 = vcombine.low %v4442_v8, %v4446_v45 }
 0x4cb   :  { %7921 = vmatpush2.bf16.msra.mxu1 %v9202_v10  ;;  %v4670_v46 = vld [vmem:[#allocation11 + $0xb78] sm:$0xff] }
 0x4cc   :  { %8026 = vmatpush1.bf16.msra.mxu0 %v9044_v27  ;;  %7976 = vmatprep.subr.bf16.mxu1 %v8941_v44  ;;  %v9117_v9 = vcombine.high %v4666_v21, %v4670_v46  ;;  %v4434_v10 = vld [vmem:[#allocation11 + $0x418] sm:$0xff]  ;;  %v9116_v57 = vcombine.low %v4666_v21, %v4670_v46 }
 0x4cd   :  { %8027 = vmatprep.subr.bf16.mxu0 %v9037_v40  ;;  %v4438_v27 = vld [vmem:[#allocation11 + $0x438] sm:$0xff] }
 0x4ce   :  { %7923 = vmatmul.mubr.bf16.vlgmr.msra.gmra.mxu1 %v9799_v13  ;;  %v4658_v44 = vld [vmem:[#allocation11 + $0xb18] sm:$0xff]  ;;  %v8885_v53 = vcombine.high %v4434_v10, %v4438_v27  ;;  %v8884_v1 = vcombine.low %v4434_v10, %v4438_v27 }
 0x4cf   :  { %7977 = vmatpush1.bf16.msra.mxu1 %v8940_v58  ;;  %8008 = vmatprep.mubr.bf16.mxu1 %v9743_v19  ;;  %v4458_v19 = vld [vmem:[#allocation11 + $0x4d8] sm:$0xff] }
 0x4d0   :  { %8028 = vmatpush1.bf16.msra.mxu0 %v9036_v42  ;;  %7978 = vmatprep.subr.bf16.mxu1 %v8933_v61  ;;  %v8909_v23 = vcombine.high %v4458_v19, %v4462_v25  ;;  %v8908_v31 = vcombine.low %v4458_v19, %v4462_v25  ;;  %v4662_v40 = vld [vmem:[#allocation11 + $0xb38] sm:$0xff] }
 0x4d1   :  { %8029 = vmatprep.subr.bf16.mxu0 %v9029_v14  ;;  %v9109_v50 = vcombine.high %v4658_v44, %v4662_v40  ;;  %v4554_v58 = vld [vmem:[#allocation11 + $0x7d8] sm:$0xff]  ;;  %v9108_v34 = vcombine.low %v4658_v44, %v4662_v40 }
 0x4d2   :  { %v4558_v42 = vld [vmem:[#allocation11 + $0x7f8] sm:$0xff] }
 0x4d3   :  { %7979 = vmatpush1.bf16.msra.mxu1 %v8932_v6  ;;  %v4650_v61 = vld [vmem:[#allocation11 + $0xad8] sm:$0xff]  ;;  %v9005_v24 = vcombine.high %v4554_v58, %v4558_v42  ;;  %v9004_v3 = vcombine.low %v4554_v58, %v4558_v42 }
 0x4d4   :  { %8030 = vmatpush1.bf16.msra.mxu0 %v9028_v39  ;;  %7980 = vmatprep.subr.bf16.mxu1 %v8925_v22  ;;  %v4654_v14 = vld [vmem:[#allocation11 + $0xaf8] sm:$0xff] }
 0x4d5   :  { %8031 = vmatprep.subr.bf16.mxu0 %v9021_v30  ;;  %v9101_v2 = vcombine.high %v4650_v61, %v4654_v14  ;;  %v4546_v6 = vld [vmem:[#allocation11 + $0x798] sm:$0xff]  ;;  %v9100_v54 = vcombine.low %v4650_v61, %v4654_v14 }
 0x4d6   :  { %v4550_v39 = vld [vmem:[#allocation11 + $0x7b8] sm:$0xff] }
 0x4d7   :  { %7981 = vmatpush1.bf16.msra.mxu1 %v8924_v63  ;;  %v4642_v22 = vld [vmem:[#allocation11 + $0xa98] sm:$0xff]  ;;  %v8997_v4 = vcombine.high %v4546_v6, %v4550_v39  ;;  %v8996_v19 = vcombine.low %v4546_v6, %v4550_v39 }
 0x4d8   :  { %8032 = vmatpush1.bf16.msra.mxu0 %v9020_v41  ;;  %7982 = vmatprep.subr.bf16.mxu1 %v8917_v38  ;;  %v4646_v30 = vld [vmem:[#allocation11 + $0xab8] sm:$0xff] }
 0x4d9   :  { %8033 = vmatprep.subr.bf16.mxu0 %v9013_v43  ;;  %v9093_v37 = vcombine.high %v4642_v22, %v4646_v30  ;;  %v4538_v63 = vld [vmem:[#allocation11 + $0x758] sm:$0xff]  ;;  %v9092_v25 = vcombine.low %v4642_v22, %v4646_v30 }
 0x4da   :  { %v4542_v41 = vld [vmem:[#allocation11 + $0x778] sm:$0xff] }
 0x4db   :  { %7983 = vmatpush1.bf16.msra.mxu1 %v8916_v56  ;;  %v4634_v38 = vld [vmem:[#allocation11 + $0xa58] sm:$0xff]  ;;  %v8989_v5 = vcombine.high %v4538_v63, %v4542_v41  ;;  %v8988_v32 = vcombine.low %v4538_v63, %v4542_v41 }
 0x4dc   :  { %8034 = vmatpush1.bf16.msra.mxu0 %v9012_v35  ;;  %7984 = vmatprep.subr.bf16.mxu1 %v8909_v23  ;;  %v4638_v43 = vld [vmem:[#allocation11 + $0xa78] sm:$0xff] }
 0x4dd   :  { %8035 = vmatprep.subr.bf16.mxu0 %v9133_v17  ;;  %v9085_v7 = vcombine.high %v4634_v38, %v4638_v43  ;;  %v4530_v56 = vld [vmem:[#allocation11 + $0x718] sm:$0xff]  ;;  %v9084_v28 = vcombine.low %v4634_v38, %v4638_v43 }
 0x4de   :  { %v4534_v35 = vld [vmem:[#allocation11 + $0x738] sm:$0xff] }
 0x4df   :  { %7985 = vmatpush1.bf16.msra.mxu1 %v8908_v31  ;;  %v4626_v23 = vld [vmem:[#allocation11 + $0xa18] sm:$0xff]  ;;  %v8981_v11 = vcombine.high %v4530_v56, %v4534_v35 }
 0x4e0   :  { %8036 = vmatpush2.bf16.msra.mxu0 %v9132_v26  ;;  %7986 = vmatprep.subr.bf16.mxu1 %v8901_v12  ;;  %v4630_v17 = vld [vmem:[#allocation11 + $0xa38] sm:$0xff]  ;;  %v8980_v12 = vcombine.low %v4530_v56, %v4534_v35 }
 0x4e1   :  { %8037 = vmatprep.subr.bf16.mxu0 %v9125_v29  ;;  %v9077_v18 = vcombine.high %v4626_v23, %v4630_v17  ;;  %v4522_v31 = vld [vmem:[#allocation11 + $0x6d8] sm:$0xff]  ;;  %v9076_v29 = vcombine.low %v4626_v23, %v4630_v17 }
 0x4e2   :  { %v4526_v26 = vld [vmem:[#allocation11 + $0x6f8] sm:$0xff] }
 0x4e3   :  { %7987 = vmatpush1.bf16.msra.mxu1 %v8900_v36  ;;  %v8973_v8 = vcombine.high %v4522_v31, %v4526_v26  ;;  %v4514_v45 = vld [vmem:[#allocation11 + $0x698] sm:$0xff]  ;;  %v8972_v46 = vcombine.low %v4522_v31, %v4526_v26 }
 0x4e4   :  { %8038 = vmatpush2.bf16.msra.mxu0 %v9124_v20  ;;  %7988 = vmatprep.subr.bf16.mxu1 %v8893_v33  ;;  %v4518_v21 = vld [vmem:[#allocation11 + $0x6b8] sm:$0xff] }
 0x4e5   :  { %8039 = vmatprep.subr.bf16.mxu0 %v9117_v9  ;;  %v8965_v36 = vcombine.high %v4514_v45, %v4518_v21  ;;  %v4506_v20 = vld [vmem:[#allocation11 + $0x658] sm:$0xff]  ;;  %v8964_v9 = vcombine.low %v4514_v45, %v4518_v21 }
 0x4e6   :  { %v4510_v33 = vld [vmem:[#allocation11 + $0x678] sm:$0xff] }
 0x4e7   :  { %7989 = vmatpush1.bf16.msra.mxu1 %v8892_v15  ;;  %v8957_v10 = vcombine.high %v4506_v20, %v4510_v33  ;;  %v4498_v27 = vld [vmem:[#allocation11 + $0x618] sm:$0xff]  ;;  %v8956_v40 = vcombine.low %v4506_v20, %v4510_v33 }
 0x4e8   :  { %8040 = vmatpush2.bf16.msra.mxu0 %v9116_v57  ;;  %7990 = vmatprep.subr.bf16.mxu1 %v8885_v53  ;;  %v4502_v44 = vld [vmem:[#allocation11 + $0x638] sm:$0xff] }
 0x4e9   :  { %8041 = vmatprep.subr.bf16.mxu0 %v9109_v50  ;;  %v8949_v15 = vcombine.high %v4498_v27, %v4502_v44  ;;  %v4746_v57 = vld [vmem:[#allocation11 + $0xdd8] sm:$0xff]  ;;  %v8948_v50 = vcombine.low %v4498_v27, %v4502_v44 }
 0x4ea   :  { %v4750_v53 = vld [vmem:[#allocation11 + $0xdf8] sm:$0xff] }
 0x4eb   :  { %7991 = vmatpush1.bf16.msra.mxu1 %v8884_v1  ;;  %v9197_v58 = vcombine.high %v4746_v57, %v4750_v53  ;;  %v4738_v42 = vld [vmem:[#allocation11 + $0xd98] sm:$0xff]  ;;  %v9196_v14 = vcombine.low %v4746_v57, %v4750_v53 }
 0x4ec   :  { %8042 = vmatpush2.bf16.msra.mxu0 %v9108_v34  ;;  %7992 = vmatprep.subr.bf16.mxu1 %v9005_v24  ;;  %v4742_v61 = vld [vmem:[#allocation11 + $0xdb8] sm:$0xff] }
 0x4ed   :  { %8043 = vmatprep.subr.bf16.mxu0 %v9101_v2  ;;  %v4730_v1 = vld [vmem:[#allocation11 + $0xd58] sm:$0xff]  ;;  %v9188_v24 = vcombine.low %v4738_v42, %v4742_v61 }
 0x4ee   :  { %v4734_v34 = vld [vmem:[#allocation11 + $0xd78] sm:$0xff] }
 0x4ef   :  { %7993 = vmatpush2.bf16.msra.mxu1 %v9004_v3  ;;  %v9181_v2 = vcombine.high %v4730_v1, %v4734_v34  ;;  %v4722_v6 = vld [vmem:[#allocation11 + $0xd18] sm:$0xff]  ;;  %v9180_v22 = vcombine.low %v4730_v1, %v4734_v34 }
 0x4f0   :  { %8044 = vmatpush2.bf16.msra.mxu0 %v9100_v54  ;;  %7994 = vmatprep.subr.bf16.mxu1 %v8997_v4  ;;  %v4726_v39 = vld [vmem:[#allocation11 + $0xd38] sm:$0xff] }
 0x4f1   :  { %8045 = vmatprep.subr.bf16.mxu0 %v9093_v37  ;;  %v9173_v30 = vcombine.high %v4722_v6, %v4726_v39  ;;  %v4714_v3 = vld [vmem:[#allocation11 + $0xcd8] sm:$0xff]  ;;  %v9172_v4 = vcombine.low %v4722_v6, %v4726_v39  ;;  %v7494_v6 = vpop.f32.mrf.mxu1 }
 0x4f2   :  { %v4718_v54 = vld [vmem:[#allocation11 + $0xcf8] sm:$0xff] }
 0x4f3   :  { %7995 = vmatpush2.bf16.msra.mxu1 %v8996_v19  ;;  %v9165_v37 = vcombine.high %v4714_v3, %v4718_v54  ;;  %v4706_v63 = vld [vmem:[#allocation11 + $0xc98] sm:$0xff]  ;;  %v9164_v41 = vcombine.low %v4714_v3, %v4718_v54 }
 0x4f4   :  { %8046 = vmatpush2.bf16.msra.mxu0 %v9092_v25  ;;  %7996 = vmatprep.subr.bf16.mxu1 %v8989_v5  ;;  %v4698_v38 = vld [vmem:[#allocation11 + $0xc58] sm:$0xff] }
 0x4f5   :  { %8047 = vmatprep.subr.bf16.mxu0 %v9085_v7  ;;  %v4702_v43 = vld [vmem:[#allocation11 + $0xc78] sm:$0xff] }
 0x4f6   :  { %v9149_v25 = vcombine.high %v4698_v38, %v4702_v43  ;;  %v4690_v5 = vld [vmem:[#allocation11 + $0xc18] sm:$0xff]  ;;  %v9148_v56 = vcombine.low %v4698_v38, %v4702_v43 }
 0x4f7   :  { %7997 = vmatpush2.bf16.msra.mxu1 %v8988_v32  ;;  %v4694_v7 = vld [vmem:[#allocation11 + $0xc38] sm:$0xff] }
 0x4f8   :  { %8048 = vmatpush2.bf16.msra.mxu0 %v9084_v28  ;;  %7998 = vmatprep.subr.bf16.mxu1 %v8981_v11  ;;  %v9141_v35 = vcombine.high %v4690_v5, %v4694_v7  ;;  %v4810_v23 = vld [vmem:[#allocation11 + $0xfd8] sm:$0xff]  ;;  %v9140_v32 = vcombine.low %v4690_v5, %v4694_v7 }
 0x4f9   :  { %8049 = vmatprep.subr.bf16.mxu0 %v9077_v18  ;;  %v4814_v17 = vld [vmem:[#allocation11 + $0xff8] sm:$0xff] }
 0x4fa   :  { %v9261_v28 = vcombine.high %v4810_v23, %v4814_v17  ;;  %v4802_v11 = vld [vmem:[#allocation11 + $0xf98] sm:$0xff]  ;;  %v9260_v31 = vcombine.low %v4810_v23, %v4814_v17 }
 0x4fb   :  { %7999 = vmatpush2.bf16.msra.mxu1 %v8980_v12  ;;  %v4806_v18 = vld [vmem:[#allocation11 + $0xfb8] sm:$0xff] }
 0x4fc   :  { %8050 = vmatpush2.bf16.msra.mxu0 %v9076_v29  ;;  %8000 = vmatprep.subr.bf16.mxu1 %v8973_v8  ;;  %v9253_v26 = vcombine.high %v4802_v11, %v4806_v18  ;;  %v4794_v12 = vld [vmem:[#allocation11 + $0xf58] sm:$0xff]  ;;  %v9252_v8 = vcombine.low %v4802_v11, %v4806_v18 }
 0x4fd   :  { %v4798_v29 = vld [vmem:[#allocation11 + $0xf78] sm:$0xff] }
 0x4fe   :  { %v9245_v45 = vcombine.high %v4794_v12, %v4798_v29  ;;  %v4786_v21 = vld [vmem:[#allocation11 + $0xf18] sm:$0xff] }
 0x4ff   :  { %8001 = vmatpush2.bf16.msra.mxu1 %v8972_v46  ;;  %8052 = vmatmul.mubr.bf16.vlgmr.msra.gmra.mxu0 %v9789_v55  ;;  %v9189_v55 = vcombine.high %v4738_v42, %v4742_v61  ;;  %v4790_v46 = vld [vmem:[#allocation11 + $0xf38] sm:$0xff] }
 0x500   :  { %8002 = vmatprep.subr.bf16.mxu1 %v8965_v36  ;;  %v9244_v36 = vcombine.low %v4794_v12, %v4798_v29  ;;  %v9237_v20 = vcombine.high %v4786_v21, %v4790_v46  ;;  %v4778_v33 = vld [vmem:[#allocation11 + $0xed8] sm:$0xff] }
 0x501   :  { %v4770_v44 = vld [vmem:[#allocation11 + $0xe98] sm:$0xff] }
 0x502   :  { %v4762_v53 = vld [vmem:[#allocation11 + $0xe58] sm:$0xff] }
 0x503   :  { %8003 = vmatpush2.bf16.msra.mxu1 %v8964_v9  ;;  %v4782_v9 = vld [vmem:[#allocation11 + $0xef8] sm:$0xff] }
 0x504   :  { %8004 = vmatprep.subr.bf16.mxu1 %v8957_v10  ;;  %v9236_v10 = vcombine.low %v4786_v21, %v4790_v46  ;;  %v9229_v27 = vcombine.high %v4778_v33, %v4782_v9  ;;  %v4754_v61 = vld [vmem:[#allocation11 + $0xe18] sm:$0xff] }
 0x507   :  { %8005 = vmatpush2.bf16.msra.mxu1 %v8956_v40  ;;  %v4774_v40 = vld [vmem:[#allocation11 + $0xeb8] sm:$0xff] }
 0x508   :  { %8006 = vmatprep.subr.bf16.mxu1 %v8949_v15  ;;  %v9228_v15 = vcombine.low %v4778_v33, %v4782_v9  ;;  %v9221_v57 = vcombine.high %v4770_v44, %v4774_v40 }
 0x50b   :  { %8007 = vmatpush2.bf16.msra.mxu1 %v8948_v50  ;;  %v4766_v50 = vld [vmem:[#allocation11 + $0xe78] sm:$0xff] }
 0x50c   :  { %8062 = vmatprep.subr.bf16.mxu1 %v9197_v58  ;;  %v9220_v58 = vcombine.low %v4770_v44, %v4774_v40  ;;  %v9213_v42 = vcombine.high %v4762_v53, %v4766_v50 }
 0x50e   :  { %8009 = vmatmul.mubr.bf16.vlgmr.msra.gmra.mxu1 %v9718_v16  ;;  %v4710_v16 = vld [vmem:[#allocation11 + $0xcb8] sm:$0xff] }
 0x50f   :  { %8063 = vmatpush1.bf16.msra.mxu1 %v9196_v14  ;;  %8094 = vmatprep.mubr.bf16.mxu1 %v9797_v52  ;;  %v9157_v52 = vcombine.high %v4706_v63, %v4710_v16  ;;  %v9156_v19 = vcombine.low %v4706_v63, %v4710_v16  ;;  %v4758_v14 = vld [vmem:[#allocation11 + $0xe38] sm:$0xff] }
 0x510   :  { %8064 = vmatprep.subr.bf16.mxu1 %v9189_v55  ;;  %v9212_v55 = vcombine.low %v4762_v53, %v4766_v50  ;;  %v9205_v1 = vcombine.high %v4754_v61, %v4758_v14  ;;  %v9204_v34 = vcombine.low %v4754_v61, %v4758_v14 }
 0x513   :  { %8065 = vmatpush1.bf16.msra.mxu1 %v9188_v24  ;;  %v7451_v24 = vpop.f32.mrf.mxu0 }
 0x514   :  { %8066 = vmatprep.subr.bf16.mxu1 %v9181_v2 }
 0x515   :  { %v7453_v2 = vpop.f32.mrf.mxu0 }
 0x517   :  { %8067 = vmatpush1.bf16.msra.mxu1 %v9180_v22  ;;  %v7455_v39 = vpop.f32.mrf.mxu0  ;;  %v7496_v22 = vpop.f32.mrf.mxu1 }
 0x518   :  { %8068 = vmatprep.subr.bf16.mxu1 %v9173_v30 }
 0x519   :  { %v7457_v30 = vpop.f32.mrf.mxu0  ;;  %v9827_v54 = vpop.f32.mrf.mxu1 }
 0x51b   :  { %8069 = vmatpush1.bf16.msra.mxu1 %v9172_v4  ;;  %v7537_v3 = vpop.f32.mrf.mxu0 }
 0x51c   :  { %8070 = vmatprep.subr.bf16.mxu1 %v9165_v37  ;;  %v7500_v37 = vpop.f32.mrf.mxu1 }
 0x51d   :  { %v7539_v4 = vpop.f32.mrf.mxu0 }
 0x51e   :  { %v7580_v16 = vpop.f32.mrf.mxu1 }
 0x51f   :  { %8071 = vmatpush1.bf16.msra.mxu1 %v9164_v41  ;;  %v9829_v63 = vpop.f32.mrf.mxu0 }
 0x520   :  { %8072 = vmatprep.subr.bf16.mxu1 %v9157_v52  ;;  %v7582_v52 = vpop.f32.mrf.mxu1 }
 0x521   :  { %v9831_v41 = vpop.f32.mrf.mxu0 }
 0x522   :  { %v9833_v43 = vpop.f32.mrf.mxu1 }
 0x523   :  { %8073 = vmatpush1.bf16.msra.mxu1 %v9156_v19  ;;  %v7623_v38 = vpop.f32.mrf.mxu0 }
 0x524   :  { %8074 = vmatprep.subr.bf16.mxu1 %v9149_v25  ;;  %v9835_v19 = vpop.f32.mrf.mxu1 }
 0x526   :  { %v7666_v5 = vpop.f32.mrf.mxu1 }
 0x527   :  { %8075 = vmatpush1.bf16.msra.mxu1 %v9148_v56 }
 0x528   :  { %8076 = vmatprep.subr.bf16.mxu1 %v9141_v35  ;;  %v7668_v56 = vpop.f32.mrf.mxu1 }
 0x52a   :  { %v7670_v23 = vpop.f32.mrf.mxu1 }
 0x52b   :  { %8077 = vmatpush1.bf16.msra.mxu1 %v9140_v32 }
 0x52c   :  { %8078 = vmatprep.subr.bf16.mxu1 %v9261_v28  ;;  %v9839_v32 = vpop.f32.mrf.mxu1 }
 0x52e   :  { %v7752_v11 = vpop.f32.mrf.mxu1 }
 0x52f   :  { %8079 = vmatpush2.bf16.msra.mxu1 %v9260_v31 }
 0x530   :  { %8080 = vmatprep.subr.bf16.mxu1 %v9253_v26  ;;  %v9843_v31 = vpop.f32.mrf.mxu1 }
 0x532   :  { %v9845_v12 = vpop.f32.mrf.mxu1 }
 0x533   :  { %8081 = vmatpush2.bf16.msra.mxu1 %v9252_v8 }
 0x534   :  { %8082 = vmatprep.subr.bf16.mxu1 %v9245_v45  ;;  %v9847_v8 = vpop.f32.mrf.mxu1 }
 0x535   :  { %9940 = vst [vmem:[#allocation24_spill] sm:$0xff] %v9847_v8 }
 0x537   :  { %8083 = vmatpush2.bf16.msra.mxu1 %v9244_v36 }
 0x538   :  { %8084 = vmatprep.subr.bf16.mxu1 %v9237_v20  ;;  %v9851_v20 = vld [vmem:[#allocation13] sm:$0xff] }
 0x539   :  { %v4820_v9 = vrot.slane %v9851_v20, %v9568_v48  ;;  %v4828_v40 = vrot.slane %v9851_v20, %v9576_v51  ;;  %v4832_v61 = vrot.slane %v9851_v20, %v9571_v49  ;;  %v4836_v8 = vrot.slane %v9851_v20, %v9629_v59 }
 0x53b   :  { %8085 = vmatpush2.bf16.msra.mxu1 %v9236_v10  ;;  %v7456_v62 = vadd.f32 %v7455_v39, %v4820_v9 }
 0x53c   :  { %8086 = vmatprep.subr.bf16.mxu1 %v9229_v27  ;;  %v4824_v27 = vrot.slane %v9851_v20, %v9565_v47 }
 0x53e   :  { %v7454_v53 = vadd.f32 %v7453_v2, %v4824_v27 }
 0x53f   :  { %8087 = vmatpush2.bf16.msra.mxu1 %v9228_v15  ;;  %v7452_v15 = vadd.f32 %v7451_v24, %v4820_v9 }
 0x540   :  { %8088 = vmatprep.subr.bf16.mxu1 %v9221_v57 }
 0x541   :  { %v7495_v14 = vadd.f32 %v7494_v6, %v7452_v15 }
 0x543   :  { %8089 = vmatpush2.bf16.msra.mxu1 %v9220_v58 }
 0x544   :  { %8090 = vmatprep.subr.bf16.mxu1 %v9213_v42  ;;  %v7624_v42 = vadd.f32 %v7623_v38, %v4828_v40 }
 0x547   :  { %8091 = vmatpush2.bf16.msra.mxu1 %v9212_v55  ;;  %v7458_v55 = vadd.f32 %v7457_v30, %v4824_v27  ;;  %v4840_v27 = vrot.slane %v9851_v20, %v9587_v60 }
 0x548   :  { %8092 = vmatprep.subr.bf16.mxu1 %v9205_v1  ;;  %v7497_v1 = vadd.f32 %v7496_v22, %v7454_v53 }
 0x549   :  { %v7501_v38 = vadd.f32 %v7500_v37, %v7458_v55 }
 0x54a   :  { %v7540_v2 = vadd.f32 %v7539_v4, %v7497_v1 }
 0x54b   :  { %8093 = vmatpush2.bf16.msra.mxu1 %v9204_v34  ;;  %v7667_v34 = vadd.f32 %v7666_v5, %v7624_v42  ;;  %v7499_v5 = vadd.f32 %v9827_v54, %v7456_v62  ;;  %v7544_v4 = vadd.f32 %v9831_v41, %v7501_v38 }
 0x54c   :  { %v7583_v22 = vadd.f32 %v7582_v52, %v7540_v2 }
 0x54d   :  { %v7542_v52 = vadd.f32 %v9829_v63, %v7499_v5 }
 0x54e   :  { %8095 = vmatmul.mubr.bf16.vlgmr.msra.gmra.mxu1 %v9799_v13  ;;  %v7625_v13 = vpop.f32.mrf.mxu0  ;;  %v7838_v21 = vpop.f32.mrf.mxu1  ;;  %v8106_v54 = vmax.f32 %v7583_v22, 0.0 }
 0x54f   :  { %v7585_v41 = vadd.f32 %v9833_v43, %v7542_v52 }
 0x550   :  { %v7627_v25 = vpop.f32.mrf.mxu0  ;;  %v7840_v36 = vpop.f32.mrf.mxu1 }
 0x551   :  { %v7628_v0 = vadd.f32 %v7627_v25, %v4828_v40 }
 0x552   :  { %v7629_v7 = vpop.f32.mrf.mxu0  ;;  %v7842_v10 = vpop.f32.mrf.mxu1 }
 0x553   :  { %v7671_v39 = vadd.f32 %v7670_v23, %v7628_v0  ;;  %v7630_v0 = vadd.f32 %v7629_v7, %v4832_v61 }
 0x554   :  { %v7709_v35 = vpop.f32.mrf.mxu0  ;;  %v9861_v57 = vpop.f32.mrf.mxu1 }
 0x555   :  { %9943 = vst [vmem:[#allocation27_spill] sm:$0xff] %v9861_v57 }
 0x556   :  { %v9837_v17 = vpop.f32.mrf.mxu0 }
 0x558   :  { %v7713_v28 = vpop.f32.mrf.mxu0 }
 0x55a   :  { %v9841_v18 = vpop.f32.mrf.mxu0 }
 0x55b   :  { %9939 = vst [vmem:[#allocation23_spill] sm:$0xff] %v9841_v18 }
 0x55c   :  { %v7795_v26 = vpop.f32.mrf.mxu0 }
 0x55d   :  { %v7796_v9 = vadd.f32 %v7795_v26, %v4836_v8  ;;  %v7714_v26 = vadd.f32 %v7713_v28, %v7671_v39 }
 0x55e   :  { %v7797_v29 = vpop.f32.mrf.mxu0 }
 0x560   :  { %v7799_v45 = vpop.f32.mrf.mxu0 }
 0x561   :  { %v7800_v40 = vadd.f32 %v7799_v45, %v4836_v8 }
 0x562   :  { %v9849_v46 = vpop.f32.mrf.mxu0 }
 0x563   :  { %9941 = vst [vmem:[#allocation25_spill] sm:$0xff] %v9849_v46  ;;  %v9873_v46 = vld [vmem:[#allocation14] sm:$0xff] }
 0x564   :  { %v7881_v33 = vpop.f32.mrf.mxu0  ;;  %v8126_v37 = vrot.slane %v9873_v46, %v9568_v48  ;;  %v7673_v48 = vadd.f32 %v9839_v32, %v7630_v0  ;;  %v8134_v63 = vrot.slane %v9873_v46, %v9576_v51  ;;  %v8138_v32 = vrot.slane %v9873_v46, %v9571_v49 }
 0x566   :  { %v9857_v44 = vpop.f32.mrf.mxu0 }
 0x567   :  { %9942 = vst [vmem:[#allocation26_spill] sm:$0xff] %v9857_v44  ;;  %v7538_v44 = vadd.f32 %v7537_v3, %v7495_v14  ;;  %v7710_v3 = vadd.f32 %v7709_v35, %v7667_v34  ;;  %v7587_v35 = vadd.f32 %v9835_v19, %v7544_v4  ;;  %v7843_v19 = vadd.f32 %v7842_v10, %v7800_v40  ;;  %v9949_v34 = vld [vmem:[#allocation27_spill] sm:$0xff] }
 0x568   :  { %v9863_v50 = vpop.f32.mrf.mxu0  ;;  %v8146_v40 = vrot.slane %v9873_v46, %v9587_v60 }
 0x569   :  { %9944 = vst [vmem:[#allocation28_spill] sm:$0xff] %v9863_v50  ;;  %v7626_v50 = vadd.f32 %v7625_v13, %v4832_v61  ;;  %v7581_v18 = vadd.f32 %v7580_v16, %v7538_v44  ;;  %v8130_v16 = vrot.slane %v9873_v46, %v9565_v47  ;;  %v7753_v13 = vadd.f32 %v7752_v11, %v7710_v3  ;;  %v9946_v61 = vld [vmem:[#allocation23_spill] sm:$0xff] }
 0x56a   :  { %v9869_v24 = vpop.f32.mrf.mxu0  ;;  %v7798_v44 = vadd.f32 %v7797_v29, %v4840_v27  ;;  %v8114_v42 = vmax.f32 %v7587_v35, 0.0  ;;  %v8113_v29 = vmax.f32 %v7585_v41, 0.0  ;;  %v9945_v8 = vld [vmem:[#allocation25_spill] sm:$0xff]  ;;  %v7716_v51 = vadd.f32 %v9946_v61, %v7673_v48 }
 0x56b   :  { %v7669_v30 = vadd.f32 %v7668_v56, %v7626_v50  ;;  %v8105_v25 = vmax.f32 %v7581_v18, 0.0  ;;  %v7839_v56 = vadd.f32 %v7838_v21, %v7796_v9  ;;  %v8107_v11 = vmax.f32 %v7753_v13, 0.0 }
 0x56c   :  { %v7757_v18 = vadd.f32 %v9845_v12, %v7714_v26  ;;  %v7841_v21 = vadd.f32 %v7840_v36, %v7798_v44  ;;  %v8164_v43 = vmul.f32 %v8130_v16, %v8106_v54  ;;  %v7802_v45 = vadd.f32 %v9945_v8, %v4840_v27  ;;  %v9947_v36 = vld [vmem:[#allocation22_spill] sm:$0xff]  ;;  %v9952_v27 = vld [vmem:[#allocation21_spill] sm:$0xff] }
 0x56d   :  { %v7712_v23 = vadd.f32 %v9837_v17, %v7669_v30  ;;  %v7882_v17 = vadd.f32 %v7881_v33, %v7839_v56  ;;  %v8163_v50 = vmul.f32 %v8126_v37, %v8105_v25  ;;  %v4844_v10 = vrot.slane %v9851_v20, %v9947_v36  ;;  %v9948_v33 = vld [vmem:[#allocation24_spill] sm:$0xff] }
 0x56e   :  { %v8115_v12 = vmax.f32 %v7757_v18, 0.0  ;;  %v7759_v1 = vadd.f32 %v9948_v33, %v7716_v51  ;;  %v7845_v2 = vadd.f32 %v9949_v34, %v7802_v45  ;;  %v9950_v22 = vld [vmem:[#allocation26_spill] sm:$0xff]  ;;  %v8172_v9 = vmul.f32 %v8130_v16, %v8114_v42 }
 0x56f   :  { %v7755_v7 = vadd.f32 %v9843_v31, %v7712_v23  ;;  %v8165_v31 = vmul.f32 %v8134_v63, %v8107_v11  ;;  %v7884_v30 = vadd.f32 %v9950_v22, %v7841_v21  ;;  %v8179_v5 = vadd.f32 %v8164_v43, %v8163_v50 }
 0x570   :  { %v9951_v49 = vld [vmem:[#allocation28_spill] sm:$0xff]  ;;  %v8142_v13 = vrot.slane %v9873_v46, %v9629_v59  ;;  %v8171_v56 = vmul.f32 %v8126_v37, %v8113_v29  ;;  %v8173_v26 = vmul.f32 %v8134_v63, %v8115_v12  ;;  %v8116_v41 = vmax.f32 %v7759_v1, 0.0 }
 0x571   :  { %v8108_v55 = vmax.f32 %v7755_v7, 0.0  ;;  %v7886_v39 = vadd.f32 %v9951_v49, %v7843_v19  ;;  %v8180_v54 = vadd.f32 %v8179_v5, %v8165_v31  ;;  %v7888_v16 = vadd.f32 %v9869_v24, %v7845_v2 }
 0x572   :  { %v8188_v44 = vadd.f32 %v8172_v9, %v8171_v56  ;;  %v8174_v63 = vmul.f32 %v8138_v32, %v8116_v41  ;;  %v8154_v12 = vrot.slane %v9873_v46, %v9952_v27 }
 0x573   :  { %v8166_v23 = vmul.f32 %v8138_v32, %v8108_v55 }
 0x574   :  { %v8189_v19 = vadd.f32 %v8188_v44, %v8173_v26 }
 0x576   :  { %v8190_v51 = vadd.f32 %v8189_v19, %v8174_v63 }
 0x57f   :  { %v9875_v6 = vpop.f32.mrf.mxu0 }
 0x580   :  { %v7968_v35 = vadd.f32 %v9875_v6, %v4844_v10  ;;  %v8181_v6 = vadd.f32 %v8180_v54, %v8166_v23 }
 0x581   :  { %v7969_v62 = vpop.f32.mrf.mxu0 }
 0x583   :  { %v7971_v53 = vpop.f32.mrf.mxu0 }
 0x584   :  { %v7972_v18 = vadd.f32 %v7971_v53, %v4844_v10 }
 0x585   :  { %v7973_v38 = vpop.f32.mrf.mxu0 }
 0x58e   :  { %v7924_v58 = vpop.f32.mrf.mxu1 }
 0x58f   :  { %v7925_v14 = vadd.f32 %v7924_v58, %v7882_v17  ;;  %v4848_v58 = vrot.slane %v9851_v20, %v9952_v27 }
 0x590   :  { %v9871_v57 = vpop.f32.mrf.mxu1 }
 0x591   :  { %v8109_v4 = vmax.f32 %v7925_v14, 0.0  ;;  %v7927_v52 = vadd.f32 %v9871_v57, %v7884_v30  ;;  %v7970_v20 = vadd.f32 %v7969_v62, %v4848_v58  ;;  %v7974_v50 = vadd.f32 %v7973_v38, %v4848_v58 }
 0x592   :  { %v7928_v15 = vpop.f32.mrf.mxu1 }
 0x593   :  { %v7929_v0 = vadd.f32 %v7928_v15, %v7886_v39  ;;  %v8167_v11 = vmul.f32 %v8142_v13, %v8109_v4  ;;  %v8110_v57 = vmax.f32 %v7927_v52, 0.0 }
 0x594   :  { %v7930_v47 = vpop.f32.mrf.mxu1 }
 0x595   :  { %v8117_v15 = vmax.f32 %v7929_v0, 0.0  ;;  %v7931_v7 = vadd.f32 %v7930_v47, %v7888_v16  ;;  %v8182_v42 = vadd.f32 %v8181_v6, %v8167_v11  ;;  %v8168_v62 = vmul.f32 %v8146_v40, %v8110_v57 }
 0x596   :  { %v8150_v47 = vrot.slane %v9873_v46, %v9947_v36 }
 0x597   :  { %v8175_v29 = vmul.f32 %v8142_v13, %v8117_v15  ;;  %v8118_v8 = vmax.f32 %v7931_v7, 0.0  ;;  %v8183_v2 = vadd.f32 %v8182_v42, %v8168_v62 }
 0x599   :  { %v8191_v10 = vadd.f32 %v8190_v51, %v8175_v29  ;;  %v8176_v33 = vmul.f32 %v8146_v40, %v8118_v8 }
 0x59b   :  { %v8192_v58 = vadd.f32 %v8191_v10, %v8176_v33 }
 0x5bf   :  { %v8053_v25 = vpop.f32.mrf.mxu0 }
 0x5c1   :  { %v8055_v37 = vpop.f32.mrf.mxu0 }
 0x5c3   :  { %v8057_v60 = vpop.f32.mrf.mxu0 }
 0x5c5   :  { %v8059_v1 = vpop.f32.mrf.mxu0 }
 0x5ce   :  { %v8010_v28 = vpop.f32.mrf.mxu1 }
 0x5cf   :  { %v8011_v59 = vadd.f32 %v8010_v28, %v7968_v35 }
 0x5d0   :  { %v8012_v3 = vpop.f32.mrf.mxu1 }
 0x5d1   :  { %v8013_v21 = vadd.f32 %v8012_v3, %v7970_v20  ;;  %v8054_v43 = vadd.f32 %v8053_v25, %v8011_v59  ;;  %v9262_v25 = vld [vmem:[#allocation2] ss:$0 sm:$0xff] }
 0x5d2   :  { %v8014_v48 = vpop.f32.mrf.mxu1 }
 0x5d3   :  { %v8015_v24 = vadd.f32 %v8014_v48, %v7972_v18  ;;  %v8056_v53 = vadd.f32 %v8055_v37, %v8013_v21 }
 0x5d4   :  { %v8016_v17 = vpop.f32.mrf.mxu1 }
 0x5d5   :  { %v8017_v45 = vadd.f32 %v8016_v17, %v7974_v50  ;;  %v8058_v55 = vadd.f32 %v8057_v60, %v8015_v24 }
 0x5d7   :  { %v8060_v49 = vadd.f32 %v8059_v1, %v8017_v45 }
 0x60e   :  { %v8096_v28 = vpop.f32.mrf.mxu1 }
 0x60f   :  { %v8097_v61 = vadd.f32 %v8096_v28, %v8054_v43 }
 0x610   :  { %v8098_v14 = vpop.f32.mrf.mxu1 }
 0x611   :  { %v8111_v31 = vmax.f32 %v8097_v61, 0.0  ;;  %v8099_v32 = vadd.f32 %v8098_v14, %v8056_v53 }
 0x612   :  { %v8100_v34 = vpop.f32.mrf.mxu1 }
 0x613   :  { %v8169_v38 = vmul.f32 %v8150_v47, %v8111_v31  ;;  %v8112_v22 = vmax.f32 %v8099_v32, 0.0  ;;  %v8101_v30 = vadd.f32 %v8100_v34, %v8058_v55 }
 0x614   :  { %v8102_v39 = vpop.f32.mrf.mxu1 }
 0x615   :  { %v8119_v36 = vmax.f32 %v8101_v30, 0.0  ;;  %v8103_v3 = vadd.f32 %v8102_v39, %v8060_v49  ;;  %v8170_v5 = vmul.f32 %v8154_v12, %v8112_v22  ;;  %v8184_v9 = vadd.f32 %v8183_v2, %v8169_v38 }
 0x617   :  { %v8177_v4 = vmul.f32 %v8150_v47, %v8119_v36  ;;  %v8120_v13 = vmax.f32 %v8103_v3, 0.0  ;;  %v8185_v52 = vadd.f32 %v8184_v9, %v8170_v5 }
 0x619   :  { %v8178_v0 = vmul.f32 %v8154_v12, %v8120_v13  ;;  %8186 = vadd.xlane.f32.xlu0 %v8185_v52  ;;  %v8193_v46 = vadd.f32 %v8192_v58, %v8177_v4 }
 0x61b   :  { %v8194_v27 = vadd.f32 %v8193_v46, %v8178_v0 }
 0x61d   :  { %8195 = vadd.xlane.f32.xlu0 %v8194_v27 }
 0x6a2   :  { %v8187_v56 = vpop.xlane.xlu0 %8186 }
 0x6a3   :  { %v8204_v54 = vadd.f32 %v9262_v25, %v8187_v56 }
 0x6a5   :  { %8207 = vst.msk [vmem:[%s9932_s9] sm:$0xff] %vm8206_vm1, %v8204_v54 }
 0x6a6   :  { %v8196_v35 = vpop.xlane.xlu0 %8195 }
 0x6a7   :  { %v8205_v23 = vadd.f32 %v9262_v25, %v8196_v35 }
 0x6a9   :  { %8208 = vst.msk [vmem:[%s9932_s9 + $0x8] sm:$0xff] %vm8206_vm1, %v8205_v23 }
 0x6aa   :  { %8213 = vsyncpa [#allocation4], 1 }
 0x6ab   :  { %8214 = vsyncpa [#allocation6], 1 }
 0x6ac   :  { %8215 = vsyncpa [#allocation9], 1 }
 0x6ad   :  { %8216 = vsyncpa [#allocation12], 1 }
 0x6ae   :  { %8217 = vsyncpa [#allocation15], 1 }

</bundles_post_ra>
